<compile_context>
chip_gen: v6e
topology: v6e:2x2x1
jax: 0.10.0
libtpu: 0.0.40
codegen_flags: <defaults>
</compile_context>

<pallas_src>
import functools

import jax
import jax.numpy as jnp
from jax.experimental import pallas as pl
from jax.experimental.pallas import tpu as pltpu

K = 5
PAD = K // 2          # 2
BN_EPS = 1e-5
W_LEFT = 8            # sublane-aligned left padding of the pooling buffer


# ---------------------------------------------------------------------------
# Fused SPPF kernel: one batch element per grid step
# ---------------------------------------------------------------------------
def _sppf_fused_kernel(x_ref, w1_ref, b1_ref, w2_ref, b2_ref, o_ref,
                       pad_ref, rowmax_ref, *, H, W, C_mid, Wp):
    """Fused SPPF for one batch element.

    x_ref      : (H*W, C1) bf16      input pixels (rows) x channels
    w1_ref     : (C1, C_mid) bf16    cv1 weight, BN scale folded in
    b1_ref     : (1, C_mid) f32      cv1 folded BN bias
    w2_ref     : (4, C_mid, C2) bf16 cv2 weight, one (C_mid, C2) block/branch
    b2_ref     : (1, C2) f32         cv2 folded BN bias
    o_ref      : (H*W, C2) f32       output block (also the cv2 accumulator)
    pad_ref    : (H, Wp, C_mid) f32  pool input, -inf W-pad, interior @ col 8
    rowmax_ref : (H+4, W, C_mid) f32 W-max intermediate, -inf H-pad rows
    """
    HW = H * W
    HP = H + 2 * PAD
    W_RIGHT = Wp - W_LEFT - W

    # ---- cv1: 1x1 conv (bf16 x bf16 -> f32 MXU) + bias + SiLU (f32) --------
    t = jnp.dot(x_ref[...], w1_ref[...], preferred_element_type=jnp.float32)
    t = t + b1_ref[...]
    x1 = t * jax.nn.sigmoid(t)                              # (HW, C_mid) f32

    # ---- cv2 partial matmul #0 ("x" branch), straight into the out block ---
    o_ref[...] = jnp.dot(x1.astype(jnp.bfloat16), w2_ref[0],
                         preferred_element_type=jnp.float32)

    # ---- border-only -inf init (interiors are fully overwritten below) -----
    pad_ref[:, 0:W_LEFT, :] = jnp.full((H, W_LEFT, C_mid), -jnp.inf,
                                       jnp.float32)
    pad_ref[:, W_LEFT + W:Wp, :] = jnp.full((H, W_RIGHT, C_mid), -jnp.inf,
                                            jnp.float32)
    rowmax_ref[0:PAD, :, :] = jnp.full((PAD, W, C_mid), -jnp.inf, jnp.float32)
    rowmax_ref[PAD + H:HP, :, :] = jnp.full((PAD, W, C_mid), -jnp.inf,
                                            jnp.float32)

    # ---- place cv1 output in the (aligned) interior of the pool buffer -----
    pad_ref[:, W_LEFT:W_LEFT + W, :] = x1.reshape(H, W, C_mid)

    # ---- 3 x (separable 5x5 stride-1 "SAME" max-pool + partial matmul) -----
    for i in range(1, 4):
        # 5-tap max along W: sublane-offset reads over H rows only.
        base = W_LEFT - PAD
        rm = pad_ref[:, base:base + W, :]
        for dx in range(1, K):
            rm = jnp.maximum(rm, pad_ref[:, base + dx:base + dx + W, :])
        rowmax_ref[PAD:PAD + H, :, :] = rm                  # (H, W, C_mid)

        # 5-tap max along H: free major-dim offsets (pad rows are -inf).
        p = rowmax_ref[0:H, :, :]
        for dy in range(1, K):
            p = jnp.maximum(p, rowmax_ref[dy:dy + H, :, :])
        # p == maxpool5(previous tensor), shape (H, W, C_mid), f32

        o_ref[...] += jnp.dot(p.reshape(HW, C_mid).astype(jnp.bfloat16),
                              w2_ref[i], preferred_element_type=jnp.float32)
        if i < 3:
            pad_ref[:, W_LEFT:W_LEFT + W, :] = p            # feed next pool

    # ---- cv2 bias + SiLU (f32) ----------------------------------------------
    y = o_ref[...] + b2_ref[...]
    o_ref[...] = (y * jax.nn.sigmoid(y)).astype(o_ref.dtype)


# ---------------------------------------------------------------------------
# Wrapper
# ---------------------------------------------------------------------------
def sppf_forward(x_nchw, params):
    """SPPF forward. x_nchw: (N, C1, H, W) -> (N, C2, H, W) (f32 output)."""
    N, C1, H, W = x_nchw.shape
    C_mid = params["w1f"].shape[1]
    C2 = params["w2f"].shape[1]
    HW = H * W

    # bf16 MXU operands (f32 accumulation inside the kernel); biases stay f32.
    w1 = params["w1f"].astype(jnp.bfloat16)
    b1 = params["b1f"].astype(jnp.float32).reshape(1, C_mid)
    w2 = params["w2f"].astype(jnp.bfloat16).reshape(4, C_mid, C2)
    b2 = params["b2f"].astype(jnp.float32).reshape(1, C2)

    # Padded pooling-buffer width: interior at sublane offset 8, total width
    # rounded up to a multiple of 8 with >= PAD columns of right padding.
    Wp = ((W_LEFT + W + PAD + 7) // 8) * 8
    HP = H + 2 * PAD

    # NCHW -> (rows, channels); cast to bf16 (halves the kernel's HBM read).
    x_rows = jnp.transpose(x_nchw, (0, 2, 3, 1)).reshape(N, HW, C1)
    x_rows = x_rows.astype(jnp.bfloat16)

    kernel = functools.partial(_sppf_fused_kernel, H=H, W=W, C_mid=C_mid,
                               Wp=Wp)

    # Explicit VMEM budget (double-buffered blocks + weights + scratch).
    est = (2 * HW * C1 * 2                       # x block (bf16), 2 buffers
           + 2 * HW * C2 * 4                     # out block (f32), 2 buffers
           + 2 * (C1 * C_mid + 4 * C_mid * C2) * 2   # weights (bf16)
           + 2 * (C_mid + C2) * 4                # biases (f32)
           + H * Wp * C_mid * 4                  # pad_ref
           + HP * W * C_mid * 4)                 # rowmax_ref
    vmem_limit = int(min(max(2 * est, 8 * 1024 * 1024), 48 * 1024 * 1024))

    out_rows = pl.pallas_call(
        kernel,
        out_shape=jax.ShapeDtypeStruct((N, HW, C2), jnp.float32),
        grid=(N,),
        in_specs=[
            pl.BlockSpec((None, HW, C1), lambda n: (n, 0, 0)),
            pl.BlockSpec((C1, C_mid), lambda n: (0, 0)),
            pl.BlockSpec((1, C_mid), lambda n: (0, 0)),
            pl.BlockSpec((4, C_mid, C2), lambda n: (0, 0, 0)),
            pl.BlockSpec((1, C2), lambda n: (0, 0)),
        ],
        out_specs=pl.BlockSpec((None, HW, C2), lambda n: (n, 0, 0)),
        scratch_shapes=[
            pltpu.VMEM((H, Wp, C_mid), jnp.float32),    # pool input (W-padded)
            pltpu.VMEM((HP, W, C_mid), jnp.float32),    # W-max (H-padded)
        ],
        compiler_params=pltpu.CompilerParams(
            dimension_semantics=("parallel",),
            vmem_limit_bytes=vmem_limit),
    )(x_rows, w1, b1, w2, b2)

    out = out_rows.reshape(N, H, W, C2).astype(x_nchw.dtype)
    return jnp.transpose(out, (0, 3, 1, 2))


# ---------------------------------------------------------------------------
# Pure-JAX reference (independent, full f32) for correctness check
# ---------------------------------------------------------------------------
def sppf_reference(x_nchw, params):
    w1, b1 = params["w1f"], params["b1f"]
    w2, b2 = params["w2f"], params["b2f"]
    x = jnp.transpose(x_nchw, (0, 2, 3, 1))

    def pw(v, w, b):
        y = jnp.einsum("nhwc,cd->nhwd", v, w) + b
        return y * jax.nn.sigmoid(y)

    def mp(v):
        return jax.lax.reduce_window(
            v, -jnp.inf, jax.lax.max, (1, K, K, 1), (1, 1, 1, 1), "SAME")

    x = pw(x, w1, b1)
    y1 = mp(x)
    y2 = mp(y1)
    y3 = mp(y2)
    out = pw(jnp.concatenate([x, y1, y2, y3], axis=-1), w2, b2)
    return jnp.transpose(out, (0, 3, 1, 2))


def _fold_bn_into_weight(w, gamma, beta, mean, var):
    """Fold eval-mode BatchNorm into (conv_weight, bias)."""
    scale = gamma / jnp.sqrt(var + BN_EPS)
    return w * scale[None, :], beta - mean * scale


if __name__ == "__main__":
    key = jax.random.PRNGKey(0)
    N, C1, H, W = 2, 8, 16, 16
    C2 = 8
    C_ = C1 // 2          # cv1 out channels
    CCAT = 4 * C_         # cv2 in channels

    ks = jax.random.split(key, 11)
    x = jax.random.normal(ks[0], (N, C1, H, W), jnp.float32)

    # cv1: 1x1 conv weight (C1 -> C_), plus BN(gamma, beta, running mean/var)
    w1 = 0.2 * jax.random.normal(ks[1], (C1, C_), jnp.float32)
    g1 = 0.5 + jax.random.uniform(ks[2], (C_,), jnp.float32)
    be1 = 0.1 * jax.random.normal(ks[3], (C_,), jnp.float32)
    m1 = 0.1 * jax.random.normal(ks[4], (C_,), jnp.float32)
    v1 = 0.5 + jax.random.uniform(ks[5], (C_,), jnp.float32)

    # cv2: 1x1 conv weight (4*C_ -> C2), plus BN
    w2 = 0.2 * jax.random.normal(ks[6], (CCAT, C2), jnp.float32)
    g2 = 0.5 + jax.random.uniform(ks[7], (C2,), jnp.float32)
    be2 = 0.1 * jax.random.normal(ks[8], (C2,), jnp.float32)
    m2 = 0.1 * jax.random.normal(ks[9], (C2,), jnp.float32)
    v2 = 0.5 + jax.random.uniform(ks[10], (C2,), jnp.float32)

    w1f, b1f = _fold_bn_into_weight(w1, g1, be1, m1, v1)
    w2f, b2f = _fold_bn_into_weight(w2, g2, be2, m2, v2)
    params = {"w1f": w1f, "b1f": b1f, "w2f": w2f, "b2f": b2f}

    out = jax.block_until_ready(sppf_forward(x, params))
    ref = jax.block_until_ready(sppf_reference(x, params))

    assert out.shape == (N, C2, H, W), out.shape
    # Tolerance sized for bf16 matmul operands (f32 accumulation) vs the pure
    # f32 reference; structural bugs would show O(1) differences.
    max_err = float(jnp.max(jnp.abs(out - ref)))
    assert jnp.allclose(out, ref, atol=1e-1, rtol=5e-2), max_err
    print("KERNEL_OK")
</pallas_src>

<mosaic_0001>
module attributes {stable_mosaic.version = 11 : i64} {
  func.func @_sppf_fused_kernel(%arg0: i32, %arg1: memref<1x256x8xbf16, #tpu.memory_space<vmem>>, %arg2: memref<8x4xbf16, #tpu.memory_space<vmem>>, %arg3: memref<1x4xf32, #tpu.memory_space<vmem>>, %arg4: memref<4x4x8xbf16, #tpu.memory_space<vmem>>, %arg5: memref<1x8xf32, #tpu.memory_space<vmem>>, %arg6: memref<1x256x8xf32, #tpu.memory_space<vmem>>, %arg7: memref<16x32x4xf32, #tpu.memory_space<vmem>>, %arg8: memref<20x16x4xf32, #tpu.memory_space<vmem>>) attributes {dimension_semantics = [#tpu.dimension_semantics<parallel>], iteration_bounds = array<i64: 2>, scalar_prefetch = 0 : i64, scratch_operands = 2 : i64, tpu.core_type = #tpu.core_type<tc>, window_params = [{transform_indices = @transform_0, window_bounds = array<i64: 1, 256, 8>}, {pipeline_mode = #tpu.pipeline_mode<synchronous>, transform_indices = @transform_1, window_bounds = array<i64: 8, 4>}, {pipeline_mode = #tpu.pipeline_mode<synchronous>, transform_indices = @transform_2, window_bounds = array<i64: 1, 4>}, {pipeline_mode = #tpu.pipeline_mode<synchronous>, transform_indices = @transform_3, window_bounds = array<i64: 4, 4, 8>}, {pipeline_mode = #tpu.pipeline_mode<synchronous>, transform_indices = @transform_4, window_bounds = array<i64: 1, 8>}, {transform_indices = @transform_5, window_bounds = array<i64: 1, 256, 8>}]} {
    %c0 = arith.constant 0 : index
    %c0_0 = arith.constant 0 : index
    %c0_1 = arith.constant 0 : index
    %0 = vector.load %arg1[%c0, %c0_0, %c0_1] : memref<1x256x8xbf16, #tpu.memory_space<vmem>>, vector<1x256x8xbf16>
    %1 = vector.shape_cast %0 : vector<1x256x8xbf16> to vector<256x8xbf16>
    %c0_2 = arith.constant 0 : index
    %c0_3 = arith.constant 0 : index
    %2 = vector.load %arg2[%c0_2, %c0_3] : memref<8x4xbf16, #tpu.memory_space<vmem>>, vector<8x4xbf16>
    %cst = arith.constant dense<0.000000e+00> : vector<256x4xf32>
    %3 = tpu.matmul %1, %2, %cst {dimension_numbers = #tpu.dot_dimension_numbers<[1], [0], [0], [1], [0, 0, 1, 1], [], []>} : vector<256x8xbf16>, vector<8x4xbf16>, vector<256x4xf32> -> vector<256x4xf32>
    %c0_4 = arith.constant 0 : index
    %c0_5 = arith.constant 0 : index
    %4 = vector.load %arg3[%c0_4, %c0_5] : memref<1x4xf32, #tpu.memory_space<vmem>>, vector<1x4xf32>
    %5 = vector.broadcast %4 : vector<1x4xf32> to vector<256x4xf32>
    %6 = arith.addf %3, %5 : vector<256x4xf32>
    %7 = arith.negf %6 : vector<256x4xf32>
    %8 = math.exp %7 : vector<256x4xf32>
    %cst_6 = arith.constant 1.000000e+00 : f32
    %9 = vector.broadcast %cst_6 : f32 to vector<256x4xf32>
    %10 = arith.addf %9, %8 : vector<256x4xf32>
    %11 = arith.divf %9, %10 : vector<256x4xf32>
    %12 = arith.mulf %6, %11 : vector<256x4xf32>
    %13 = arith.truncf %12 : vector<256x4xf32> to vector<256x4xbf16>
    %c0_7 = arith.constant 0 : index
    %c0_8 = arith.constant 0 : index
    %c0_9 = arith.constant 0 : index
    %14 = vector.load %arg4[%c0_7, %c0_8, %c0_9] : memref<4x4x8xbf16, #tpu.memory_space<vmem>>, vector<1x4x8xbf16>
    %15 = vector.shape_cast %14 : vector<1x4x8xbf16> to vector<4x8xbf16>
    %cst_10 = arith.constant dense<0.000000e+00> : vector<256x8xf32>
    %16 = tpu.matmul %13, %15, %cst_10 {dimension_numbers = #tpu.dot_dimension_numbers<[1], [0], [0], [1], [0, 0, 1, 1], [], []>} : vector<256x4xbf16>, vector<4x8xbf16>, vector<256x8xf32> -> vector<256x8xf32>
    %c0_11 = arith.constant 0 : index
    %c0_12 = arith.constant 0 : index
    %c0_13 = arith.constant 0 : index
    %17 = vector.load %arg6[%c0_11, %c0_12, %c0_13] : memref<1x256x8xf32, #tpu.memory_space<vmem>>, vector<1x256x8xf32>
    %18 = vector.shape_cast %17 : vector<1x256x8xf32> to vector<256x8xf32>
    %19 = vector.shape_cast %16 : vector<256x8xf32> to vector<1x256x8xf32>
    tpu.vector_store %arg6[%c0_11, %c0_12, %c0_13], %19 {strides = array<i32>} : memref<1x256x8xf32, #tpu.memory_space<vmem>>, vector<1x256x8xf32>,
    %cst_14 = arith.constant 0xFF800000 : f32
    %20 = vector.broadcast %cst_14 : f32 to vector<16x8x4xf32>
    %c0_15 = arith.constant 0 : index
    %c0_16 = arith.constant 0 : index
    %c0_17 = arith.constant 0 : index
    %21 = vector.load %arg7[%c0_15, %c0_16, %c0_17] : memref<16x32x4xf32, #tpu.memory_space<vmem>>, vector<16x8x4xf32>
    tpu.vector_store %arg7[%c0_15, %c0_16, %c0_17], %20 {strides = array<i32>} : memref<16x32x4xf32, #tpu.memory_space<vmem>>, vector<16x8x4xf32>,
    %cst_18 = arith.constant 0xFF800000 : f32
    %22 = vector.broadcast %cst_18 : f32 to vector<16x8x4xf32>
    %c0_19 = arith.constant 0 : index
    %c24 = arith.constant 24 : index
    %c0_20 = arith.constant 0 : index
    %23 = vector.load %arg7[%c0_19, %c24, %c0_20] : memref<16x32x4xf32, #tpu.memory_space<vmem>>, vector<16x8x4xf32>
    tpu.vector_store %arg7[%c0_19, %c24, %c0_20], %22 {strides = array<i32>} : memref<16x32x4xf32, #tpu.memory_space<vmem>>, vector<16x8x4xf32>,
    %cst_21 = arith.constant 0xFF800000 : f32
    %24 = vector.broadcast %cst_21 : f32 to vector<2x16x4xf32>
    %c0_22 = arith.constant 0 : index
    %c0_23 = arith.constant 0 : index
    %c0_24 = arith.constant 0 : index
    %25 = vector.load %arg8[%c0_22, %c0_23, %c0_24] : memref<20x16x4xf32, #tpu.memory_space<vmem>>, vector<2x16x4xf32>
    tpu.vector_store %arg8[%c0_22, %c0_23, %c0_24], %24 {strides = array<i32>} : memref<20x16x4xf32, #tpu.memory_space<vmem>>, vector<2x16x4xf32>,
    %cst_25 = arith.constant 0xFF800000 : f32
    %26 = vector.broadcast %cst_25 : f32 to vector<2x16x4xf32>
    %c18 = arith.constant 18 : index
    %c0_26 = arith.constant 0 : index
    %c0_27 = arith.constant 0 : index
    %27 = vector.load %arg8[%c18, %c0_26, %c0_27] : memref<20x16x4xf32, #tpu.memory_space<vmem>>, vector<2x16x4xf32>
    tpu.vector_store %arg8[%c18, %c0_26, %c0_27], %26 {strides = array<i32>} : memref<20x16x4xf32, #tpu.memory_space<vmem>>, vector<2x16x4xf32>,
    %28 = vector.shape_cast %12 : vector<256x4xf32> to vector<16x16x4xf32>
    %c0_28 = arith.constant 0 : index
    %c8 = arith.constant 8 : index
    %c0_29 = arith.constant 0 : index
    %29 = vector.load %arg7[%c0_28, %c8, %c0_29] : memref<16x32x4xf32, #tpu.memory_space<vmem>>, vector<16x16x4xf32>
    tpu.vector_store %arg7[%c0_28, %c8, %c0_29], %28 {strides = array<i32>} : memref<16x32x4xf32, #tpu.memory_space<vmem>>, vector<16x16x4xf32>,
    %c0_30 = arith.constant 0 : index
    %c6 = arith.constant 6 : index
    %c0_31 = arith.constant 0 : index
    %30 = vector.load %arg7[%c0_30, %c6, %c0_31] : memref<16x32x4xf32, #tpu.memory_space<vmem>>, vector<16x16x4xf32>
    %c0_32 = arith.constant 0 : index
    %c7 = arith.constant 7 : index
    %c0_33 = arith.constant 0 : index
    %31 = vector.load %arg7[%c0_32, %c7, %c0_33] : memref<16x32x4xf32, #tpu.memory_space<vmem>>, vector<16x16x4xf32>
    %32 = arith.maximumf %30, %31 : vector<16x16x4xf32>
    %c0_34 = arith.constant 0 : index
    %c8_35 = arith.constant 8 : index
    %c0_36 = arith.constant 0 : index
    %33 = vector.load %arg7[%c0_34, %c8_35, %c0_36] : memref<16x32x4xf32, #tpu.memory_space<vmem>>, vector<16x16x4xf32>
    %34 = arith.maximumf %32, %33 : vector<16x16x4xf32>
    %c0_37 = arith.constant 0 : index
    %c9 = arith.constant 9 : index
    %c0_38 = arith.constant 0 : index
    %35 = vector.load %arg7[%c0_37, %c9, %c0_38] : memref<16x32x4xf32, #tpu.memory_space<vmem>>, vector<16x16x4xf32>
    %36 = arith.maximumf %34, %35 : vector<16x16x4xf32>
    %c0_39 = arith.constant 0 : index
    %c10 = arith.constant 10 : index
    %c0_40 = arith.constant 0 : index
    %37 = vector.load %arg7[%c0_39, %c10, %c0_40] : memref<16x32x4xf32, #tpu.memory_space<vmem>>, vector<16x16x4xf32>
    %38 = arith.maximumf %36, %37 : vector<16x16x4xf32>
    %c2 = arith.constant 2 : index
    %c0_41 = arith.constant 0 : index
    %c0_42 = arith.constant 0 : index
    %39 = vector.load %arg8[%c2, %c0_41, %c0_42] : memref<20x16x4xf32, #tpu.memory_space<vmem>>, vector<16x16x4xf32>
    tpu.vector_store %arg8[%c2, %c0_41, %c0_42], %38 {strides = array<i32>} : memref<20x16x4xf32, #tpu.memory_space<vmem>>, vector<16x16x4xf32>,
    %c0_43 = arith.constant 0 : index
    %c0_44 = arith.constant 0 : index
    %c0_45 = arith.constant 0 : index
    %40 = vector.load %arg8[%c0_43, %c0_44, %c0_45] : memref<20x16x4xf32, #tpu.memory_space<vmem>>, vector<16x16x4xf32>
    %c1 = arith.constant 1 : index
    %c0_46 = arith.constant 0 : index
    %c0_47 = arith.constant 0 : index
    %41 = vector.load %arg8[%c1, %c0_46, %c0_47] : memref<20x16x4xf32, #tpu.memory_space<vmem>>, vector<16x16x4xf32>
    %42 = arith.maximumf %40, %41 : vector<16x16x4xf32>
    %c2_48 = arith.constant 2 : index
    %c0_49 = arith.constant 0 : index
    %c0_50 = arith.constant 0 : index
    %43 = vector.load %arg8[%c2_48, %c0_49, %c0_50] : memref<20x16x4xf32, #tpu.memory_space<vmem>>, vector<16x16x4xf32>
    %44 = arith.maximumf %42, %43 : vector<16x16x4xf32>
    %c3 = arith.constant 3 : index
    %c0_51 = arith.constant 0 : index
    %c0_52 = arith.constant 0 : index
    %45 = vector.load %arg8[%c3, %c0_51, %c0_52] : memref<20x16x4xf32, #tpu.memory_space<vmem>>, vector<16x16x4xf32>
    %46 = arith.maximumf %44, %45 : vector<16x16x4xf32>
    %c4 = arith.constant 4 : index
    %c0_53 = arith.constant 0 : index
    %c0_54 = arith.constant 0 : index
    %47 = vector.load %arg8[%c4, %c0_53, %c0_54] : memref<20x16x4xf32, #tpu.memory_space<vmem>>, vector<16x16x4xf32>
    %48 = arith.maximumf %46, %47 : vector<16x16x4xf32>
    %c0_55 = arith.constant 0 : index
    %c0_56 = arith.constant 0 : index
    %c0_57 = arith.constant 0 : index
    %49 = vector.load %arg6[%c0_55, %c0_56, %c0_57] : memref<1x256x8xf32, #tpu.memory_space<vmem>>, vector<1x256x8xf32>
    %50 = vector.shape_cast %49 : vector<1x256x8xf32> to vector<256x8xf32>
    %51 = vector.shape_cast %48 : vector<16x16x4xf32> to vector<256x4xf32>
    %52 = arith.truncf %51 : vector<256x4xf32> to vector<256x4xbf16>
    %c1_58 = arith.constant 1 : index
    %c0_59 = arith.constant 0 : index
    %c0_60 = arith.constant 0 : index
    %53 = vector.load %arg4[%c1_58, %c0_59, %c0_60] : memref<4x4x8xbf16, #tpu.memory_space<vmem>>, vector<1x4x8xbf16>
    %54 = vector.shape_cast %53 : vector<1x4x8xbf16> to vector<4x8xbf16>
    %cst_61 = arith.constant dense<0.000000e+00> : vector<256x8xf32>
    %55 = tpu.matmul %52, %54, %cst_61 {dimension_numbers = #tpu.dot_dimension_numbers<[1], [0], [0], [1], [0, 0, 1, 1], [], []>} : vector<256x4xbf16>, vector<4x8xbf16>, vector<256x8xf32> -> vector<256x8xf32>
    %56 = arith.addf %50, %55 : vector<256x8xf32>
    %c0_62 = arith.constant 0 : index
    %c0_63 = arith.constant 0 : index
    %c0_64 = arith.constant 0 : index
    %57 = vector.load %arg6[%c0_62, %c0_63, %c0_64] : memref<1x256x8xf32, #tpu.memory_space<vmem>>, vector<1x256x8xf32>
    %58 = vector.shape_cast %57 : vector<1x256x8xf32> to vector<256x8xf32>
    %59 = vector.shape_cast %56 : vector<256x8xf32> to vector<1x256x8xf32>
    tpu.vector_store %arg6[%c0_62, %c0_63, %c0_64], %59 {strides = array<i32>} : memref<1x256x8xf32, #tpu.memory_space<vmem>>, vector<1x256x8xf32>,
    %c0_65 = arith.constant 0 : index
    %c8_66 = arith.constant 8 : index
    %c0_67 = arith.constant 0 : index
    %60 = vector.load %arg7[%c0_65, %c8_66, %c0_67] : memref<16x32x4xf32, #tpu.memory_space<vmem>>, vector<16x16x4xf32>
    tpu.vector_store %arg7[%c0_65, %c8_66, %c0_67], %48 {strides = array<i32>} : memref<16x32x4xf32, #tpu.memory_space<vmem>>, vector<16x16x4xf32>,
    %c0_68 = arith.constant 0 : index
    %c6_69 = arith.constant 6 : index
    %c0_70 = arith.constant 0 : index
    %61 = vector.load %arg7[%c0_68, %c6_69, %c0_70] : memref<16x32x4xf32, #tpu.memory_space<vmem>>, vector<16x16x4xf32>
    %c0_71 = arith.constant 0 : index
    %c7_72 = arith.constant 7 : index
    %c0_73 = arith.constant 0 : index
    %62 = vector.load %arg7[%c0_71, %c7_72, %c0_73] : memref<16x32x4xf32, #tpu.memory_space<vmem>>, vector<16x16x4xf32>
    %63 = arith.maximumf %61, %62 : vector<16x16x4xf32>
    %c0_74 = arith.constant 0 : index
    %c8_75 = arith.constant 8 : index
    %c0_76 = arith.constant 0 : index
    %64 = vector.load %arg7[%c0_74, %c8_75, %c0_76] : memref<16x32x4xf32, #tpu.memory_space<vmem>>, vector<16x16x4xf32>
    %65 = arith.maximumf %63, %64 : vector<16x16x4xf32>
    %c0_77 = arith.constant 0 : index
    %c9_78 = arith.constant 9 : index
    %c0_79 = arith.constant 0 : index
    %66 = vector.load %arg7[%c0_77, %c9_78, %c0_79] : memref<16x32x4xf32, #tpu.memory_space<vmem>>, vector<16x16x4xf32>
    %67 = arith.maximumf %65, %66 : vector<16x16x4xf32>
    %c0_80 = arith.constant 0 : index
    %c10_81 = arith.constant 10 : index
    %c0_82 = arith.constant 0 : index
    %68 = vector.load %arg7[%c0_80, %c10_81, %c0_82] : memref<16x32x4xf32, #tpu.memory_space<vmem>>, vector<16x16x4xf32>
    %69 = arith.maximumf %67, %68 : vector<16x16x4xf32>
    %c2_83 = arith.constant 2 : index
    %c0_84 = arith.constant 0 : index
    %c0_85 = arith.constant 0 : index
    %70 = vector.load %arg8[%c2_83, %c0_84, %c0_85] : memref<20x16x4xf32, #tpu.memory_space<vmem>>, vector<16x16x4xf32>
    tpu.vector_store %arg8[%c2_83, %c0_84, %c0_85], %69 {strides = array<i32>} : memref<20x16x4xf32, #tpu.memory_space<vmem>>, vector<16x16x4xf32>,
    %c0_86 = arith.constant 0 : index
    %c0_87 = arith.constant 0 : index
    %c0_88 = arith.constant 0 : index
    %71 = vector.load %arg8[%c0_86, %c0_87, %c0_88] : memref<20x16x4xf32, #tpu.memory_space<vmem>>, vector<16x16x4xf32>
    %c1_89 = arith.constant 1 : index
    %c0_90 = arith.constant 0 : index
    %c0_91 = arith.constant 0 : index
    %72 = vector.load %arg8[%c1_89, %c0_90, %c0_91] : memref<20x16x4xf32, #tpu.memory_space<vmem>>, vector<16x16x4xf32>
    %73 = arith.maximumf %71, %72 : vector<16x16x4xf32>
    %c2_92 = arith.constant 2 : index
    %c0_93 = arith.constant 0 : index
    %c0_94 = arith.constant 0 : index
    %74 = vector.load %arg8[%c2_92, %c0_93, %c0_94] : memref<20x16x4xf32, #tpu.memory_space<vmem>>, vector<16x16x4xf32>
    %75 = arith.maximumf %73, %74 : vector<16x16x4xf32>
    %c3_95 = arith.constant 3 : index
    %c0_96 = arith.constant 0 : index
    %c0_97 = arith.constant 0 : index
    %76 = vector.load %arg8[%c3_95, %c0_96, %c0_97] : memref<20x16x4xf32, #tpu.memory_space<vmem>>, vector<16x16x4xf32>
    %77 = arith.maximumf %75, %76 : vector<16x16x4xf32>
    %c4_98 = arith.constant 4 : index
    %c0_99 = arith.constant 0 : index
    %c0_100 = arith.constant 0 : index
    %78 = vector.load %arg8[%c4_98, %c0_99, %c0_100] : memref<20x16x4xf32, #tpu.memory_space<vmem>>, vector<16x16x4xf32>
    %79 = arith.maximumf %77, %78 : vector<16x16x4xf32>
    %c0_101 = arith.constant 0 : index
    %c0_102 = arith.constant 0 : index
    %c0_103 = arith.constant 0 : index
    %80 = vector.load %arg6[%c0_101, %c0_102, %c0_103] : memref<1x256x8xf32, #tpu.memory_space<vmem>>, vector<1x256x8xf32>
    %81 = vector.shape_cast %80 : vector<1x256x8xf32> to vector<256x8xf32>
    %82 = vector.shape_cast %79 : vector<16x16x4xf32> to vector<256x4xf32>
    %83 = arith.truncf %82 : vector<256x4xf32> to vector<256x4xbf16>
    %c2_104 = arith.constant 2 : index
    %c0_105 = arith.constant 0 : index
    %c0_106 = arith.constant 0 : index
    %84 = vector.load %arg4[%c2_104, %c0_105, %c0_106] : memref<4x4x8xbf16, #tpu.memory_space<vmem>>, vector<1x4x8xbf16>
    %85 = vector.shape_cast %84 : vector<1x4x8xbf16> to vector<4x8xbf16>
    %cst_107 = arith.constant dense<0.000000e+00> : vector<256x8xf32>
    %86 = tpu.matmul %83, %85, %cst_107 {dimension_numbers = #tpu.dot_dimension_numbers<[1], [0], [0], [1], [0, 0, 1, 1], [], []>} : vector<256x4xbf16>, vector<4x8xbf16>, vector<256x8xf32> -> vector<256x8xf32>
    %87 = arith.addf %81, %86 : vector<256x8xf32>
    %c0_108 = arith.constant 0 : index
    %c0_109 = arith.constant 0 : index
    %c0_110 = arith.constant 0 : index
    %88 = vector.load %arg6[%c0_108, %c0_109, %c0_110] : memref<1x256x8xf32, #tpu.memory_space<vmem>>, vector<1x256x8xf32>
    %89 = vector.shape_cast %88 : vector<1x256x8xf32> to vector<256x8xf32>
    %90 = vector.shape_cast %87 : vector<256x8xf32> to vector<1x256x8xf32>
    tpu.vector_store %arg6[%c0_108, %c0_109, %c0_110], %90 {strides = array<i32>} : memref<1x256x8xf32, #tpu.memory_space<vmem>>, vector<1x256x8xf32>,
    %c0_111 = arith.constant 0 : index
    %c8_112 = arith.constant 8 : index
    %c0_113 = arith.constant 0 : index
    %91 = vector.load %arg7[%c0_111, %c8_112, %c0_113] : memref<16x32x4xf32, #tpu.memory_space<vmem>>, vector<16x16x4xf32>
    tpu.vector_store %arg7[%c0_111, %c8_112, %c0_113], %79 {strides = array<i32>} : memref<16x32x4xf32, #tpu.memory_space<vmem>>, vector<16x16x4xf32>,
    %c0_114 = arith.constant 0 : index
    %c6_115 = arith.constant 6 : index
    %c0_116 = arith.constant 0 : index
    %92 = vector.load %arg7[%c0_114, %c6_115, %c0_116] : memref<16x32x4xf32, #tpu.memory_space<vmem>>, vector<16x16x4xf32>
    %c0_117 = arith.constant 0 : index
    %c7_118 = arith.constant 7 : index
    %c0_119 = arith.constant 0 : index
    %93 = vector.load %arg7[%c0_117, %c7_118, %c0_119] : memref<16x32x4xf32, #tpu.memory_space<vmem>>, vector<16x16x4xf32>
    %94 = arith.maximumf %92, %93 : vector<16x16x4xf32>
    %c0_120 = arith.constant 0 : index
    %c8_121 = arith.constant 8 : index
    %c0_122 = arith.constant 0 : index
    %95 = vector.load %arg7[%c0_120, %c8_121, %c0_122] : memref<16x32x4xf32, #tpu.memory_space<vmem>>, vector<16x16x4xf32>
    %96 = arith.maximumf %94, %95 : vector<16x16x4xf32>
    %c0_123 = arith.constant 0 : index
    %c9_124 = arith.constant 9 : index
    %c0_125 = arith.constant 0 : index
    %97 = vector.load %arg7[%c0_123, %c9_124, %c0_125] : memref<16x32x4xf32, #tpu.memory_space<vmem>>, vector<16x16x4xf32>
    %98 = arith.maximumf %96, %97 : vector<16x16x4xf32>
    %c0_126 = arith.constant 0 : index
    %c10_127 = arith.constant 10 : index
    %c0_128 = arith.constant 0 : index
    %99 = vector.load %arg7[%c0_126, %c10_127, %c0_128] : memref<16x32x4xf32, #tpu.memory_space<vmem>>, vector<16x16x4xf32>
    %100 = arith.maximumf %98, %99 : vector<16x16x4xf32>
    %c2_129 = arith.constant 2 : index
    %c0_130 = arith.constant 0 : index
    %c0_131 = arith.constant 0 : index
    %101 = vector.load %arg8[%c2_129, %c0_130, %c0_131] : memref<20x16x4xf32, #tpu.memory_space<vmem>>, vector<16x16x4xf32>
    tpu.vector_store %arg8[%c2_129, %c0_130, %c0_131], %100 {strides = array<i32>} : memref<20x16x4xf32, #tpu.memory_space<vmem>>, vector<16x16x4xf32>,
    %c0_132 = arith.constant 0 : index
    %c0_133 = arith.constant 0 : index
    %c0_134 = arith.constant 0 : index
    %102 = vector.load %arg8[%c0_132, %c0_133, %c0_134] : memref<20x16x4xf32, #tpu.memory_space<vmem>>, vector<16x16x4xf32>
    %c1_135 = arith.constant 1 : index
    %c0_136 = arith.constant 0 : index
    %c0_137 = arith.constant 0 : index
    %103 = vector.load %arg8[%c1_135, %c0_136, %c0_137] : memref<20x16x4xf32, #tpu.memory_space<vmem>>, vector<16x16x4xf32>
    %104 = arith.maximumf %102, %103 : vector<16x16x4xf32>
    %c2_138 = arith.constant 2 : index
    %c0_139 = arith.constant 0 : index
    %c0_140 = arith.constant 0 : index
    %105 = vector.load %arg8[%c2_138, %c0_139, %c0_140] : memref<20x16x4xf32, #tpu.memory_space<vmem>>, vector<16x16x4xf32>
    %106 = arith.maximumf %104, %105 : vector<16x16x4xf32>
    %c3_141 = arith.constant 3 : index
    %c0_142 = arith.constant 0 : index
    %c0_143 = arith.constant 0 : index
    %107 = vector.load %arg8[%c3_141, %c0_142, %c0_143] : memref<20x16x4xf32, #tpu.memory_space<vmem>>, vector<16x16x4xf32>
    %108 = arith.maximumf %106, %107 : vector<16x16x4xf32>
    %c4_144 = arith.constant 4 : index
    %c0_145 = arith.constant 0 : index
    %c0_146 = arith.constant 0 : index
    %109 = vector.load %arg8[%c4_144, %c0_145, %c0_146] : memref<20x16x4xf32, #tpu.memory_space<vmem>>, vector<16x16x4xf32>
    %110 = arith.maximumf %108, %109 : vector<16x16x4xf32>
    %c0_147 = arith.constant 0 : index
    %c0_148 = arith.constant 0 : index
    %c0_149 = arith.constant 0 : index
    %111 = vector.load %arg6[%c0_147, %c0_148, %c0_149] : memref<1x256x8xf32, #tpu.memory_space<vmem>>, vector<1x256x8xf32>
    %112 = vector.shape_cast %111 : vector<1x256x8xf32> to vector<256x8xf32>
    %113 = vector.shape_cast %110 : vector<16x16x4xf32> to vector<256x4xf32>
    %114 = arith.truncf %113 : vector<256x4xf32> to vector<256x4xbf16>
    %c3_150 = arith.constant 3 : index
    %c0_151 = arith.constant 0 : index
    %c0_152 = arith.constant 0 : index
    %115 = vector.load %arg4[%c3_150, %c0_151, %c0_152] : memref<4x4x8xbf16, #tpu.memory_space<vmem>>, vector<1x4x8xbf16>
    %116 = vector.shape_cast %115 : vector<1x4x8xbf16> to vector<4x8xbf16>
    %cst_153 = arith.constant dense<0.000000e+00> : vector<256x8xf32>
    %117 = tpu.matmul %114, %116, %cst_153 {dimension_numbers = #tpu.dot_dimension_numbers<[1], [0], [0], [1], [0, 0, 1, 1], [], []>} : vector<256x4xbf16>, vector<4x8xbf16>, vector<256x8xf32> -> vector<256x8xf32>
    %118 = arith.addf %112, %117 : vector<256x8xf32>
    %c0_154 = arith.constant 0 : index
    %c0_155 = arith.constant 0 : index
    %c0_156 = arith.constant 0 : index
    %119 = vector.load %arg6[%c0_154, %c0_155, %c0_156] : memref<1x256x8xf32, #tpu.memory_space<vmem>>, vector<1x256x8xf32>
    %120 = vector.shape_cast %119 : vector<1x256x8xf32> to vector<256x8xf32>
    %121 = vector.shape_cast %118 : vector<256x8xf32> to vector<1x256x8xf32>
    tpu.vector_store %arg6[%c0_154, %c0_155, %c0_156], %121 {strides = array<i32>} : memref<1x256x8xf32, #tpu.memory_space<vmem>>, vector<1x256x8xf32>,
    %c0_157 = arith.constant 0 : index
    %c0_158 = arith.constant 0 : index
    %c0_159 = arith.constant 0 : index
    %122 = vector.load %arg6[%c0_157, %c0_158, %c0_159] : memref<1x256x8xf32, #tpu.memory_space<vmem>>, vector<1x256x8xf32>
    %123 = vector.shape_cast %122 : vector<1x256x8xf32> to vector<256x8xf32>
    %c0_160 = arith.constant 0 : index
    %c0_161 = arith.constant 0 : index
    %124 = vector.load %arg5[%c0_160, %c0_161] : memref<1x8xf32, #tpu.memory_space<vmem>>, vector<1x8xf32>
    %125 = vector.broadcast %124 : vector<1x8xf32> to vector<256x8xf32>
    %126 = arith.addf %123, %125 : vector<256x8xf32>
    %127 = arith.negf %126 : vector<256x8xf32>
    %128 = math.exp %127 : vector<256x8xf32>
    %cst_162 = arith.constant 1.000000e+00 : f32
    %129 = vector.broadcast %cst_162 : f32 to vector<256x8xf32>
    %130 = arith.addf %129, %128 : vector<256x8xf32>
    %131 = arith.divf %129, %130 : vector<256x8xf32>
    %132 = arith.mulf %126, %131 : vector<256x8xf32>
    %c0_163 = arith.constant 0 : index
    %c0_164 = arith.constant 0 : index
    %c0_165 = arith.constant 0 : index
    %133 = vector.load %arg6[%c0_163, %c0_164, %c0_165] : memref<1x256x8xf32, #tpu.memory_space<vmem>>, vector<1x256x8xf32>
    %134 = vector.shape_cast %133 : vector<1x256x8xf32> to vector<256x8xf32>
    %135 = vector.shape_cast %132 : vector<256x8xf32> to vector<1x256x8xf32>
    tpu.vector_store %arg6[%c0_163, %c0_164, %c0_165], %135 {strides = array<i32>} : memref<1x256x8xf32, #tpu.memory_space<vmem>>, vector<1x256x8xf32>,
    return
  }
  func.func @transform_0(%arg0: i32) -> (i32, i32, i32) {
    %c0_i32 = arith.constant 0 : i32
    %c0_i32_0 = arith.constant 0 : i32
    %c0_i32_1 = arith.constant 0 : i32
    return %arg0, %c0_i32, %c0_i32_0 : i32, i32, i32
  }
  func.func @transform_1(%arg0: i32) -> (i32, i32) {
    %c0_i32 = arith.constant 0 : i32
    %c0_i32_0 = arith.constant 0 : i32
    %c0_i32_1 = arith.constant 0 : i32
    return %c0_i32, %c0_i32_0 : i32, i32
  }
  func.func @transform_2(%arg0: i32) -> (i32, i32) {
    %c0_i32 = arith.constant 0 : i32
    %c0_i32_0 = arith.constant 0 : i32
    %c0_i32_1 = arith.constant 0 : i32
    return %c0_i32, %c0_i32_0 : i32, i32
  }
  func.func @transform_3(%arg0: i32) -> (i32, i32, i32) {
    %c0_i32 = arith.constant 0 : i32
    %c0_i32_0 = arith.constant 0 : i32
    %c0_i32_1 = arith.constant 0 : i32
    %c0_i32_2 = arith.constant 0 : i32
    return %c0_i32, %c0_i32_0, %c0_i32_1 : i32, i32, i32
  }
  func.func @transform_4(%arg0: i32) -> (i32, i32) {
    %c0_i32 = arith.constant 0 : i32
    %c0_i32_0 = arith.constant 0 : i32
    %c0_i32_1 = arith.constant 0 : i32
    return %c0_i32, %c0_i32_0 : i32, i32
  }
  func.func @transform_5(%arg0: i32) -> (i32, i32, i32) {
    %c0_i32 = arith.constant 0 : i32
    %c0_i32_0 = arith.constant 0 : i32
    %c0_i32_1 = arith.constant 0 : i32
    return %arg0, %c0_i32, %c0_i32_0 : i32, i32, i32
  }
}

</mosaic_0001>

<bundles_post_ra>
// kernel: tpu_custom_call.1
= control target key start
LH: loop header
LB: loop body
LE: loop exit
PB: predicated region body
PF: predicated region fallthrough
CT: control target
= control target key end

     0   :  { %s5137_s18 = smov 0   ;;  %s7239_s0 = inlined_call_operand.vmem [shape: bf16[2,256,8], index: 0, kind: input, shape index: {}]   ;;  %s7240_s1 = inlined_call_operand.vmem [shape: bf16[8,4], index: 1, kind: input, shape index: {}]   ;;  %s7241_s2 = inlined_call_operand.vmem [shape: f32[1,4], index: 2, kind: input, shape index: {}]   ;;  %s7242_s3 = inlined_call_operand.vmem [shape: bf16[4,4,8], index: 3, kind: input, shape index: {}]   ;;  %s7243_s4 = inlined_call_operand.vmem [shape: f32[1,8], index: 4, kind: input, shape index: {}]   ;;  %s7244_s5 = inlined_call_operand.vmem [shape: f32[2,256,8], index: 5, kind: output, shape index: {}]  }
   0x1 LB: > { %s4372_s19 = sadd.s32 4294967295, %s5104_s18   ;;  %p4376_p0 = scmp.ge.s32.totalorder %s5104_s18, 1  ;;  %s5104_s18 = sphi %s5137_s18, %s15_s18  }
   0x2   : > { %p187_p1 = scmp.lt.s32.totalorder %s5104_s18, 3 }
   0x4   : > { %p188_p2 = pnand %p4376_p0, %p187_p1 }
   0x5   : > { %p215_p3 = scmp.lt.s32.totalorder (!%p188_p2), %s4372_s19, 1 }
   0x6   : > { %191 = sbr.rel (%p188_p2) target bundleno = 840 (0x348), region = 40 }
   0xb   : > { %v258_v0 = vld [vmem:[%s7240_s1] sm:$0xf]  ;;  %vm395_vm0 = vcmask 1043456   ;;  %s7261_s19 = smov (!%p215_p3, %s4372_s19), 1  ;;  %vm346_vm1 = vcmask 64512   ;;  %vm801_vm2 = vcmask 31744  }
   0xc   : > { %4807 = vmatprep.subr.msk.bf16.mxu0 %vm395_vm0, %v258_v0  ;;  %4808 = vmatprep.subr.msk.bf16.mxu1 %vm395_vm0, %v258_v0  ;;  %v397_v1 = vsel %vm395_vm0, %v258_v0, 0  ;;  %s4548_s22 = sshll.u32 %s7261_s19, 7  ;;  %v5106_v18 = vmov -inf   ;;  %v800_v19 = vld [vmem:[%s7242_s3] sm:$0x3]  ;;  %vm850_vm3 = vcmask 1041408  }
   0xd   : > { %4636 = vmatpush3.bf16.msra.mxu0 %v397_v1  ;;  %4806 = vmatpush3.bf16.msra.mxu1 %v397_v1  ;;  %s5154_s25 = scalar_lea.vmem %s7239_s0, %s4548_s22  ;;  %1048 = vst.msk [vmem:[#allocation2 + $0x20] sm:$0xff] %vm801_vm2, %v5106_v18  ;;  %1047 = vst.msk [vmem:[#allocation2] sm:$0xff] %vm801_vm2, %v5106_v18  ;;  %v852_v20 = vsel %vm850_vm3, %v800_v19, 0  ;;  %v4462_v21 = vld [vmem:[%s7242_s3 + $0x2] sm:$0x3]  ;;  %s4549_s11 = sshll.u32 %s7261_s19, 8 }
   0xe   : > { %v4822_v2 = vld [vmem:[%s5154_s25] sm:$0xff]   ;;  %v4824_v4 = vld [vmem:[%s5154_s25 + $0x8] sm:$0xff]   ;;  %v4826_v6 = vld [vmem:[%s5154_s25 + $0x10] sm:$0xff]   ;;  %1049 = vst.msk [vmem:[#allocation2 + $0x40] sm:$0xff] %vm801_vm2, %v5106_v18  ;;  %4809 = vmatprep.subr.msk.bf16.mxu1 %vm850_vm3, %v800_v19  ;;  %4810 = vmatprep.subr.msk.bf16.mxu0 %vm850_vm3, %v4462_v21  ;;  %v1831_v22 = vsel %vm850_vm3, %v4462_v21, 0  ;;  %s6499_s14 = scalar_lea.vmem %s7244_s5, %s4549_s11 }
   0xf   : > { %v4823_v3 = vld [vmem:[%s5154_s25 + $0x40] sm:$0xff]   ;;  %4637 = vmatprep.mubr.msk.bf16.mxu0 %vm346_vm1, %v4822_v2  ;;  %v4825_v5 = vld [vmem:[%s5154_s25 + $0x48] sm:$0xff]   ;;  %v4827_v7 = vld [vmem:[%s5154_s25 + $0x50] sm:$0xff]   ;;  %1050 = vst.msk [vmem:[#allocation2 + $0x60] sm:$0xff] %vm801_vm2, %v5106_v18 }
  0x10   : > { %4653 = vmatprep.mubr.msk.bf16.mxu1 %vm346_vm1, %v4823_v3  ;;  %4638 = vmatmul.mubr.msk.bf16.vlgmr.msra.gmra.mxu0 %vm346_vm1, %v4824_v4  ;;  %v4828_v8 = vld [vmem:[%s5154_s25 + $0x18] sm:$0xff]   ;;  %v4830_v10 = vld [vmem:[%s5154_s25 + $0x20] sm:$0xff]   ;;  %v4832_v12 = vld [vmem:[%s5154_s25 + $0x28] sm:$0xff]   ;;  %1051 = vst.msk [vmem:[#allocation2 + $0x80] sm:$0xff] %vm801_vm2, %v5106_v18 }
  0x11   : > { %4654 = vmatmul.mubr.msk.bf16.vlgmr.msra.gmra.mxu1 %vm346_vm1, %v4825_v5  ;;  %4641 = vmatprep.mubr.msk.bf16.mxu0 %vm346_vm1, %v4826_v6  ;;  %v4829_v9 = vld [vmem:[%s5154_s25 + $0x58] sm:$0xff]   ;;  %v4831_v11 = vld [vmem:[%s5154_s25 + $0x60] sm:$0xff]   ;;  %v4833_v13 = vld [vmem:[%s5154_s25 + $0x68] sm:$0xff]   ;;  %1052 = vst.msk [vmem:[#allocation2 + $0xa0] sm:$0xff] %vm801_vm2, %v5106_v18 }
  0x12   : > { %4657 = vmatprep.mubr.msk.bf16.mxu1 %vm346_vm1, %v4827_v7  ;;  %v4834_v14 = vld [vmem:[%s5154_s25 + $0x30] sm:$0xff]   ;;  %v4836_v16 = vld [vmem:[%s5154_s25 + $0x38] sm:$0xff]   ;;  %1053 = vst.msk [vmem:[#allocation2 + $0xc0] sm:$0xff] %vm801_vm2, %v5106_v18  ;;  %1054 = vst.msk [vmem:[#allocation2 + $0xe0] sm:$0xff] %vm801_vm2, %v5106_v18  ;;  %4670 = vmatpush3.bf16.msra.mxu1 %v852_v20 }
  0x13   : > { %v4835_v15 = vld [vmem:[%s5154_s25 + $0x70] sm:$0xff]   ;;  %v4837_v17 = vld [vmem:[%s5154_s25 + $0x78] sm:$0xff]   ;;  %1055 = vst.msk [vmem:[#allocation2 + $0x100] sm:$0xff] %vm801_vm2, %v5106_v18  ;;  %1056 = vst.msk [vmem:[#allocation2 + $0x120] sm:$0xff] %vm801_vm2, %v5106_v18  ;;  %4704 = vmatpush3.bf16.msra.mxu0 %v1831_v22 }
  0x14   : > { %1057 = vst.msk [vmem:[#allocation2 + $0x140] sm:$0xff] %vm801_vm2, %v5106_v18  ;;  %1058 = vst.msk [vmem:[#allocation2 + $0x160] sm:$0xff] %vm801_vm2, %v5106_v18  ;;  %v5241_v23 = vld [vmem:[%s7242_s3 + $0x4] sm:$0x3]  ;;  %v4496_v24 = vld [vmem:[%s7242_s3 + $0x6] sm:$0x3] }
  0x15   : > { %1059 = vst.msk [vmem:[#allocation2 + $0x180] sm:$0xff] %vm801_vm2, %v5106_v18  ;;  %1060 = vst.msk [vmem:[#allocation2 + $0x1a0] sm:$0xff] %vm801_vm2, %v5106_v18  ;;  %v5249_v25 = vld [vmem:[%s7241_s2] ss:$0 sm:$0xff]  ;;  %4811 = vmatprep.subr.msk.bf16.mxu1 %vm850_vm3, %v5241_v23  ;;  %4812 = vmatprep.subr.msk.bf16.mxu0 %vm850_vm3, %v4496_v24  ;;  %v5255_v26 = vsel %vm850_vm3, %v4496_v24, 0 }
  0x16   : > { %1061 = vst.msk [vmem:[#allocation2 + $0x1c0] sm:$0xff] %vm801_vm2, %v5106_v18  ;;  %1062 = vst.msk [vmem:[#allocation2 + $0x1e0] sm:$0xff] %vm801_vm2, %v5106_v18 }
  0x17   : > { %1063 = vst.msk [vmem:[#allocation2 + $0x18] sm:$0xff] %vm801_vm2, %v5106_v18  ;;  %1064 = vst.msk [vmem:[#allocation2 + $0x38] sm:$0xff] %vm801_vm2, %v5106_v18 }
  0x18   : > { %4642 = vmatmul.mubr.msk.bf16.gmra.mxu0 %vm346_vm1, %v4828_v8  ;;  %1065 = vst.msk [vmem:[#allocation2 + $0x58] sm:$0xff] %vm801_vm2, %v5106_v18  ;;  %1066 = vst.msk [vmem:[#allocation2 + $0x78] sm:$0xff] %vm801_vm2, %v5106_v18 }
  0x19   : > { %4658 = vmatmul.mubr.msk.bf16.gmra.mxu1 %vm346_vm1, %v4829_v9  ;;  %4645 = vmatprep.mubr.msk.bf16.mxu0 %vm346_vm1, %v4830_v10  ;;  %1067 = vst.msk [vmem:[#allocation2 + $0x98] sm:$0xff] %vm801_vm2, %v5106_v18  ;;  %1068 = vst.msk [vmem:[#allocation2 + $0xb8] sm:$0xff] %vm801_vm2, %v5106_v18 }
  0x1a   : > { %4661 = vmatprep.mubr.msk.bf16.mxu1 %vm346_vm1, %v4831_v11  ;;  %1069 = vst.msk [vmem:[#allocation2 + $0xd8] sm:$0xff] %vm801_vm2, %v5106_v18  ;;  %1070 = vst.msk [vmem:[#allocation2 + $0xf8] sm:$0xff] %vm801_vm2, %v5106_v18 }
  0x1b   : > { %1071 = vst.msk [vmem:[#allocation2 + $0x118] sm:$0xff] %vm801_vm2, %v5106_v18  ;;  %1072 = vst.msk [vmem:[#allocation2 + $0x138] sm:$0xff] %vm801_vm2, %v5106_v18 }
  0x1c   : > { %1073 = vst.msk [vmem:[#allocation2 + $0x158] sm:$0xff] %vm801_vm2, %v5106_v18  ;;  %1074 = vst.msk [vmem:[#allocation2 + $0x178] sm:$0xff] %vm801_vm2, %v5106_v18 }
  0x1d   : > { %1075 = vst.msk [vmem:[#allocation2 + $0x198] sm:$0xff] %vm801_vm2, %v5106_v18  ;;  %1076 = vst.msk [vmem:[#allocation2 + $0x1b8] sm:$0xff] %vm801_vm2, %v5106_v18 }
  0x1e   : > { %1077 = vst.msk [vmem:[#allocation2 + $0x1d8] sm:$0xff] %vm801_vm2, %v5106_v18  ;;  %1078 = vst.msk [vmem:[#allocation2 + $0x1f8] sm:$0xff] %vm801_vm2, %v5106_v18 }
  0x1f   : > { %1079 = vst.msk [vmem:[#allocation3] sm:$0xff] %vm801_vm2, %v5106_v18  ;;  %1080 = vst.msk [vmem:[#allocation3 + $0x8] sm:$0xff] %vm801_vm2, %v5106_v18 }
  0x20   : > { %4646 = vmatmul.mubr.msk.bf16.gmra.mxu0 %vm346_vm1, %v4832_v12  ;;  %1081 = vst.msk [vmem:[#allocation3 + $0x10] sm:$0xff] %vm801_vm2, %v5106_v18  ;;  %1082 = vst.msk [vmem:[#allocation3 + $0x18] sm:$0xff] %vm801_vm2, %v5106_v18 }
  0x21   : > { %4662 = vmatmul.mubr.msk.bf16.gmra.mxu1 %vm346_vm1, %v4833_v13  ;;  %4649 = vmatprep.mubr.msk.bf16.mxu0 %vm346_vm1, %v4834_v14  ;;  %1084 = vst.msk [vmem:[#allocation3 + $0x120] sm:$0xff] %vm801_vm2, %v5106_v18  ;;  %1085 = vst.msk [vmem:[#allocation3 + $0x128] sm:$0xff] %vm801_vm2, %v5106_v18 }
  0x22   : > { %4665 = vmatprep.mubr.msk.bf16.mxu1 %vm346_vm1, %v4835_v15  ;;  %1086 = vst.msk [vmem:[#allocation3 + $0x130] sm:$0xff] %vm801_vm2, %v5106_v18  ;;  %1087 = vst.msk [vmem:[#allocation3 + $0x138] sm:$0xff] %vm801_vm2, %v5106_v18 }
  0x28   : > { %4650 = vmatmul.mubr.msk.bf16.gmra.mxu0 %vm346_vm1, %v4836_v16 }
  0x29   : > { %4666 = vmatmul.mubr.msk.bf16.gmra.mxu1 %vm346_vm1, %v4837_v17 }
  0xd0   : > { %v4639_v27 = vpop.f32.mrf.mxu0 }
  0xd1   : > { %v5258_v28 = vadd.f32 %v4639_v27, %v5249_v25  ;;  %v4655_v29 = vpop.f32.mrf.mxu1 }
  0xd2   : > { %v5261_v30 = vadd.f32 %v4655_v29, %v5249_v25  ;;  %v433_v31 = vpop.f32.mrf.mxu0 }
  0xd3   : > { %v4416_v32 = vmul.f32 -1.442695, %v5258_v28  ;;  %v5265_v33 = vadd.f32 %v5249_v25, %v433_v31  ;;  %v497_v34 = vpop.f32.mrf.mxu1 }
  0xd4   : > { %v4432_v35 = vmul.f32 -1.442695, %v5261_v30  ;;  %v5269_v36 = vadd.f32 %v5249_v25, %v497_v34  ;;  %v4640_v37 = vpop.f32.mrf.mxu0 }
  0xd5   : > { %4838 = vpow2.f32 %v4416_v32  ;;  %v4414_v38 = vmul.f32 -1.442695, %v5265_v33  ;;  %v5273_v39 = vadd.f32 %v4640_v37, %v5249_v25  ;;  %v4656_v40 = vpop.f32.mrf.mxu1 }
  0xd6   : > { %4840 = vpow2.f32 %v4432_v35  ;;  %v4430_v41 = vmul.f32 -1.442695, %v5269_v36  ;;  %v5277_v42 = vadd.f32 %v4656_v40, %v5249_v25  ;;  %v436_v43 = vpop.f32.mrf.mxu0 }
  0xd7   : > { %4842 = vpow2.f32 %v4414_v38  ;;  %v4417_v44 = vmul.f32 -1.442695, %v5273_v39  ;;  %v5281_v45 = vadd.f32 %v5249_v25, %v436_v43  ;;  %v500_v46 = vpop.f32.mrf.mxu1 }
  0xd8   : > { %4844 = vpow2.f32 %v4430_v41  ;;  %v4433_v47 = vmul.f32 -1.442695, %v5277_v42  ;;  %v5285_v48 = vadd.f32 %v5249_v25, %v500_v46  ;;  %v4643_v49 = vpop.f32.mrf.mxu0 }
  0xd9   : > { %4846 = vpow2.f32 %v4417_v44  ;;  %v4415_v50 = vmul.f32 -1.442695, %v5281_v45  ;;  %v5289_v51 = vadd.f32 %v4643_v49, %v5249_v25  ;;  %v4659_v52 = vpop.f32.mrf.mxu1  ;;  %v1441_v49 = vld [vmem:[#allocation3] sm:$0xff] }
  0xda   : > { %4848 = vpow2.f32 %v4433_v47  ;;  %v4431_v53 = vmul.f32 -1.442695, %v5285_v48  ;;  %v5293_v54 = vadd.f32 %v4659_v52, %v5249_v25  ;;  %v449_v55 = vpop.f32.mrf.mxu0 }
  0xdb   : > { %4850 = vpow2.f32 %v4415_v50  ;;  %v4420_v56 = vmul.f32 -1.442695, %v5289_v51  ;;  %v5297_v57 = vadd.f32 %v5249_v25, %v449_v55  ;;  %v513_v58 = vpop.f32.mrf.mxu1  ;;  %v5321_v50 = vld [vmem:[#allocation3 + $0x10] sm:$0xff] }
  0xdc   : > { %4852 = vpow2.f32 %v4431_v53  ;;  %v4436_v59 = vmul.f32 -1.442695, %v5293_v54  ;;  %v5301_v60 = vadd.f32 %v5249_v25, %v513_v58  ;;  %v4644_v61 = vpop.f32.mrf.mxu0 }
  0xdd   : > { %4854 = vpow2.f32 %v4420_v56  ;;  %v4418_v62 = vmul.f32 -1.442695, %v5297_v57  ;;  %v5305_v63 = vadd.f32 %v4644_v61, %v5249_v25  ;;  %v4660_v0 = vpop.f32.mrf.mxu1 }
  0xde   : > { %4856 = vpow2.f32 %v4436_v59  ;;  %v4434_v1 = vmul.f32 -1.442695, %v5301_v60  ;;  %v5309_v2 = vadd.f32 %v4660_v0, %v5249_v25  ;;  %v452_v3 = vpop.f32.mrf.mxu0 }
  0xdf   : > { %4858 = vpow2.f32 %v4418_v62  ;;  %v4421_v4 = vmul.f32 -1.442695, %v5305_v63  ;;  %v5313_v5 = vadd.f32 %v5249_v25, %v452_v3  ;;  %v516_v6 = vpop.f32.mrf.mxu1 }
  0xe0   : > { %4860 = vpow2.f32 %v4434_v1  ;;  %v4437_v7 = vmul.f32 -1.442695, %v5309_v2  ;;  %v5317_v8 = vadd.f32 %v5249_v25, %v516_v6  ;;  %v4647_v9 = vpop.f32.mrf.mxu0  ;;  %v5336_v6 = vmax.f32 %v1441_v49, %v5321_v50 }
  0xe1   : > { %4862 = vpow2.f32 %v4421_v4  ;;  %v4419_v10 = vmul.f32 -1.442695, %v5313_v5  ;;  %v4663_v11 = vpop.f32.mrf.mxu1  ;;  %v5324_v55 = vadd.f32 %v4647_v9, %v5249_v25 }
  0xe2   : > { %v4839_v12 = vpop.eup %4838  ;;  %4864 = vpow2.f32 %v4437_v7  ;;  %v4435_v13 = vmul.f32 -1.442695, %v5317_v8  ;;  %v465_v14 = vpop.f32.mrf.mxu0  ;;  %v5327_v56 = vadd.f32 %v4663_v11, %v5249_v25  ;;  %v5343_v11 = vsel %vm850_vm3, %v5241_v23, 0 }
  0xe3   : > { %v4841_v15 = vpop.eup %4840  ;;  %v658_v16 = vadd.f32 1.0, %v4839_v12  ;;  %4866 = vpow2.f32 %v4419_v10  ;;  %v529_v17 = vpop.f32.mrf.mxu1  ;;  %v5330_v62 = vadd.f32 %v5249_v25, %v465_v14  ;;  %v4424_v14 = vmul.f32 -1.442695, %v5324_v55 }
  0xe4   : > { %v4843_v18 = vpop.eup %4842  ;;  %v674_v19 = vadd.f32 1.0, %v4841_v15  ;;  %4868 = vpow2.f32 %v4435_v13  ;;  %v4648_v20 = vpop.f32.mrf.mxu0  ;;  %v5333_v0 = vadd.f32 %v5249_v25, %v529_v17  ;;  %v4440_v15 = vmul.f32 -1.442695, %v5327_v56 }
  0xe5   : > { %v4845_v21 = vpop.eup %4844  ;;  %4870 = vrcp.f32 %v658_v16  ;;  %v656_v22 = vadd.f32 1.0, %v4843_v18  ;;  %v4664_v29 = vpop.f32.mrf.mxu1  ;;  %v5339_v10 = vadd.f32 %v4648_v20, %v5249_v25 }
  0xe6   : > { %v4847_v24 = vpop.eup %4846  ;;  %4872 = vrcp.f32 %v674_v19  ;;  %v672_v27 = vadd.f32 1.0, %v4845_v21  ;;  %v468_v37 = vpop.f32.mrf.mxu0  ;;  %v4422_v19 = vmul.f32 -1.442695, %v5330_v62  ;;  %v4438_v20 = vmul.f32 -1.442695, %v5333_v0 }
  0xe7   : > { %v4849_v31 = vpop.eup %4848  ;;  %4874 = vrcp.f32 %v656_v22  ;;  %v659_v32 = vadd.f32 1.0, %v4847_v24  ;;  %v532_v44 = vpop.f32.mrf.mxu1  ;;  %v5350_v23 = vadd.f32 %v4664_v29, %v5249_v25  ;;  %v5353_v24 = vadd.f32 %v5249_v25, %v468_v37 }
  0xe8   : > { %v4851_v34 = vpop.eup %4850  ;;  %4876 = vrcp.f32 %v672_v27  ;;  %v675_v35 = vadd.f32 1.0, %v4849_v31  ;;  %v4651_v58 = vpop.f32.mrf.mxu0 }
  0xe9   : > { %v4853_v38 = vpop.eup %4852  ;;  %4878 = vrcp.f32 %v659_v32  ;;  %v657_v40 = vadd.f32 1.0, %v4851_v34  ;;  %v4667_v4 = vpop.f32.mrf.mxu1  ;;  %v4425_v34 = vmul.f32 -1.442695, %v5339_v10  ;;  %v5366_v29 = vadd.f32 %v4651_v58, %v5249_v25 }
  0xea   : > { %v4855_v41 = vpop.eup %4854  ;;  %4880 = vrcp.f32 %v675_v35  ;;  %v673_v43 = vadd.f32 1.0, %v4853_v38  ;;  %v481_v16 = vpop.f32.mrf.mxu0  ;;  %v5360_v35 = vadd.f32 %v5249_v25, %v532_v44  ;;  %v5369_v37 = vadd.f32 %v4667_v4, %v5249_v25 }
  0xeb   : > { %v4857_v46 = vpop.eup %4856  ;;  %4882 = vrcp.f32 %v657_v40  ;;  %v662_v47 = vadd.f32 1.0, %v4855_v41  ;;  %v545_v27 = vpop.f32.mrf.mxu1  ;;  %v5375_v44 = vadd.f32 %v5249_v25, %v481_v16  ;;  %v4441_v49 = vmul.f32 -1.442695, %v5350_v23 }
  0xec   : > { %v4859_v52 = vpop.eup %4858  ;;  %4884 = vrcp.f32 %v673_v43  ;;  %v678_v53 = vadd.f32 1.0, %v4857_v46  ;;  %v4652_v41 = vpop.f32.mrf.mxu0  ;;  %v4439_v58 = vmul.f32 -1.442695, %v5360_v35  ;;  %v4444_v4 = vmul.f32 -1.442695, %v5369_v37 }
  0xed   : > { %v4861_v59 = vpop.eup %4860  ;;  %4886 = vrcp.f32 %v662_v47  ;;  %v660_v61 = vadd.f32 1.0, %v4859_v52  ;;  %v4423_v52 = vmul.f32 -1.442695, %v5353_v24 }
  0xee   : > { %v4863_v1 = vpop.eup %4862  ;;  %4888 = vrcp.f32 %v678_v53  ;;  %v676_v3 = vadd.f32 1.0, %v4861_v59  ;;  %v5391_v59 = vadd.f32 %v4652_v41, %v5249_v25 }
  0xef   : > { %v4865_v7 = vpop.eup %4864  ;;  %4890 = vrcp.f32 %v660_v61  ;;  %v663_v9 = vadd.f32 1.0, %v4863_v1  ;;  %v4668_v61 = vpop.f32.mrf.mxu1 }
  0xf0   : > { %v4867_v12 = vpop.eup %4866  ;;  %4892 = vrcp.f32 %v676_v3  ;;  %v679_v13 = vadd.f32 1.0, %v4865_v7  ;;  %v4428_v3 = vmul.f32 -1.442695, %v5366_v29 }
  0xf1   : > { %v4869_v17 = vpop.eup %4868  ;;  %4894 = vrcp.f32 %v663_v9  ;;  %v661_v18 = vadd.f32 1.0, %v4867_v12  ;;  %v4426_v9 = vmul.f32 -1.442695, %v5375_v44 }
  0xf2   : > { %v4871_v21 = vpop.eup %4870  ;;  %4896 = vrcp.f32 %v679_v13  ;;  %v677_v22 = vadd.f32 1.0, %v4869_v17 }
  0xf3   : > { %v4873_v31 = vpop.eup %4872  ;;  %v5356_v32 = vmul.f32 %v4871_v21, %v5258_v28  ;;  %4898 = vrcp.f32 %v661_v18 }
  0xf4   : > { %v4875_v38 = vpop.eup %4874  ;;  %v5363_v40 = vmul.f32 %v4873_v31, %v5261_v30  ;;  %4900 = vrcp.f32 %v677_v22  ;;  %v5378_v30 = vadd.f32 %v5249_v25, %v545_v27 }
  0xf5   : > { %v4877_v28 = vpop.eup %4876  ;;  %1090 = vst.msk [vmem:[#allocation2 + $0x28] sm:$0xff] %vm801_vm2, %v5356_v32  ;;  %v752_v43 = vmul.f32 %v4875_v38, %v5265_v33  ;;  %4902 = vpow2.f32 %v4424_v14 }
  0xf6   : > { %v4879_v46 = vpop.eup %4878  ;;  %1106 = vst.msk [vmem:[#allocation2 + $0x128] sm:$0xff] %vm801_vm2, %v5363_v40  ;;  %v5383_v47 = vmul.f32 %v4877_v28, %v5269_v36  ;;  %4904 = vpow2.f32 %v4440_v15  ;;  %v4442_v12 = vmul.f32 -1.442695, %v5378_v30  ;;  %v5412_v15 = vadd.f32 %v4668_v61, %v5249_v25 }
  0xf7   : > { %v4881_v33 = vpop.eup %4880  ;;  %1088 = vst.msk [vmem:[#allocation2 + $0x8] sm:$0xff] %vm801_vm2, %v752_v43  ;;  %v755_v53 = vmul.f32 %v4879_v46, %v5273_v39  ;;  %4906 = vpow2.f32 %v4422_v19  ;;  %v5419_v19 = vmul.f32 -1.442695, %v5391_v59 }
  0xf8   : > { %v4883_v1 = vpop.eup %4882  ;;  %1104 = vst.msk [vmem:[#allocation2 + $0x108] sm:$0xff] %vm801_vm2, %v5383_v47  ;;  %v5396_v36 = vmul.f32 %v4881_v33, %v5277_v42  ;;  %4908 = vpow2.f32 %v4438_v20 }
  0xf9   : > { %v4885_v39 = vpop.eup %4884  ;;  %1091 = vst.msk [vmem:[#allocation2 + $0x30] sm:$0xff] %vm801_vm2, %v755_v53  ;;  %v753_v7 = vmul.f32 %v4883_v1, %v5281_v45  ;;  %4910 = vpow2.f32 %v4425_v34  ;;  %v484_v45 = vpop.f32.mrf.mxu0  ;;  %v785_v22 = vpack.c.bf16 %v755_v53, %v5356_v32 }
  0xfa   : > { %v4887_v13 = vpop.eup %4886  ;;  %1107 = vst.msk [vmem:[#allocation2 + $0x130] sm:$0xff] %vm801_vm2, %v5396_v36  ;;  %v5409_v14 = vmul.f32 %v4885_v39, %v5285_v48  ;;  %4912 = vpow2.f32 %v4441_v49  ;;  %v5435_v32 = vadd.f32 %v5249_v25, %v484_v45 }
  0xfb   : > { %v4889_v16 = vpop.eup %4888  ;;  %v784_v17 = vpack.c.bf16 %v753_v7, %v752_v43  ;;  %1089 = vst.msk [vmem:[#allocation2 + $0x10] sm:$0xff] %vm801_vm2, %v753_v7  ;;  %v5416_v18 = vmul.f32 %v4887_v13, %v5289_v51  ;;  %4914 = vpow2.f32 %v4423_v52 }
  0xfc   : > { %v4891_v20 = vpop.eup %4890  ;;  %v1122_v21 = vld [vmem:[#allocation2 + $0x26] sm:$0xff]  ;;  %v792_v27 = vpack.c.bf16 %v5409_v14, %v5383_v47  ;;  %1105 = vst.msk [vmem:[#allocation2 + $0x110] sm:$0xff] %vm801_vm2, %v5409_v14  ;;  %v5427_v31 = vmul.f32 %v4889_v16, %v5293_v54  ;;  %4916 = vpow2.f32 %v4439_v58 }
  0xfd   : > { %v1154_v48 = vld [vmem:[#allocation2 + $0x27] sm:$0xff]  ;;  %v4893_v51 = vpop.eup %4892  ;;  %1094 = vst.msk [vmem:[#allocation2 + $0x68] sm:$0xff] %vm801_vm2, %v5416_v18  ;;  %v5432_v28 = vmul.f32 %v4891_v20, %v5297_v57  ;;  %4918 = vpow2.f32 %v4428_v3  ;;  %4671 = vmatprep.mubr.msk.bf16.mxu1 %vm801_vm2, %v784_v17  ;;  %v5444_v57 = vmul.f32 -1.442695, %v5412_v15 }
  0xfe   : > { %v1186_v34 = vmax.f32 %v1122_v21, %v1154_v48  ;;  %v1138_v38 = vld [vmem:[#allocation2 + $0x126] sm:$0xff]  ;;  %v4895_v43 = vpop.eup %4894  ;;  %1110 = vst.msk [vmem:[#allocation2 + $0x168] sm:$0xff] %vm801_vm2, %v5427_v31  ;;  %v5441_v33 = vmul.f32 %v4893_v51, %v5301_v60  ;;  %4920 = vpow2.f32 %v4444_v4  ;;  %4672 = vmatmul.mubr.msk.bf16.vlgmr.msra.gmra.mxu1 %vm801_vm2, %v785_v22 }
  0xff   : > { %v1170_v41 = vld [vmem:[#allocation2 + $0x127] sm:$0xff]  ;;  %v4897_v53 = vpop.eup %4896  ;;  %1092 = vst.msk [vmem:[#allocation2 + $0x48] sm:$0xff] %vm801_vm2, %v5432_v28  ;;  %v5450_v7 = vmul.f32 %v4895_v43, %v5305_v63  ;;  %4922 = vpow2.f32 %v4426_v9  ;;  %4738 = vmatpush3.bf16.msra.mxu1 %v5343_v11 }
 0x100   : > { %v1218_v54 = vld [vmem:[#allocation2 + $0x28] sm:$0xff]  ;;  %v1202_v46 = vmax.f32 %v1138_v38, %v1170_v41  ;;  %v4899_v60 = vpop.eup %4898  ;;  %1108 = vst.msk [vmem:[#allocation2 + $0x148] sm:$0xff] %vm801_vm2, %v5441_v33  ;;  %v5456_v20 = vmul.f32 %v4897_v53, %v5309_v2  ;;  %4924 = vpow2.f32 %v4442_v12  ;;  %v1219_v2 = vld [vmem:[#allocation2 + $0x30] sm:$0xff] }
 0x101   : > { %v1120_v49 = vld [vmem:[#allocation2 + $0x6] sm:$0xff]  ;;  %v1250_v58 = vmax.f32 %v1186_v34, %v1218_v54  ;;  %v1123_v16 = vld [vmem:[#allocation2 + $0x2e] sm:$0xff]  ;;  %v4901_v21 = vpop.eup %4900  ;;  %v787_v11 = vpack.c.bf16 %v5450_v7, %v5416_v18  ;;  %1095 = vst.msk [vmem:[#allocation2 + $0x70] sm:$0xff] %vm801_vm2, %v5450_v7  ;;  %v757_v51 = vmul.f32 %v4899_v60, %v5313_v5 }
 0x102   : > { %v1152_v52 = vld [vmem:[#allocation2 + $0x7] sm:$0xff]  ;;  %v1155_v17 = vld [vmem:[#allocation2 + $0x2f] sm:$0xff]  ;;  %v4903_v34 = vpop.eup %4902  ;;  %1111 = vst.msk [vmem:[#allocation2 + $0x170] sm:$0xff] %vm801_vm2, %v5456_v20  ;;  %v5472_v18 = vmul.f32 %v4901_v21, %v5317_v8 }
 0x103   : > { %v1234_v61 = vld [vmem:[#allocation2 + $0x128] sm:$0xff]  ;;  %v1184_v1 = vmax.f32 %v1120_v49, %v1152_v52  ;;  %v1187_v9 = vmax.f32 %v1123_v16, %v1155_v17  ;;  %v1283_v52 = vld [vmem:[#allocation2 + $0x31] sm:$0xff]  ;;  %1093 = vst.msk [vmem:[#allocation2 + $0x50] sm:$0xff] %vm801_vm2, %v757_v51 }
 0x104   : > { %v1136_v3 = vld [vmem:[#allocation2 + $0x106] sm:$0xff]  ;;  %v1266_v4 = vmax.f32 %v1202_v46, %v1234_v61  ;;  %v1139_v12 = vld [vmem:[#allocation2 + $0x12e] sm:$0xff]  ;;  %v4905_v46 = vpop.eup %4904  ;;  %1109 = vst.msk [vmem:[#allocation2 + $0x150] sm:$0xff] %vm801_vm2, %v5472_v18 }
 0x105   : > { %v1168_v39 = vld [vmem:[#allocation2 + $0x107] sm:$0xff]  ;;  %v1171_v43 = vld [vmem:[#allocation2 + $0x12f] sm:$0xff]  ;;  %v1251_v49 = vmax.f32 %v1187_v9, %v1219_v2  ;;  %v682_v16 = vadd.f32 1.0, %v4905_v46 }
 0x106   : > { %v1216_v13 = vld [vmem:[#allocation2 + $0x8] sm:$0xff]  ;;  %v1200_v45 = vmax.f32 %v1136_v3, %v1168_v39  ;;  %v1203_v53 = vmax.f32 %v1139_v12, %v1171_v43  ;;  %v4907_v3 = vpop.eup %4906  ;;  %v1347_v39 = vld [vmem:[#allocation2 + $0x32] sm:$0xff] }
 0x107   : > { %v5458_v48 = vmax.f32 %v1184_v1, %v1216_v13  ;;  %v1232_v63 = vld [vmem:[#allocation2 + $0x108] sm:$0xff]  ;;  %v786_v1 = vpack.c.bf16 %v757_v51, %v5432_v28  ;;  %v1235_v60 = vld [vmem:[#allocation2 + $0x130] sm:$0xff]  ;;  %v4909_v17 = vpop.eup %4908  ;;  %v1315_v21 = vmax.f32 %v1251_v49, %v1283_v52  ;;  %v664_v51 = vadd.f32 1.0, %v4907_v3 }
 0x108   : > { %v1282_v22 = vld [vmem:[#allocation2 + $0x29] sm:$0xff]  ;;  %v5465_v38 = vmax.f32 %v1200_v45, %v1232_v63  ;;  %v1267_v63 = vmax.f32 %v1203_v53, %v1235_v60  ;;  %v1363_v2 = vld [vmem:[#allocation2 + $0x132] sm:$0xff] }
 0x109   : > { %v1314_v41 = vmax.f32 %v1250_v58, %v1282_v22  ;;  %v1346_v5 = vld [vmem:[#allocation2 + $0x2a] sm:$0xff]  ;;  %v666_v58 = vadd.f32 1.0, %v4903_v34  ;;  %4675 = vmatprep.mubr.msk.bf16.mxu1 %vm801_vm2, %v786_v1  ;;  %v4911_v34 = vpop.eup %4910  ;;  %v1379_v52 = vmax.f32 %v1315_v21, %v1347_v39  ;;  %v680_v1 = vadd.f32 1.0, %v4909_v17  ;;  %v1345_v39 = vld [vmem:[#allocation2 + $0x12] sm:$0xff] }
 0x10a   : > { %v1298_v61 = vld [vmem:[#allocation2 + $0x129] sm:$0xff]  ;;  %4676 = vmatmul.mubr.msk.bf16.gmra.mxu1 %vm801_vm2, %v787_v11  ;;  %v4913_v49 = vpop.eup %4912  ;;  %v1281_v60 = vld [vmem:[#allocation2 + $0x11] sm:$0xff] }
 0x10b   : > { %v1378_v7 = vmax.f32 %v1314_v41, %v1346_v5  ;;  %v1330_v13 = vmax.f32 %v1266_v4, %v1298_v61  ;;  %v1121_v45 = vld [vmem:[#allocation2 + $0xe] sm:$0xff]  ;;  %4926 = vrcp.f32 %v666_v58  ;;  %v4915_v3 = vpop.eup %4914  ;;  %1412 = vst.msk [vmem:[#allocation3 + $0x38] sm:$0xff] %vm801_vm2, %v1379_v52  ;;  %v548_v52 = vpop.f32.mrf.mxu1 }
 0x10c   : > { %v1362_v28 = vld [vmem:[#allocation2 + $0x12a] sm:$0xff]  ;;  %4928 = vrcp.f32 %v682_v16  ;;  %v667_v16 = vadd.f32 1.0, %v4911_v34  ;;  %v1361_v54 = vld [vmem:[#allocation2 + $0x112] sm:$0xff] }
 0x10d   : > { %v1153_v9 = vld [vmem:[#allocation2 + $0xf] sm:$0xff]  ;;  %1411 = vst.msk [vmem:[#allocation3 + $0x30] sm:$0xff] %vm801_vm2, %v1378_v7  ;;  %v1394_v41 = vmax.f32 %v1330_v13, %v1362_v28  ;;  %4930 = vrcp.f32 %v664_v51  ;;  %v1158_v17 = vld [vmem:[#allocation2 + $0x67] sm:$0xff]  ;;  %v683_v51 = vadd.f32 1.0, %v4913_v49  ;;  %v665_v49 = vadd.f32 1.0, %v4915_v3 }
 0x10e   : > { %v1280_v22 = vld [vmem:[#allocation2 + $0x9] sm:$0xff]  ;;  %v1299_v4 = vld [vmem:[#allocation2 + $0x131] sm:$0xff]  ;;  %v1185_v12 = vmax.f32 %v1121_v45, %v1153_v9  ;;  %v4917_v9 = vpop.eup %4916  ;;  %4932 = vrcp.f32 %v680_v1 }
 0x10f   : > { %v1217_v43 = vld [vmem:[#allocation2 + $0x10] sm:$0xff]  ;;  %v1312_v46 = vmax.f32 %v5458_v48, %v1280_v22  ;;  %v1331_v5 = vmax.f32 %v1267_v63, %v1299_v4  ;;  %1427 = vst.msk [vmem:[#allocation3 + $0xb0] sm:$0xff] %vm801_vm2, %v1394_v41  ;;  %v1126_v22 = vld [vmem:[#allocation2 + $0x66] sm:$0xff]  ;;  %v4919_v4 = vpop.eup %4918  ;;  %4934 = vrcp.f32 %v667_v16 }
 0x110   : > { %v1344_v53 = vld [vmem:[#allocation2 + $0xa] sm:$0xff]  ;;  %v1249_v7 = vmax.f32 %v1185_v12, %v1217_v43  ;;  %4936 = vrcp.f32 %v683_v51  ;;  %v5491_v51 = vadd.f32 %v5249_v25, %v548_v52 }
 0x111   : > { %v1137_v61 = vld [vmem:[#allocation2 + $0x10e] sm:$0xff]  ;;  %v1376_v13 = vmax.f32 %v1312_v46, %v1344_v53  ;;  %v1395_v11 = vmax.f32 %v1331_v5, %v1363_v2  ;;  %v1190_v46 = vmax.f32 %v1126_v22, %v1158_v17  ;;  %v1142_v34 = vld [vmem:[#allocation2 + $0x166] sm:$0xff]  ;;  %v4921_v2 = vpop.eup %4920  ;;  %4938 = vrcp.f32 %v665_v49 }
 0x112   : > { %v1169_v58 = vld [vmem:[#allocation2 + $0x10f] sm:$0xff]  ;;  %v1313_v41 = vmax.f32 %v1249_v7, %v1281_v60  ;;  %v1174_v53 = vld [vmem:[#allocation2 + $0x167] sm:$0xff]  ;;  %v4923_v7 = vpop.eup %4922 }
 0x113   : > { %v1201_v45 = vmax.f32 %v1137_v61, %v1169_v58  ;;  %v1233_v28 = vld [vmem:[#allocation2 + $0x110] sm:$0xff]  ;;  %1409 = vst.msk [vmem:[#allocation3 + $0x20] sm:$0xff] %vm801_vm2, %v1376_v13  ;;  %1428 = vst.msk [vmem:[#allocation3 + $0xb8] sm:$0xff] %vm801_vm2, %v1395_v11  ;;  %v1206_v61 = vmax.f32 %v1142_v34, %v1174_v53  ;;  %v1124_v58 = vld [vmem:[#allocation2 + $0x46] sm:$0xff]  ;;  %v4925_v16 = vpop.eup %4924  ;;  %v681_v34 = vadd.f32 1.0, %v4917_v9  ;;  %v668_v49 = vadd.f32 1.0, %v4923_v7 }
 0x114   : > { %v1296_v48 = vld [vmem:[#allocation2 + $0x109] sm:$0xff]  ;;  %v1297_v21 = vld [vmem:[#allocation2 + $0x111] sm:$0xff]  ;;  %v1377_v60 = vmax.f32 %v1313_v41, %v1345_v39 }
 0x115   : > { %v1328_v63 = vmax.f32 %v5465_v38, %v1296_v48  ;;  %v1265_v12 = vmax.f32 %v1201_v45, %v1233_v28  ;;  %v1360_v43 = vld [vmem:[#allocation2 + $0x10a] sm:$0xff]  ;;  %4940 = vrcp.f32 %v681_v34 }
 0x116   : > { %v1222_v38 = vld [vmem:[#allocation2 + $0x68] sm:$0xff]  ;;  %1410 = vst.msk [vmem:[#allocation3 + $0x28] sm:$0xff] %vm801_vm2, %v1377_v60 }
 0x117   : > { %v1392_v5 = vmax.f32 %v1328_v63, %v1360_v43  ;;  %v1156_v1 = vld [vmem:[#allocation2 + $0x47] sm:$0xff]  ;;  %v1329_v13 = vmax.f32 %v1265_v12, %v1297_v21  ;;  %v1254_v45 = vmax.f32 %v1190_v46, %v1222_v38  ;;  %v1159_v43 = vld [vmem:[#allocation2 + $0x6f] sm:$0xff]  ;;  %v670_v46 = vadd.f32 1.0, %v4919_v4 }
 0x118   : > { %v1238_v28 = vld [vmem:[#allocation2 + $0x168] sm:$0xff]  ;;  %v1188_v48 = vmax.f32 %v1124_v58, %v1156_v1  ;;  %v1223_v38 = vld [vmem:[#allocation2 + $0x70] sm:$0xff] }
 0x119   : > { %v1140_v22 = vld [vmem:[#allocation2 + $0x146] sm:$0xff]  ;;  %1425 = vst.msk [vmem:[#allocation3 + $0xa0] sm:$0xff] %vm801_vm2, %v1392_v5  ;;  %v1270_v11 = vmax.f32 %v1206_v61, %v1238_v28  ;;  %v1127_v63 = vld [vmem:[#allocation2 + $0x6e] sm:$0xff]  ;;  %v1393_v3 = vmax.f32 %v1329_v13, %v1361_v54  ;;  %v686_v61 = vadd.f32 1.0, %v4921_v2  ;;  %4942 = vrcp.f32 %v670_v46 }
 0x11a   : > { %v1172_v17 = vld [vmem:[#allocation2 + $0x147] sm:$0xff]  ;;  %v1191_v41 = vmax.f32 %v1127_v63, %v1159_v43  ;;  %v1175_v25 = vld [vmem:[#allocation2 + $0x16f] sm:$0xff]  ;;  %v684_v54 = vadd.f32 1.0, %v4925_v16 }
 0x11b   : > { %v1220_v39 = vld [vmem:[#allocation2 + $0x48] sm:$0xff]  ;;  %v1204_v21 = vmax.f32 %v1140_v22, %v1172_v17  ;;  %1426 = vst.msk [vmem:[#allocation3 + $0xa8] sm:$0xff] %vm801_vm2, %v1393_v3  ;;  %v1287_v13 = vld [vmem:[#allocation2 + $0x71] sm:$0xff]  ;;  %4944 = vrcp.f32 %v686_v61  ;;  %v4427_v3 = vmul.f32 -1.442695, %v5435_v32 }
 0x11c   : > { %v1286_v12 = vld [vmem:[#allocation2 + $0x69] sm:$0xff]  ;;  %v1252_v53 = vmax.f32 %v1188_v48, %v1220_v39  ;;  %v1255_v9 = vmax.f32 %v1191_v41, %v1223_v38  ;;  %4946 = vrcp.f32 %v668_v49  ;;  %v1351_v41 = vld [vmem:[#allocation2 + $0x72] sm:$0xff] }
 0x11d   : > { %v1318_v58 = vmax.f32 %v1254_v45, %v1286_v12  ;;  %v1143_v5 = vld [vmem:[#allocation2 + $0x16e] sm:$0xff]  ;;  %v4927_v45 = vpop.eup %4926  ;;  %4948 = vrcp.f32 %v684_v54 }
 0x11e   : > { %v1350_v1 = vld [vmem:[#allocation2 + $0x6a] sm:$0xff]  ;;  %v1207_v22 = vmax.f32 %v1143_v5, %v1175_v25  ;;  %v1319_v63 = vmax.f32 %v1255_v9, %v1287_v13  ;;  %v4929_v39 = vpop.eup %4928  ;;  %4950 = vpow2.f32 %v5419_v19 }
 0x11f   : > { %v1302_v52 = vld [vmem:[#allocation2 + $0x169] sm:$0xff]  ;;  %v1382_v28 = vmax.f32 %v1318_v58, %v1350_v1  ;;  %v1303_v16 = vld [vmem:[#allocation2 + $0x171] sm:$0xff]  ;;  %v5501_v25 = vmul.f32 %v4929_v39, %v5327_v56  ;;  %4952 = vpow2.f32 %v5444_v57 }
 0x120   : > { %v1236_v60 = vld [vmem:[#allocation2 + $0x148] sm:$0xff]  ;;  %v1239_v4 = vld [vmem:[#allocation2 + $0x170] sm:$0xff]  ;;  %v1334_v48 = vmax.f32 %v1270_v11, %v1302_v52  ;;  %v5498_v11 = vmul.f32 %v4927_v45, %v5324_v55  ;;  %v1383_v58 = vmax.f32 %v1319_v63, %v1351_v41  ;;  %v4443_v45 = vmul.f32 -1.442695, %v5491_v51  ;;  %v5519_v41 = vld [vmem:[#allocation3 + $0x20] sm:$0xff] }
 0x121   : > { %v1268_v17 = vmax.f32 %v1204_v21, %v1236_v60  ;;  %v1366_v2 = vld [vmem:[#allocation2 + $0x16a] sm:$0xff]  ;;  %1415 = vst.msk [vmem:[#allocation3 + $0x50] sm:$0xff] %vm801_vm2, %v1382_v28  ;;  %v1271_v7 = vmax.f32 %v1207_v22, %v1239_v4  ;;  %v4931_v21 = vpop.eup %4930  ;;  %v1367_v22 = vld [vmem:[#allocation2 + $0x172] sm:$0xff]  ;;  %1114 = vst.msk [vmem:[#allocation2 + $0x1a8] sm:$0xff] %vm801_vm2, %v5501_v25  ;;  %4954 = vpow2.f32 %v4427_v3  ;;  %v1508_v3 = vmax.f32 %v5321_v50, %v5519_v41 }
 0x122   : > { %v1125_v43 = vld [vmem:[#allocation2 + $0x4e] sm:$0xff]  ;;  %v1398_v12 = vmax.f32 %v1334_v48, %v1366_v2  ;;  %1098 = vst.msk [vmem:[#allocation2 + $0xa8] sm:$0xff] %vm801_vm2, %v5498_v11  ;;  %v5507_v55 = vmul.f32 %v4931_v21, %v5330_v62  ;;  %1416 = vst.msk [vmem:[#allocation3 + $0x58] sm:$0xff] %vm801_vm2, %v1383_v58  ;;  %4956 = vpow2.f32 %v4443_v45 }
 0x123   : > { %v1157_v34 = vld [vmem:[#allocation2 + $0x4f] sm:$0xff]  ;;  %v1335_v52 = vmax.f32 %v1271_v7, %v1303_v16 }
 0x124   : > { %v1189_v46 = vmax.f32 %v1125_v43, %v1157_v34  ;;  %v1284_v38 = vld [vmem:[#allocation2 + $0x49] sm:$0xff]  ;;  %1431 = vst.msk [vmem:[#allocation3 + $0xd0] sm:$0xff] %vm801_vm2, %v1398_v12  ;;  %v1285_v56 = vld [vmem:[#allocation2 + $0x51] sm:$0xff]  ;;  %1096 = vst.msk [vmem:[#allocation2 + $0x88] sm:$0xff] %vm801_vm2, %v5507_v55 }
 0x125   : > { %v1221_v5 = vld [vmem:[#allocation2 + $0x50] sm:$0xff]  ;;  %v1316_v61 = vmax.f32 %v1252_v53, %v1284_v38  ;;  %v4933_v53 = vpop.eup %4932  ;;  %v1399_v2 = vmax.f32 %v1335_v52, %v1367_v22  ;;  %v5540_v52 = vld [vmem:[#allocation3 + $0x18] sm:$0xff] }
 0x126   : > { %v1141_v9 = vld [vmem:[#allocation2 + $0x14e] sm:$0xff]  ;;  %v1253_v49 = vmax.f32 %v1189_v46, %v1221_v5  ;;  %v4935_v63 = vpop.eup %4934  ;;  %v5517_v39 = vmul.f32 %v4933_v53, %v5333_v0 }
 0x127   : > { %v1173_v1 = vld [vmem:[#allocation2 + $0x14f] sm:$0xff]  ;;  %v763_v12 = vmul.f32 %v4935_v63, %v5339_v10  ;;  %1432 = vst.msk [vmem:[#allocation3 + $0xd8] sm:$0xff] %vm801_vm2, %v1399_v2  ;;  %v1570_v10 = vmax.f32 %v5336_v6, %v5519_v41 }
 0x128   : > { %v1348_v60 = vld [vmem:[#allocation2 + $0x4a] sm:$0xff]  ;;  %v1205_v13 = vmax.f32 %v1141_v9, %v1173_v1  ;;  %v1317_v43 = vmax.f32 %v1253_v49, %v1285_v56  ;;  %v1349_v7 = vld [vmem:[#allocation2 + $0x52] sm:$0xff]  ;;  %1112 = vst.msk [vmem:[#allocation2 + $0x188] sm:$0xff] %vm801_vm2, %v5517_v39 }
 0x129   : > { %v1300_v28 = vld [vmem:[#allocation2 + $0x149] sm:$0xff]  ;;  %v1380_v4 = vmax.f32 %v1316_v61, %v1348_v60  ;;  %v1301_v19 = vld [vmem:[#allocation2 + $0x151] sm:$0xff]  ;;  %1099 = vst.msk [vmem:[#allocation2 + $0xb0] sm:$0xff] %vm801_vm2, %v763_v12  ;;  %v789_v53 = vpack.c.bf16 %v763_v12, %v5498_v11 }
 0x12a   : > { %v1237_v54 = vld [vmem:[#allocation2 + $0x150] sm:$0xff]  ;;  %v1332_v48 = vmax.f32 %v1268_v17, %v1300_v28  ;;  %v4937_v17 = vpop.eup %4936  ;;  %v1381_v46 = vmax.f32 %v1317_v43, %v1349_v7  ;;  %v1442_v5 = vld [vmem:[#allocation3 + $0x8] sm:$0xff] }
 0x12b   : > { %v1269_v62 = vmax.f32 %v1205_v13, %v1237_v54  ;;  %v1364_v34 = vld [vmem:[#allocation2 + $0x14a] sm:$0xff]  ;;  %1413 = vst.msk [vmem:[#allocation3 + $0x40] sm:$0xff] %vm801_vm2, %v1380_v4  ;;  %v5528_v0 = vmul.f32 %v4937_v17, %v5350_v23  ;;  %v4939_v21 = vpop.eup %4938  ;;  %v1365_v58 = vld [vmem:[#allocation2 + $0x152] sm:$0xff] }
 0x12c   : > { %v1396_v16 = vmax.f32 %v1332_v48, %v1364_v34  ;;  %1414 = vst.msk [vmem:[#allocation3 + $0x48] sm:$0xff] %vm801_vm2, %v1381_v46  ;;  %v761_v23 = vmul.f32 %v4939_v21, %v5353_v24  ;;  %v4941_v61 = vpop.eup %4940  ;;  %v1130_v9 = vld [vmem:[#allocation2 + $0xa6] sm:$0xff]  ;;  %v5549_v50 = vld [vmem:[#allocation3 + $0x30] sm:$0xff]  ;;  %v5563_v34 = vmax.f32 %v1442_v5, %v5540_v52 }
 0x12d   : > { %v1333_v38 = vmax.f32 %v1269_v62, %v1301_v19  ;;  %1115 = vst.msk [vmem:[#allocation2 + $0x1b0] sm:$0xff] %vm801_vm2, %v5528_v0  ;;  %v1162_v1 = vld [vmem:[#allocation2 + $0xa7] sm:$0xff]  ;;  %v4943_v49 = vpop.eup %4942  ;;  %v5547_v24 = vmul.f32 %v4941_v61, %v5360_v35  ;;  %v1635_v2 = vmax.f32 %v1570_v10, %v5549_v50  ;;  %v1572_v11 = vmax.f32 %v1508_v3, %v5549_v50 }
 0x12e   : > { %1429 = vst.msk [vmem:[#allocation3 + $0xc0] sm:$0xff] %vm801_vm2, %v1396_v16  ;;  %v1194_v60 = vmax.f32 %v1130_v9, %v1162_v1  ;;  %v1146_v13 = vld [vmem:[#allocation2 + $0x1a6] sm:$0xff]  ;;  %v788_v22 = vpack.c.bf16 %v761_v23, %v5507_v55  ;;  %1097 = vst.msk [vmem:[#allocation2 + $0x90] sm:$0xff] %vm801_vm2, %v761_v23  ;;  %v4945_v56 = vpop.eup %4944  ;;  %v5552_v63 = vmul.f32 %v4943_v49, %v5366_v29  ;;  %v5581_v23 = vld [vmem:[#allocation3 + $0x50] sm:$0xff] }
 0x12f   : > { %v1397_v57 = vmax.f32 %v1333_v38, %v1365_v58  ;;  %v1178_v28 = vld [vmem:[#allocation2 + $0x1a7] sm:$0xff]  ;;  %v4947_v55 = vpop.eup %4946  ;;  %1113 = vst.msk [vmem:[#allocation2 + $0x190] sm:$0xff] %vm801_vm2, %v5547_v24  ;;  %v5559_v35 = vmul.f32 %v4945_v56, %v5369_v37 }
 0x130   : > { %v1226_v4 = vld [vmem:[#allocation2 + $0xa8] sm:$0xff]  ;;  %v1210_v54 = vmax.f32 %v1146_v13, %v1178_v28  ;;  %4679 = vmatprep.mubr.msk.bf16.mxu1 %vm801_vm2, %v788_v22  ;;  %1102 = vst.msk [vmem:[#allocation2 + $0xe8] sm:$0xff] %vm801_vm2, %v5552_v63  ;;  %v5572_v12 = vmul.f32 %v4947_v55, %v5375_v44  ;;  %v4949_v38 = vpop.eup %4948 }
 0x131   : > { %1430 = vst.msk [vmem:[#allocation3 + $0xc8] sm:$0xff] %vm801_vm2, %v1397_v57  ;;  %v1128_v48 = vld [vmem:[#allocation2 + $0x86] sm:$0xff]  ;;  %v1258_v43 = vmax.f32 %v1194_v60, %v1226_v4  ;;  %4680 = vmatmul.mubr.msk.bf16.gmra.mxu1 %vm801_vm2, %v789_v53  ;;  %v1131_v10 = vld [vmem:[#allocation2 + $0xae] sm:$0xff]  ;;  %1118 = vst.msk [vmem:[#allocation2 + $0x1e8] sm:$0xff] %vm801_vm2, %v5559_v35  ;;  %v5586_v61 = vmul.f32 %v4949_v38, %v5378_v30  ;;  %v4951_v1 = vpop.eup %4950 }
 0x132   : > { %v1160_v45 = vld [vmem:[#allocation2 + $0x87] sm:$0xff]  ;;  %v1163_v57 = vld [vmem:[#allocation2 + $0xaf] sm:$0xff]  ;;  %1100 = vst.msk [vmem:[#allocation2 + $0xc8] sm:$0xff] %vm801_vm2, %v5572_v12 }
 0x133   : > { %v1192_v62 = vmax.f32 %v1128_v48, %v1160_v45  ;;  %v5565_v29 = vld [vmem:[#allocation3 + $0x28] sm:$0xff]  ;;  %v5567_v17 = vld [vmem:[#allocation3 + $0x40] sm:$0xff]  ;;  %v1195_v44 = vmax.f32 %v1131_v10, %v1163_v57  ;;  %v1227_v60 = vld [vmem:[#allocation2 + $0xb0] sm:$0xff]  ;;  %1116 = vst.msk [vmem:[#allocation2 + $0x1c8] sm:$0xff] %vm801_vm2, %v5586_v61  ;;  %v671_v45 = vadd.f32 1.0, %v4951_v1 }
 0x134   : > { %v1242_v7 = vld [vmem:[#allocation2 + $0x1a8] sm:$0xff]  ;;  %v5576_v37 = vmax.f32 %v1635_v2, %v5567_v17  ;;  %v1637_v46 = vmax.f32 %v1572_v11, %v5567_v17  ;;  %v1571_v22 = vmax.f32 %v5563_v34, %v5565_v29  ;;  %v1509_v2 = vmax.f32 %v5540_v52, %v5565_v29  ;;  %v4953_v11 = vpop.eup %4952 }
 0x135   : > { %v1144_v19 = vld [vmem:[#allocation2 + $0x186] sm:$0xff]  ;;  %v1274_v21 = vmax.f32 %v1210_v54, %v1242_v7  ;;  %v1147_v28 = vld [vmem:[#allocation2 + $0x1ae] sm:$0xff]  ;;  %v1259_v4 = vmax.f32 %v1195_v44, %v1227_v60  ;;  %v4955_v38 = vpop.eup %4954  ;;  %4958 = vrcp.f32 %v671_v45  ;;  %v687_v1 = vadd.f32 1.0, %v4953_v11 }
 0x136   : > { %v1176_v16 = vld [vmem:[#allocation2 + $0x187] sm:$0xff]  ;;  %2058 = vst.msk [vmem:[#allocation2 + $0x8] sm:$0xff] %vm801_vm2, %v5576_v37  ;;  %v5591_v9 = vmax.f32 %v1637_v46, %v5581_v23  ;;  %v1179_v53 = vld [vmem:[#allocation2 + $0x1af] sm:$0xff]  ;;  %v1510_v46 = vmax.f32 %v5519_v41, %v5549_v50  ;;  %v4957_v60 = vpop.eup %4956 }
 0x137   : > { %v1208_v58 = vmax.f32 %v1144_v19, %v1176_v16  ;;  %v1224_v5 = vld [vmem:[#allocation2 + $0x88] sm:$0xff]  ;;  %v1211_v30 = vmax.f32 %v1147_v28, %v1179_v53  ;;  %v1243_v7 = vld [vmem:[#allocation2 + $0x1b0] sm:$0xff]  ;;  %4960 = vrcp.f32 %v687_v1 }
 0x138   : > { %v1290_v3 = vld [vmem:[#allocation2 + $0xa9] sm:$0xff]  ;;  %v1256_v49 = vmax.f32 %v1192_v62, %v1224_v5  ;;  %2060 = vst.msk [vmem:[#allocation2 + $0x28] sm:$0xff] %vm801_vm2, %v5591_v9  ;;  %v1355_v28 = vld [vmem:[#allocation2 + $0xb2] sm:$0xff] }
 0x139   : > { %v1322_v13 = vmax.f32 %v1258_v43, %v1290_v3  ;;  %v1240_v56 = vld [vmem:[#allocation2 + $0x188] sm:$0xff]  ;;  %v1291_v43 = vld [vmem:[#allocation2 + $0xb1] sm:$0xff]  ;;  %v1275_v57 = vmax.f32 %v1211_v30, %v1243_v7 }
 0x13a   : > { %v1354_v54 = vld [vmem:[#allocation2 + $0xaa] sm:$0xff]  ;;  %v1272_v55 = vmax.f32 %v1208_v58, %v1240_v56  ;;  %v1323_v10 = vmax.f32 %v1259_v4, %v1291_v43  ;;  %v685_v43 = vadd.f32 1.0, %v4957_v60  ;;  %v1371_v7 = vld [vmem:[#allocation2 + $0x1b2] sm:$0xff]  ;;  %v1574_v60 = vmax.f32 %v1510_v46, %v5567_v17 }
 0x13b   : > { %v1306_v48 = vld [vmem:[#allocation2 + $0x1a9] sm:$0xff]  ;;  %v1386_v62 = vmax.f32 %v1322_v13, %v1354_v54  ;;  %v1307_v58 = vld [vmem:[#allocation2 + $0x1b1] sm:$0xff]  ;;  %v669_v54 = vadd.f32 1.0, %v4955_v38 }
 0x13c   : > { %v1338_v19 = vmax.f32 %v1274_v21, %v1306_v48  ;;  %v1129_v16 = vld [vmem:[#allocation2 + $0x8e] sm:$0xff]  ;;  %v1387_v48 = vmax.f32 %v1323_v10, %v1355_v28  ;;  %v1339_v41 = vmax.f32 %v1275_v57, %v1307_v58  ;;  %v5606_v10 = vld [vmem:[#allocation3 + $0x38] sm:$0xff]  ;;  %v5608_v57 = vld [vmem:[#allocation3 + $0xa0] sm:$0xff] }
 0x13d   : > { %v1370_v5 = vld [vmem:[#allocation2 + $0x1aa] sm:$0xff]  ;;  %1419 = vst.msk [vmem:[#allocation3 + $0x70] sm:$0xff] %vm801_vm2, %v1386_v62  ;;  %4962 = vrcp.f32 %v669_v54  ;;  %v1636_v46 = vmax.f32 %v1571_v22, %v5606_v10 }
 0x13e   : > { %v1161_v44 = vld [vmem:[#allocation2 + $0x8f] sm:$0xff]  ;;  %v1402_v13 = vmax.f32 %v1338_v19, %v1370_v5  ;;  %1420 = vst.msk [vmem:[#allocation3 + $0x78] sm:$0xff] %vm801_vm2, %v1387_v48  ;;  %v1403_v19 = vmax.f32 %v1339_v41, %v1371_v7  ;;  %4964 = vrcp.f32 %v685_v43  ;;  %v1182_v48 = vld [vmem:[#allocation2 + $0x1e7] sm:$0xff] }
 0x13f   : > { %v1288_v3 = vld [vmem:[#allocation2 + $0x89] sm:$0xff]  ;;  %v1193_v53 = vmax.f32 %v1129_v16, %v1161_v44  ;;  %v1353_v44 = vld [vmem:[#allocation2 + $0x92] sm:$0xff] }
 0x140   : > { %v1225_v21 = vld [vmem:[#allocation2 + $0x90] sm:$0xff]  ;;  %v1320_v56 = vmax.f32 %v1256_v49, %v1288_v3  ;;  %1435 = vst.msk [vmem:[#allocation3 + $0xf0] sm:$0xff] %vm801_vm2, %v1402_v13  ;;  %1436 = vst.msk [vmem:[#allocation3 + $0xf8] sm:$0xff] %vm801_vm2, %v1403_v19  ;;  %v1166_v13 = vld [vmem:[#allocation2 + $0xe7] sm:$0xff] }
 0x141   : > { %v1352_v8 = vld [vmem:[#allocation2 + $0x8a] sm:$0xff]  ;;  %v1257_v45 = vmax.f32 %v1193_v53, %v1225_v21  ;;  %v1512_v21 = vmax.f32 %v5549_v50, %v5567_v17  ;;  %v1369_v43 = vld [vmem:[#allocation2 + $0x192] sm:$0xff] }
 0x142   : > { %v1145_v4 = vld [vmem:[#allocation2 + $0x18e] sm:$0xff]  ;;  %v1384_v11 = vmax.f32 %v1320_v56, %v1352_v8  ;;  %v1150_v53 = vld [vmem:[#allocation2 + $0x1e6] sm:$0xff] }
 0x143   : > { %v1177_v30 = vld [vmem:[#allocation2 + $0x18f] sm:$0xff]  ;;  %v1132_v41 = vld [vmem:[#allocation2 + $0xc6] sm:$0xff] }
 0x144   : > { %v1209_v42 = vmax.f32 %v1145_v4, %v1177_v30  ;;  %v1304_v62 = vld [vmem:[#allocation2 + $0x189] sm:$0xff]  ;;  %v1289_v49 = vld [vmem:[#allocation2 + $0x91] sm:$0xff]  ;;  %1417 = vst.msk [vmem:[#allocation3 + $0x60] sm:$0xff] %vm801_vm2, %v1384_v11  ;;  %v1573_v4 = vmax.f32 %v1509_v2, %v5606_v10 }
 0x145   : > { %v1241_v16 = vld [vmem:[#allocation2 + $0x190] sm:$0xff]  ;;  %v1336_v38 = vmax.f32 %v1272_v55, %v1304_v62  ;;  %v1321_v5 = vmax.f32 %v1257_v45, %v1289_v49  ;;  %v1134_v55 = vld [vmem:[#allocation2 + $0xe6] sm:$0xff]  ;;  %v1511_v45 = vmax.f32 %v5565_v29, %v5606_v10  ;;  %v1639_v49 = vmax.f32 %v1574_v60, %v5581_v23 }
 0x146   : > { %v1273_v3 = vmax.f32 %v1209_v42, %v1241_v16  ;;  %v1305_v8 = vld [vmem:[#allocation2 + $0x191] sm:$0xff]  ;;  %v1164_v42 = vld [vmem:[#allocation2 + $0xc7] sm:$0xff]  ;;  %v1576_v29 = vmax.f32 %v1512_v21, %v5581_v23 }
 0x147   : > { %v1368_v1 = vld [vmem:[#allocation2 + $0x18a] sm:$0xff]  ;;  %v1385_v56 = vmax.f32 %v1321_v5, %v1353_v44  ;;  %v1198_v5 = vmax.f32 %v1134_v55, %v1166_v13  ;;  %v1214_v44 = vmax.f32 %v1150_v53, %v1182_v48 }
 0x148   : > { %v5612_v28 = vld [vmem:[#allocation3 + $0xb0] sm:$0xff]  ;;  %v1400_v58 = vmax.f32 %v1336_v38, %v1368_v1  ;;  %v1337_v54 = vmax.f32 %v1273_v3, %v1305_v8  ;;  %v1148_v50 = vld [vmem:[#allocation2 + $0x1c6] sm:$0xff]  ;;  %v1196_v3 = vmax.f32 %v1132_v41, %v1164_v42  ;;  %v5638_v8 = vld [vmem:[#allocation3 + $0x58] sm:$0xff] }
 0x149   : > { %v5628_v7 = vld [vmem:[#allocation3 + $0x48] sm:$0xff]  ;;  %v1526_v22 = vmax.f32 %v5608_v57, %v5612_v28  ;;  %1418 = vst.msk [vmem:[#allocation3 + $0x68] sm:$0xff] %vm801_vm2, %v1385_v56  ;;  %v5656_v42 = vld [vmem:[#allocation3 + $0xb8] sm:$0xff] }
 0x14a   : > { %1433 = vst.msk [vmem:[#allocation3 + $0xe0] sm:$0xff] %vm801_vm2, %v1400_v58  ;;  %v1401_v11 = vmax.f32 %v1337_v54, %v1369_v43  ;;  %v1180_v62 = vld [vmem:[#allocation2 + $0x1c7] sm:$0xff]  ;;  %v1701_v2 = vmax.f32 %v1636_v46, %v5628_v7  ;;  %v1638_v19 = vmax.f32 %v1573_v4, %v5628_v7  ;;  %v1575_v60 = vmax.f32 %v1511_v45, %v5628_v7  ;;  %v4959_v46 = vpop.eup %4958 }
 0x14b   : > { %v2090_v16 = vld [vmem:[#allocation2 + $0x6] sm:$0xff]  ;;  %v1513_v55 = vmax.f32 %v5606_v10, %v5628_v7  ;;  %v1212_v54 = vmax.f32 %v1148_v50, %v1180_v62 }
 0x14c   : > { %v2122_v38 = vld [vmem:[#allocation2 + $0x7] sm:$0xff]  ;;  %1434 = vst.msk [vmem:[#allocation3 + $0xe8] sm:$0xff] %vm801_vm2, %v1401_v11  ;;  %v1764_v58 = vpack.c.bf16 %v1701_v2, %v5576_v37  ;;  %2059 = vst.msk [vmem:[#allocation2 + $0x10] sm:$0xff] %vm801_vm2, %v1701_v2  ;;  %v1703_v56 = vmax.f32 %v1638_v19, %v5638_v8  ;;  %v1514_v37 = vmax.f32 %v5567_v17, %v5581_v23 }
 0x14d   : > { %v5641_v1 = vld [vmem:[#allocation3 + $0xa8] sm:$0xff]  ;;  %v5652_v48 = vld [vmem:[#allocation3 + $0x60] sm:$0xff]  ;;  %v2154_v41 = vmax.f32 %v2090_v16, %v2122_v38  ;;  %v767_v16 = vmul.f32 %v4959_v46, %v5391_v59  ;;  %v5672_v38 = vld [vmem:[#allocation3 + $0x70] sm:$0xff] }
 0x14e   : > { %v2092_v13 = vld [vmem:[#allocation2 + $0x26] sm:$0xff]  ;;  %4705 = vmatprep.mubr.msk.bf16.mxu0 %vm801_vm2, %v1764_v58  ;;  %v1765_v10 = vpack.c.bf16 %v1703_v56, %v5591_v9  ;;  %2061 = vst.msk [vmem:[#allocation2 + $0x30] sm:$0xff] %vm801_vm2, %v1703_v56  ;;  %v1704_v45 = vmax.f32 %v1639_v49, %v5652_v48  ;;  %v1641_v50 = vmax.f32 %v1576_v29, %v5652_v48  ;;  %v4961_v58 = vpop.eup %4960 }
 0x14f   : > { %v2124_v53 = vld [vmem:[#allocation2 + $0x27] sm:$0xff]  ;;  %v1527_v17 = vmax.f32 %v5641_v1, %v5656_v42  ;;  %v1640_v29 = vmax.f32 %v1575_v60, %v5638_v8  ;;  %1103 = vst.msk [vmem:[#allocation2 + $0xf0] sm:$0xff] %vm801_vm2, %v767_v16 }
 0x150   : > { %v1230_v4 = vld [vmem:[#allocation2 + $0xe8] sm:$0xff]  ;;  %v5663_v11 = vld [vmem:[#allocation3 + $0xc0] sm:$0xff]  ;;  %v2156_v9 = vmax.f32 %v2092_v13, %v2124_v53  ;;  %4706 = vmatmul.mubr.msk.bf16.vlgmr.msra.gmra.mxu0 %vm801_vm2, %v1765_v10  ;;  %2062 = vst.msk [vmem:[#allocation2 + $0x48] sm:$0xff] %vm801_vm2, %v1704_v45 }
 0x151   : > { %v1246_v43 = vld [vmem:[#allocation2 + $0x1e8] sm:$0xff]  ;;  %v5667_v62 = vmax.f32 %v1198_v5, %v1230_v4  ;;  %v1706_v4 = vmax.f32 %v1641_v50, %v5672_v38  ;;  %4772 = vmatpush3.bf16.msra.mxu0 %v5255_v26  ;;  %v1590_v53 = vmax.f32 %v1526_v22, %v5663_v11 }
 0x152   : > { %v5669_v2 = vmax.f32 %v1214_v44, %v1246_v43  ;;  %v1228_v19 = vld [vmem:[#allocation2 + $0xc8] sm:$0xff]  ;;  %v1577_v44 = vmax.f32 %v1513_v55, %v5638_v8  ;;  %v4963_v43 = vpop.eup %4962 }
 0x153   : > { %v5674_v56 = vmax.f32 %v1196_v3, %v1228_v19  ;;  %v1244_v49 = vld [vmem:[#allocation2 + $0x1c8] sm:$0xff]  ;;  %v5685_v3 = vmul.f32 %v4961_v58, %v5412_v15  ;;  %v4965_v46 = vpop.eup %4964  ;;  %v765_v55 = vmul.f32 %v4963_v43, %v5435_v32  ;;  %2064 = vst.msk [vmem:[#allocation2 + $0x68] sm:$0xff] %vm801_vm2, %v1706_v4  ;;  %v5697_v19 = vld [vmem:[#allocation3 + $0xd0] sm:$0xff] }
 0x154   : > { %v2186_v5 = vld [vmem:[#allocation2 + $0x8] sm:$0xff]  ;;  %v5681_v59 = vmax.f32 %v1212_v54, %v1244_v49  ;;  %v5702_v26 = vmul.f32 %v4965_v46, %v5491_v51  ;;  %v5707_v49 = vmax.f32 %v1514_v37, %v5652_v48  ;;  %v791_v37 = vpack.c.bf16 %v767_v16, %v5552_v63 }
 0x155   : > { %v5688_v13 = vld [vmem:[#allocation3 + $0x68] sm:$0xff]  ;;  %v2218_v60 = vmax.f32 %v2154_v41, %v2186_v5  ;;  %1119 = vst.msk [vmem:[#allocation2 + $0x1f0] sm:$0xff] %vm801_vm2, %v5685_v3  ;;  %v5704_v41 = vld [vmem:[#allocation3 + $0x78] sm:$0xff]  ;;  %v790_v5 = vpack.c.bf16 %v765_v55, %v5572_v12  ;;  %1101 = vst.msk [vmem:[#allocation2 + $0xd0] sm:$0xff] %vm801_vm2, %v765_v55 }
 0x156   : > { %v1705_v10 = vmax.f32 %v1640_v29, %v5688_v13  ;;  %v1642_v54 = vmax.f32 %v1577_v44, %v5688_v13  ;;  %v2188_v50 = vld [vmem:[#allocation2 + $0x28] sm:$0xff]  ;;  %v1516_v29 = vmax.f32 %v5581_v23, %v5652_v48  ;;  %1117 = vst.msk [vmem:[#allocation2 + $0x1d0] sm:$0xff] %vm801_vm2, %v5702_v26  ;;  %v2187_v23 = vld [vmem:[#allocation2 + $0x10] sm:$0xff] }
 0x157   : > { %v2091_v22 = vld [vmem:[#allocation2 + $0xe] sm:$0xff]  ;;  %v2220_v58 = vmax.f32 %v2156_v9, %v2188_v50  ;;  %v5717_v9 = vld [vmem:[#allocation3 + $0xe0] sm:$0xff]  ;;  %4683 = vmatprep.mubr.msk.bf16.mxu1 %vm801_vm2, %v790_v5 }
 0x158   : > { %v2123_v32 = vld [vmem:[#allocation2 + $0xf] sm:$0xff]  ;;  %v1766_v44 = vpack.c.bf16 %v1705_v10, %v1704_v45  ;;  %2063 = vst.msk [vmem:[#allocation2 + $0x50] sm:$0xff] %vm801_vm2, %v1705_v10  ;;  %v1707_v46 = vmax.f32 %v1642_v54, %v5704_v41  ;;  %v1655_v45 = vmax.f32 %v1590_v53, %v5697_v19  ;;  %v1528_v10 = vmax.f32 %v5612_v28, %v5663_v11 }
 0x159   : > { %v2155_v51 = vmax.f32 %v2091_v22, %v2123_v32  ;;  %v2250_v43 = vld [vmem:[#allocation2 + $0x9] sm:$0xff]  ;;  %4684 = vmatmul.mubr.msk.bf16.gmra.mxu1 %vm801_vm2, %v791_v37 }
 0x15a   : > { %v5715_v30 = vld [vmem:[#allocation3 + $0xc8] sm:$0xff]  ;;  %v2282_v12 = vmax.f32 %v2218_v60, %v2250_v43  ;;  %4709 = vmatprep.mubr.msk.bf16.mxu0 %vm801_vm2, %v1766_v44  ;;  %v1767_v32 = vpack.c.bf16 %v1707_v46, %v1706_v4  ;;  %2065 = vst.msk [vmem:[#allocation2 + $0x70] sm:$0xff] %vm801_vm2, %v1707_v46  ;;  %v2251_v60 = vld [vmem:[#allocation2 + $0x11] sm:$0xff]  ;;  %v5732_v5 = vmax.f32 %v1655_v45, %v5717_v9 }
 0x15b   : > { %v2093_v50 = vld [vmem:[#allocation2 + $0x2e] sm:$0xff]  ;;  %v2219_v54 = vmax.f32 %v2155_v51, %v2187_v23  ;;  %4687 = vmatprep.mubr.msk.bf16.mxu1 %vm801_vm2, %v792_v27  ;;  %v1592_v27 = vmax.f32 %v1528_v10, %v5697_v19 }
 0x15c   : > { %v2125_v55 = vld [vmem:[#allocation2 + $0x2f] sm:$0xff]  ;;  %4710 = vmatmul.mubr.msk.bf16.gmra.mxu0 %vm801_vm2, %v1767_v32  ;;  %2078 = vst.msk [vmem:[#allocation2 + $0x148] sm:$0xff] %vm801_vm2, %v5732_v5 }
 0x15d   : > { %v2314_v22 = vld [vmem:[#allocation2 + $0xa] sm:$0xff]  ;;  %v2157_v63 = vmax.f32 %v2093_v50, %v2125_v55  ;;  %v2283_v4 = vmax.f32 %v2219_v54, %v2251_v60  ;;  %v2315_v50 = vld [vmem:[#allocation2 + $0x12] sm:$0xff] }
 0x15e   : > { %v2252_v16 = vld [vmem:[#allocation2 + $0x29] sm:$0xff]  ;;  %v2346_v43 = vmax.f32 %v2282_v12, %v2314_v22  ;;  %v2253_v55 = vld [vmem:[#allocation2 + $0x31] sm:$0xff] }
 0x15f   : > { %v2189_v21 = vld [vmem:[#allocation2 + $0x30] sm:$0xff]  ;;  %v2284_v53 = vmax.f32 %v2220_v58, %v2252_v16  ;;  %v5743_v58 = vmax.f32 %v1527_v17, %v5715_v30  ;;  %v2347_v22 = vmax.f32 %v2283_v4, %v2315_v50  ;;  %v1657_v4 = vmax.f32 %v1592_v27, %v5717_v9 }
 0x160   : > { %v1135_v44 = vld [vmem:[#allocation2 + $0xee] sm:$0xff]  ;;  %v2221_v46 = vmax.f32 %v2157_v63, %v2189_v21  ;;  %2378 = vst.msk [vmem:[#allocation3 + $0x20] sm:$0xff] %vm801_vm2, %v2346_v43  ;;  %v5753_v63 = vmax.f32 %v1516_v29, %v5672_v38  ;;  %v1517_v27 = vmax.f32 %v5638_v8, %v5688_v13 }
 0x161   : > { %v1167_v51 = vld [vmem:[#allocation2 + $0xef] sm:$0xff]  ;;  %2379 = vst.msk [vmem:[#allocation3 + $0x28] sm:$0xff] %vm801_vm2, %v2347_v22 }
 0x162   : > { %v2316_v37 = vld [vmem:[#allocation2 + $0x2a] sm:$0xff]  ;;  %v1199_v23 = vmax.f32 %v1135_v44, %v1167_v51  ;;  %v2285_v32 = vmax.f32 %v2221_v46, %v2253_v55  ;;  %v2317_v51 = vld [vmem:[#allocation2 + $0x32] sm:$0xff] }
 0x163   : > { %v1294_v12 = vld [vmem:[#allocation2 + $0xe9] sm:$0xff]  ;;  %v2348_v47 = vmax.f32 %v2284_v53, %v2316_v37  ;;  %v1295_v46 = vld [vmem:[#allocation2 + $0xf1] sm:$0xff] }
 0x164   : > { %v1231_v21 = vld [vmem:[#allocation2 + $0xf0] sm:$0xff]  ;;  %v1326_v45 = vmax.f32 %v5667_v62, %v1294_v12  ;;  %v7245_v62 = vmax.f32 %v5628_v7, %v5638_v8  ;;  %v2349_v55 = vmax.f32 %v2285_v32, %v2317_v51 }
 0x165   : > { %v1151_v17 = vld [vmem:[#allocation2 + $0x1ee] sm:$0xff]  ;;  %v1263_v60 = vmax.f32 %v1199_v23, %v1231_v21  ;;  %2380 = vst.msk [vmem:[#allocation3 + $0x30] sm:$0xff] %vm801_vm2, %v2348_v47 }
 0x166   : > { %v1183_v54 = vld [vmem:[#allocation2 + $0x1ef] sm:$0xff]  ;;  %v5762_v10 = vmax.f32 %v7245_v62, %v5688_v13  ;;  %v5769_v62 = vld [vmem:[#allocation2 + $0x46] sm:$0xff]  ;;  %2381 = vst.msk [vmem:[#allocation3 + $0x38] sm:$0xff] %vm801_vm2, %v2349_v55 }
 0x167   : > { %v5755_v16 = vld [vmem:[#allocation3 + $0xf0] sm:$0xff]  ;;  %v1215_v53 = vmax.f32 %v1151_v17, %v1183_v54  ;;  %v1327_v47 = vmax.f32 %v1263_v60, %v1295_v46 }
 0x168   : > { %v1358_v43 = vld [vmem:[#allocation2 + $0xea] sm:$0xff] }
 0x169   : > { %v1310_v44 = vld [vmem:[#allocation2 + $0x1e9] sm:$0xff]  ;;  %v1390_v29 = vmax.f32 %v1326_v45, %v1358_v43  ;;  %v5774_v45 = vmax.f32 %v1657_v4, %v5755_v16  ;;  %v1359_v43 = vld [vmem:[#allocation2 + $0xf2] sm:$0xff] }
 0x16a   : > { %v1247_v23 = vld [vmem:[#allocation2 + $0x1f0] sm:$0xff]  ;;  %v1342_v12 = vmax.f32 %v5669_v2, %v1310_v44  ;;  %v1391_v51 = vmax.f32 %v1327_v47, %v1359_v43 }
 0x16b   : > { %v1133_v50 = vld [vmem:[#allocation2 + $0xce] sm:$0xff]  ;;  %v1279_v21 = vmax.f32 %v1215_v53, %v1247_v23  ;;  %1423 = vst.msk [vmem:[#allocation3 + $0x90] sm:$0xff] %vm801_vm2, %v1390_v29  ;;  %v7246_v29 = vpack.c.bf16 %v5396_v36, %v5363_v40  ;;  %2080 = vst.msk [vmem:[#allocation2 + $0x168] sm:$0xff] %vm801_vm2, %v5774_v45  ;;  %v5796_v40 = vld [vmem:[#allocation3 + $0xd8] sm:$0xff]  ;;  %v1529_v36 = vmax.f32 %v5656_v42, %v5715_v30 }
 0x16c   : > { %v1374_v17 = vld [vmem:[#allocation2 + $0x1ea] sm:$0xff]  ;;  %1424 = vst.msk [vmem:[#allocation3 + $0x98] sm:$0xff] %vm801_vm2, %v1391_v51  ;;  %v1357_v43 = vld [vmem:[#allocation2 + $0xd2] sm:$0xff] }
 0x16d   : > { %v1165_v7 = vld [vmem:[#allocation2 + $0xcf] sm:$0xff]  ;;  %v1406_v44 = vmax.f32 %v1342_v12, %v1374_v17  ;;  %4688 = vmatmul.mubr.msk.bf16.gmra.mxu1 %vm801_vm2, %v7246_v29  ;;  %v5811_v29 = vld [vmem:[#allocation3] sm:$0xff] }
 0x16e   : > { %v1292_v54 = vld [vmem:[#allocation2 + $0xc9] sm:$0xff]  ;;  %v1311_v2 = vld [vmem:[#allocation2 + $0x1f1] sm:$0xff]  ;;  %v1197_v22 = vmax.f32 %v1133_v50, %v1165_v7  ;;  %v7247_v7 = vpack.c.bf16 %v5472_v18, %v5441_v33  ;;  %v1532_v33 = vmax.f32 %v5697_v19, %v5717_v9 }
 0x16f   : > { %v1229_v32 = vld [vmem:[#allocation2 + $0xd0] sm:$0xff]  ;;  %v1324_v60 = vmax.f32 %v5674_v56, %v1292_v54  ;;  %v1343_v46 = vmax.f32 %v1279_v21, %v1311_v2  ;;  %v1530_v56 = vmax.f32 %v5663_v11, %v5697_v19  ;;  %1439 = vst.msk [vmem:[#allocation3 + $0x110] sm:$0xff] %vm801_vm2, %v1406_v44 }
 0x170   : > { %v1356_v8 = vld [vmem:[#allocation2 + $0xca] sm:$0xff]  ;;  %v1375_v12 = vld [vmem:[#allocation2 + $0x1f2] sm:$0xff]  ;;  %v1261_v50 = vmax.f32 %v1197_v22, %v1229_v32  ;;  %4691 = vmatprep.mubr.msk.bf16.mxu1 %vm801_vm2, %v7247_v7 }
 0x171   : > { %v1149_v23 = vld [vmem:[#allocation2 + $0x1ce] sm:$0xff]  ;;  %v1388_v47 = vmax.f32 %v1324_v60, %v1356_v8  ;;  %v1407_v54 = vmax.f32 %v1343_v46, %v1375_v12  ;;  %v5803_v32 = vmax.f32 %v1530_v56, %v5717_v9 }
 0x172   : > { %v1181_v37 = vld [vmem:[#allocation2 + $0x1cf] sm:$0xff] }
 0x173   : > { %v1293_v55 = vld [vmem:[#allocation2 + $0xd1] sm:$0xff]  ;;  %v1213_v21 = vmax.f32 %v1149_v23, %v1181_v37  ;;  %v1308_v17 = vld [vmem:[#allocation2 + $0x1c9] sm:$0xff]  ;;  %1421 = vst.msk [vmem:[#allocation3 + $0x80] sm:$0xff] %vm801_vm2, %v1388_v47  ;;  %1440 = vst.msk [vmem:[#allocation3 + $0x118] sm:$0xff] %vm801_vm2, %v1407_v54 }
 0x174   : > { %v1245_v2 = vld [vmem:[#allocation2 + $0x1d0] sm:$0xff]  ;;  %v1340_v44 = vmax.f32 %v5681_v59, %v1308_v17  ;;  %v2126_v37 = vld [vmem:[#allocation2 + $0x47] sm:$0xff]  ;;  %v1325_v18 = vmax.f32 %v1261_v50, %v1293_v55 }
 0x175   : > { %v2095_v22 = vld [vmem:[#allocation2 + $0x4e] sm:$0xff]  ;;  %v1277_v60 = vmax.f32 %v1213_v21, %v1245_v2  ;;  %v2158_v59 = vmax.f32 %v5769_v62, %v2126_v37  ;;  %v5817_v21 = vmax.f32 %v1517_v27, %v5704_v41  ;;  %v5823_v62 = vld [vmem:[#allocation3 + $0x18] sm:$0xff]  ;;  %v2096_v54 = vld [vmem:[#allocation2 + $0x66] sm:$0xff] }
 0x176   : > { %v1309_v8 = vld [vmem:[#allocation2 + $0x1d1] sm:$0xff]  ;;  %v2190_v55 = vld [vmem:[#allocation2 + $0x48] sm:$0xff]  ;;  %v1389_v37 = vmax.f32 %v1325_v18, %v1357_v43  ;;  %v5836_v18 = vmax.f32 %v1532_v33, %v5755_v16 }
 0x177   : > { %v1372_v23 = vld [vmem:[#allocation2 + $0x1ca] sm:$0xff]  ;;  %v1373_v56 = vld [vmem:[#allocation2 + $0x1d2] sm:$0xff]  ;;  %v1341_v4 = vmax.f32 %v1277_v60, %v1309_v8  ;;  %v2222_v51 = vmax.f32 %v2158_v59, %v2190_v55 }
 0x178   : > { %v2127_v46 = vld [vmem:[#allocation2 + $0x4f] sm:$0xff]  ;;  %v1404_v17 = vmax.f32 %v1340_v44, %v1372_v23  ;;  %v5826_v44 = vmax.f32 %v1529_v36, %v5796_v40  ;;  %v2128_v23 = vld [vmem:[#allocation2 + $0x67] sm:$0xff]  ;;  %1422 = vst.msk [vmem:[#allocation3 + $0x88] sm:$0xff] %vm801_vm2, %v1389_v37 }
 0x179   : > { %v5813_v12 = vld [vmem:[#allocation3 + $0x10] sm:$0xff]  ;;  %v2159_v50 = vmax.f32 %v2095_v22, %v2127_v46  ;;  %v5821_v2 = vld [vmem:[#allocation3 + $0x8] sm:$0xff]  ;;  %v1405_v36 = vmax.f32 %v1341_v4, %v1373_v56  ;;  %v1534_v4 = vmax.f32 %v5717_v9, %v5755_v16  ;;  %v5854_v56 = vld [vmem:[#allocation3 + $0x98] sm:$0xff] }
 0x17a   : > { %v2254_v47 = vld [vmem:[#allocation2 + $0x49] sm:$0xff]  ;;  %1437 = vst.msk [vmem:[#allocation3 + $0x100] sm:$0xff] %vm801_vm2, %v1404_v17  ;;  %v2255_v60 = vld [vmem:[#allocation2 + $0x51] sm:$0xff] }
 0x17b   : > { %v2191_v53 = vld [vmem:[#allocation2 + $0x50] sm:$0xff]  ;;  %v2286_v8 = vmax.f32 %v2222_v51, %v2254_v47  ;;  %v2192_v7 = vld [vmem:[#allocation2 + $0x68] sm:$0xff]  ;;  %v3440_v51 = vmax.f32 %v5811_v29, %v5813_v12  ;;  %1438 = vst.msk [vmem:[#allocation3 + $0x108] sm:$0xff] %vm801_vm2, %v1405_v36  ;;  %v1525_v36 = vmax.f32 %v5854_v56, %v5641_v1 }
 0x17c   : > { %v2097_v15 = vld [vmem:[#allocation2 + $0x6e] sm:$0xff]  ;;  %v2223_v27 = vmax.f32 %v2159_v50, %v2191_v53  ;;  %v2160_v53 = vmax.f32 %v2096_v54, %v2128_v23  ;;  %v7248_v50 = vpack.c.bf16 %v5456_v20, %v5427_v31  ;;  %v7249_v31 = vpack.c.bf16 %v5547_v24, %v5517_v39  ;;  %v5856_v54 = vld [vmem:[#allocation3 + $0x20] sm:$0xff] }
 0x17d   : > { %v5829_v22 = vld [vmem:[#allocation3 + $0x90] sm:$0xff]  ;;  %v1676_v23 = vld [vmem:[#allocation3 + $0x80] sm:$0xff]  ;;  %v2538_v24 = vmax.f32 %v5336_v6, %v5856_v54 }
 0x17e   : > { %v2129_v46 = vld [vmem:[#allocation2 + $0x6f] sm:$0xff]  ;;  %4692 = vmatmul.mubr.msk.bf16.gmra.mxu1 %vm801_vm2, %v7248_v50  ;;  %v2287_v55 = vmax.f32 %v2223_v27, %v2255_v60  ;;  %v1524_v33 = vmax.f32 %v5829_v22, %v5608_v57  ;;  %v2224_v47 = vmax.f32 %v2160_v53, %v2192_v7  ;;  %v3441_v27 = vmax.f32 %v5821_v2, %v5823_v62 }
 0x17f   : > { %v2318_v59 = vld [vmem:[#allocation2 + $0x4a] sm:$0xff]  ;;  %v2161_v17 = vmax.f32 %v2097_v15, %v2129_v46  ;;  %4695 = vmatprep.mubr.msk.bf16.mxu1 %vm801_vm2, %v7249_v31  ;;  %v2319_v20 = vld [vmem:[#allocation2 + $0x52] sm:$0xff]  ;;  %v7250_v7 = vmax.f32 %v5707_v49, %v5672_v38  ;;  %v1520_v31 = vmax.f32 %v5672_v38, %v1676_v23  ;;  %v1589_v49 = vmax.f32 %v1525_v36, %v5656_v42 }
 0x180   : > { %v2193_v14 = vld [vmem:[#allocation2 + $0x70] sm:$0xff]  ;;  %v2350_v15 = vmax.f32 %v2286_v8, %v2318_v59  ;;  %v2351_v46 = vmax.f32 %v2287_v55, %v2319_v20  ;;  %v1588_v39 = vmax.f32 %v1524_v33, %v5612_v28  ;;  %v1645_v8 = vmax.f32 %v5753_v63, %v1676_v23 }
 0x181   : > { %v2256_v43 = vld [vmem:[#allocation2 + $0x69] sm:$0xff]  ;;  %v2225_v37 = vmax.f32 %v2161_v17, %v2193_v14  ;;  %v2257_v60 = vld [vmem:[#allocation2 + $0x71] sm:$0xff]  ;;  %v1708_v14 = vmax.f32 %v7250_v7, %v1676_v23  ;;  %v7251_v55 = vmax.f32 %v5652_v48, %v5672_v38  ;;  %v1522_v20 = vmax.f32 %v1676_v23, %v5829_v22 }
 0x182   : > { %2382 = vst.msk [vmem:[#allocation3 + $0x40] sm:$0xff] %vm801_vm2, %v2350_v15  ;;  %v2288_v59 = vmax.f32 %v2224_v47, %v2256_v43  ;;  %2383 = vst.msk [vmem:[#allocation3 + $0x48] sm:$0xff] %vm801_vm2, %v2351_v46  ;;  %v2320_v17 = vld [vmem:[#allocation2 + $0x6a] sm:$0xff]  ;;  %v2321_v50 = vld [vmem:[#allocation2 + $0x72] sm:$0xff]  ;;  %v1710_v63 = vmax.f32 %v1645_v8, %v5829_v22  ;;  %v1653_v47 = vmax.f32 %v1588_v39, %v5663_v11 }
 0x183   : > { %v2289_v53 = vmax.f32 %v2225_v37, %v2257_v60  ;;  %v1582_v33 = vmax.f32 %v7251_v55, %v1676_v23  ;;  %2066 = vst.msk [vmem:[#allocation2 + $0x88] sm:$0xff] %vm801_vm2, %v1708_v14  ;;  %v1677_v37 = vld [vmem:[#allocation3 + $0x88] sm:$0xff]  ;;  %v1584_v48 = vmax.f32 %v1520_v31, %v5829_v22  ;;  %v1586_v60 = vmax.f32 %v1522_v20, %v5608_v57 }
 0x184   : > { %v2352_v43 = vmax.f32 %v2288_v59, %v2320_v17  ;;  %v1654_v38 = vmax.f32 %v1589_v49, %v5715_v30  ;;  %v7252_v23 = vmax.f32 %v5762_v10, %v5704_v41  ;;  %v1646_v7 = vmax.f32 %v5817_v21, %v1677_v37  ;;  %2068 = vst.msk [vmem:[#allocation2 + $0xa8] sm:$0xff] %vm801_vm2, %v1710_v63  ;;  %v5911_v55 = vld [vmem:[#allocation3 + $0x28] sm:$0xff] }
 0x185   : > { %v2353_v15 = vmax.f32 %v2289_v53, %v2321_v50  ;;  %v1647_v46 = vmax.f32 %v1582_v33, %v5829_v22  ;;  %v7253_v39 = vmax.f32 %v5688_v13, %v5704_v41  ;;  %v1521_v8 = vmax.f32 %v5704_v41, %v1677_v37  ;;  %v5915_v33 = vld [vmem:[#allocation3 + $0xe8] sm:$0xff] }
 0x186   : > { %v1709_v36 = vmax.f32 %v7252_v23, %v1677_v37  ;;  %2384 = vst.msk [vmem:[#allocation3 + $0x50] sm:$0xff] %vm801_vm2, %v2352_v43  ;;  %v7254_v59 = vpack.c.bf16 %v5528_v0, %v5501_v25  ;;  %v1649_v21 = vmax.f32 %v1584_v48, %v5608_v57  ;;  %v1523_v53 = vmax.f32 %v1677_v37, %v5854_v56  ;;  %v5935_v43 = vld [vmem:[#allocation3 + $0x38] sm:$0xff] }
 0x187   : > { %2385 = vst.msk [vmem:[#allocation3 + $0x58] sm:$0xff] %vm801_vm2, %v2353_v15  ;;  %v1583_v22 = vmax.f32 %v7253_v39, %v1677_v37  ;;  %v1712_v10 = vmax.f32 %v1647_v46, %v5608_v57  ;;  %v1651_v17 = vmax.f32 %v1586_v60, %v5612_v28  ;;  %v7255_v50 = vpack.c.bf16 %v5702_v26, %v5586_v61  ;;  %v5913_v57 = vld [vmem:[#allocation3 + $0x30] sm:$0xff] }
 0x188   : > { %4696 = vmatmul.mubr.msk.bf16.gmra.mxu1 %vm801_vm2, %v7254_v59  ;;  %v1768_v13 = vpack.c.bf16 %v1709_v36, %v1708_v14  ;;  %2067 = vst.msk [vmem:[#allocation2 + $0x90] sm:$0xff] %vm801_vm2, %v1709_v36  ;;  %v1711_v25 = vmax.f32 %v1646_v7, %v5854_v56  ;;  %v1585_v41 = vmax.f32 %v1521_v8, %v5854_v56 }
 0x189   : > { %4699 = vmatprep.mubr.msk.bf16.mxu1 %vm801_vm2, %v7255_v50  ;;  %v1648_v0 = vmax.f32 %v1583_v22, %v5854_v56  ;;  %2070 = vst.msk [vmem:[#allocation2 + $0xc8] sm:$0xff] %vm801_vm2, %v1712_v10  ;;  %v5919_v61 = vmax.f32 %v1649_v21, %v5612_v28  ;;  %v1587_v26 = vmax.f32 %v1523_v53, %v5641_v1  ;;  %v5937_v15 = vld [vmem:[#allocation3 + $0x40] sm:$0xff]  ;;  %v5967_v6 = vld [vmem:[#allocation3 + $0x48] sm:$0xff]  ;;  %v5984_v53 = vld [vmem:[#allocation3 + $0xf8] sm:$0xff] }
 0x18a   : > { %v5923_v14 = vmax.f32 %v1651_v17, %v5663_v11  ;;  %v5926_v31 = vmax.f32 %v1653_v47, %v5697_v19  ;;  %4713 = vmatprep.mubr.msk.bf16.mxu0 %vm801_vm2, %v1768_v13  ;;  %v1769_v56 = vpack.c.bf16 %v1711_v25, %v1710_v63  ;;  %2069 = vst.msk [vmem:[#allocation2 + $0xb0] sm:$0xff] %vm801_vm2, %v1711_v25  ;;  %v2098_v11 = vld [vmem:[#allocation2 + $0x86] sm:$0xff] }
 0x18b   : > { %v1713_v20 = vmax.f32 %v1648_v0, %v5641_v1  ;;  %v1650_v49 = vmax.f32 %v1585_v41, %v5641_v1  ;;  %v5933_v28 = vmax.f32 %v1654_v38, %v5796_v40  ;;  %v2130_v37 = vld [vmem:[#allocation2 + $0x87] sm:$0xff]  ;;  %2072 = vst.msk [vmem:[#allocation2 + $0xe8] sm:$0xff] %vm801_vm2, %v5919_v61  ;;  %v1652_v19 = vmax.f32 %v1587_v26, %v5656_v42 }
 0x18c   : > { %2074 = vst.msk [vmem:[#allocation2 + $0x108] sm:$0xff] %vm801_vm2, %v5923_v14  ;;  %2076 = vst.msk [vmem:[#allocation2 + $0x128] sm:$0xff] %vm801_vm2, %v5926_v31  ;;  %v2539_v1 = vmax.f32 %v5563_v34, %v5911_v55  ;;  %v2602_v63 = vmax.f32 %v2538_v24, %v5913_v57  ;;  %v7256_v47 = vmax.f32 %v5743_v58, %v5796_v40  ;;  %4714 = vmatmul.mubr.msk.bf16.gmra.mxu0 %vm801_vm2, %v1769_v56  ;;  %v2194_v58 = vld [vmem:[#allocation2 + $0x88] sm:$0xff] }
 0x18d   : > { %v1770_v48 = vpack.c.bf16 %v1713_v20, %v1712_v10  ;;  %2071 = vst.msk [vmem:[#allocation2 + $0xd0] sm:$0xff] %vm801_vm2, %v1713_v20  ;;  %v2162_v60 = vmax.f32 %v2098_v11, %v2130_v37  ;;  %v5961_v38 = vmax.f32 %v1650_v49, %v5656_v42  ;;  %v1773_v34 = vpack.c.bf16 %v5933_v28, %v5926_v31  ;;  %v2100_v24 = vld [vmem:[#allocation2 + $0xa6] sm:$0xff]  ;;  %v5094_v10 = vld [vmem:[#allocation3 + $0x10] sm:$0xff] }
 0x18e   : > { %v5956_v46 = vmax.f32 %v7256_v47, %v5915_v33  ;;  %2077 = vst.msk [vmem:[#allocation2 + $0x130] sm:$0xff] %vm801_vm2, %v5933_v28  ;;  %v2132_v23 = vld [vmem:[#allocation2 + $0xa7] sm:$0xff]  ;;  %v5970_v36 = vmax.f32 %v1652_v19, %v5715_v30  ;;  %v2603_v7 = vmax.f32 %v2539_v1, %v5935_v43  ;;  %v2666_v39 = vmax.f32 %v2602_v63, %v5937_v15  ;;  %v6001_v49 = vld [vmem:[#allocation3 + $0x50] sm:$0xff] }
 0x18f   : > { %4717 = vmatprep.mubr.msk.bf16.mxu0 %vm801_vm2, %v1770_v48  ;;  %v2226_v22 = vmax.f32 %v2162_v60, %v2194_v58  ;;  %v1771_v8 = vpack.c.bf16 %v5961_v38, %v5919_v61  ;;  %2073 = vst.msk [vmem:[#allocation2 + $0xf0] sm:$0xff] %vm801_vm2, %v5961_v38  ;;  %v2164_v59 = vmax.f32 %v2100_v24, %v2132_v23  ;;  %v2099_v17 = vld [vmem:[#allocation2 + $0x8e] sm:$0xff] }
 0x190   : > { %v1774_v42 = vpack.c.bf16 %v5956_v46, %v5732_v5  ;;  %2079 = vst.msk [vmem:[#allocation2 + $0x150] sm:$0xff] %vm801_vm2, %v5956_v46  ;;  %v2476_v21 = vmax.f32 %v5094_v10, %v5856_v54  ;;  %v2131_v50 = vld [vmem:[#allocation2 + $0x8f] sm:$0xff]  ;;  %v7257_v13 = vpack.c.bf16 %v5685_v3, %v5559_v35  ;;  %v1772_v0 = vpack.c.bf16 %v5970_v36, %v5923_v14  ;;  %v6003_v14 = vld [vmem:[#allocation3 + $0x58] sm:$0xff]  ;;  %v2102_v10 = vld [vmem:[#allocation2 + $0xc6] sm:$0xff] }
 0x191   : > { %v2196_v25 = vld [vmem:[#allocation2 + $0xa8] sm:$0xff]  ;;  %2075 = vst.msk [vmem:[#allocation2 + $0x110] sm:$0xff] %vm801_vm2, %v5970_v36  ;;  %v2667_v41 = vmax.f32 %v2603_v7, %v5967_v6  ;;  %3024 = vst.msk [vmem:[#allocation2 + $0x8] sm:$0xff] %vm801_vm2, %v2666_v39  ;;  %v2477_v61 = vmax.f32 %v5540_v52, %v5911_v55  ;;  %v1658_v26 = vmax.f32 %v5826_v44, %v5915_v33  ;;  %v2195_v37 = vld [vmem:[#allocation2 + $0x90] sm:$0xff] }
 0x192   : > { %4700 = vmatmul.mubr.msk.bf16.gmra.mxu1 %vm801_vm2, %v7257_v13  ;;  %v2163_v35 = vmax.f32 %v2099_v17, %v2131_v50  ;;  %v2258_v3 = vld [vmem:[#allocation2 + $0x89] sm:$0xff]  ;;  %v2228_v56 = vmax.f32 %v2164_v59, %v2196_v25  ;;  %v2540_v20 = vmax.f32 %v2476_v21, %v5913_v57  ;;  %v2478_v11 = vmax.f32 %v5856_v54, %v5913_v57  ;;  %v2259_v60 = vld [vmem:[#allocation2 + $0x91] sm:$0xff]  ;;  %v6021_v50 = vld [vmem:[#allocation3 + $0x100] sm:$0xff] }
 0x193   : > { %v2290_v19 = vmax.f32 %v2226_v22, %v2258_v3  ;;  %v2101_v1 = vld [vmem:[#allocation2 + $0xae] sm:$0xff]  ;;  %v2730_v52 = vpack.c.bf16 %v2667_v41, %v2666_v39  ;;  %3025 = vst.msk [vmem:[#allocation2 + $0x10] sm:$0xff] %vm801_vm2, %v2667_v41  ;;  %v2541_v44 = vmax.f32 %v2477_v61, %v5935_v43  ;;  %v6010_v47 = vmax.f32 %v1658_v26, %v5984_v53 }
 0x194   : > { %v2133_v63 = vld [vmem:[#allocation2 + $0xaf] sm:$0xff]  ;;  %v2227_v48 = vmax.f32 %v2163_v35, %v2195_v37  ;;  %v2604_v23 = vmax.f32 %v2540_v20, %v5937_v15  ;;  %v2479_v54 = vmax.f32 %v5911_v55, %v5935_v43  ;;  %4718 = vmatmul.mubr.msk.bf16.gmra.mxu0 %vm801_vm2, %v1771_v8  ;;  %v2134_v41 = vld [vmem:[#allocation2 + $0xc7] sm:$0xff]  ;;  %v6026_v35 = vmax.f32 %v2478_v11, %v5937_v15 }
 0x195   : > { %v2322_v38 = vld [vmem:[#allocation2 + $0x8a] sm:$0xff]  ;;  %v2165_v58 = vmax.f32 %v2101_v1, %v2133_v63  ;;  %v2323_v36 = vld [vmem:[#allocation2 + $0x92] sm:$0xff]  ;;  %4739 = vmatprep.mubr.msk.bf16.mxu1 %vm801_vm2, %v2730_v52  ;;  %v2605_v21 = vmax.f32 %v2541_v44, %v5967_v6  ;;  %v1775_v17 = vpack.c.bf16 %v6010_v47, %v5774_v45  ;;  %2081 = vst.msk [vmem:[#allocation2 + $0x170] sm:$0xff] %vm801_vm2, %v6010_v47 }
 0x196   : > { %v2260_v24 = vld [vmem:[#allocation2 + $0xa9] sm:$0xff]  ;;  %v2354_v7 = vmax.f32 %v2290_v19, %v2322_v38  ;;  %v2291_v13 = vmax.f32 %v2227_v48, %v2259_v60  ;;  %v2668_v26 = vmax.f32 %v2604_v23, %v6001_v49  ;;  %v2261_v3 = vld [vmem:[#allocation2 + $0xb1] sm:$0xff]  ;;  %4721 = vmatprep.mubr.msk.bf16.mxu0 %vm801_vm2, %v1772_v0  ;;  %v2166_v37 = vmax.f32 %v2102_v10, %v2134_v41 }
 0x197   : > { %v2197_v39 = vld [vmem:[#allocation2 + $0xb0] sm:$0xff]  ;;  %v2292_v22 = vmax.f32 %v2228_v56, %v2260_v24  ;;  %v2198_v1 = vld [vmem:[#allocation2 + $0xc8] sm:$0xff]  ;;  %v2669_v8 = vmax.f32 %v2605_v21, %v6003_v14  ;;  %v2606_v0 = vmax.f32 %v6026_v35, %v6001_v49 }
 0x198   : > { %v2324_v59 = vld [vmem:[#allocation2 + $0xaa] sm:$0xff]  ;;  %v2229_v55 = vmax.f32 %v2165_v58, %v2197_v39  ;;  %2386 = vst.msk [vmem:[#allocation3 + $0x60] sm:$0xff] %vm801_vm2, %v2354_v7  ;;  %v2325_v56 = vld [vmem:[#allocation2 + $0xb2] sm:$0xff]  ;;  %v2355_v44 = vmax.f32 %v2291_v13, %v2323_v36  ;;  %3026 = vst.msk [vmem:[#allocation2 + $0x28] sm:$0xff] %vm801_vm2, %v2668_v26  ;;  %v6033_v58 = vmax.f32 %v2479_v54, %v5967_v6 }
 0x199   : > { %v2103_v25 = vld [vmem:[#allocation2 + $0xce] sm:$0xff]  ;;  %v2356_v20 = vmax.f32 %v2292_v22, %v2324_v59  ;;  %v2110_v63 = vld [vmem:[#allocation2 + $0x146] sm:$0xff]  ;;  %v2230_v23 = vmax.f32 %v2166_v37, %v2198_v1  ;;  %v2731_v59 = vpack.c.bf16 %v2669_v8, %v2668_v26  ;;  %3027 = vst.msk [vmem:[#allocation2 + $0x30] sm:$0xff] %vm801_vm2, %v2669_v8  ;;  %v7258_v54 = vmax.f32 %v5715_v30, %v5796_v40 }
 0x19a   : > { %v2135_v61 = vld [vmem:[#allocation2 + $0xcf] sm:$0xff]  ;;  %v2142_v52 = vld [vmem:[#allocation2 + $0x147] sm:$0xff]  ;;  %v2293_v48 = vmax.f32 %v2229_v55, %v2261_v3  ;;  %2387 = vst.msk [vmem:[#allocation3 + $0x68] sm:$0xff] %vm801_vm2, %v2355_v44  ;;  %v7259_v26 = vmax.f32 %v5803_v32, %v5755_v16 }
 0x19b   : > { %v2167_v19 = vmax.f32 %v2103_v25, %v2135_v61  ;;  %v2199_v60 = vld [vmem:[#allocation2 + $0xd0] sm:$0xff]  ;;  %v6037_v24 = vld [vmem:[#allocation3 + $0x108] sm:$0xff]  ;;  %2388 = vst.msk [vmem:[#allocation3 + $0x70] sm:$0xff] %vm801_vm2, %v2356_v20  ;;  %v1595_v10 = vmax.f32 %v7258_v54, %v5915_v33  ;;  %v2607_v61 = vmax.f32 %v6033_v58, %v6003_v14  ;;  %4740 = vmatmul.mubr.msk.bf16.vlgmr.msra.gmra.mxu1 %vm801_vm2, %v2731_v59 }
 0x19c   : > { %v2262_v38 = vld [vmem:[#allocation2 + $0xc9] sm:$0xff]  ;;  %v2263_v11 = vld [vmem:[#allocation2 + $0xd1] sm:$0xff]  ;;  %v2357_v21 = vmax.f32 %v2293_v48, %v2325_v56  ;;  %v6052_v3 = vmax.f32 %v7259_v26, %v6021_v50  ;;  %v2174_v32 = vmax.f32 %v2110_v63, %v2142_v52  ;;  %4722 = vmatmul.mubr.msk.bf16.gmra.mxu0 %vm801_vm2, %v1773_v34 }
 0x19d   : > { %v2231_v7 = vmax.f32 %v2167_v19, %v2199_v60  ;;  %v2104_v39 = vld [vmem:[#allocation2 + $0xe6] sm:$0xff]  ;;  %v2105_v36 = vld [vmem:[#allocation2 + $0xee] sm:$0xff]  ;;  %v2294_v20 = vmax.f32 %v2230_v23, %v2262_v38  ;;  %v1660_v56 = vmax.f32 %v1595_v10, %v5984_v53  ;;  %v2480_v38 = vmax.f32 %v5913_v57, %v5937_v15  ;;  %4725 = vmatprep.mubr.msk.bf16.mxu0 %vm801_vm2, %v1774_v42 }
 0x19e   : > { %v2136_v22 = vld [vmem:[#allocation2 + $0xe7] sm:$0xff]  ;;  %v2327_v55 = vld [vmem:[#allocation2 + $0xd2] sm:$0xff]  ;;  %2389 = vst.msk [vmem:[#allocation3 + $0x78] sm:$0xff] %vm801_vm2, %v2357_v21  ;;  %2082 = vst.msk [vmem:[#allocation2 + $0x188] sm:$0xff] %vm801_vm2, %v6052_v3 }
 0x19f   : > { %v2326_v13 = vld [vmem:[#allocation2 + $0xca] sm:$0xff]  ;;  %v2168_v41 = vmax.f32 %v2104_v39, %v2136_v22  ;;  %v2295_v37 = vmax.f32 %v2231_v7, %v2263_v11  ;;  %v2481_v11 = vmax.f32 %v5935_v43, %v5967_v6  ;;  %v6064_v21 = vmax.f32 %v1660_v56, %v6037_v24  ;;  %v2329_v52 = vld [vmem:[#allocation2 + $0xf2] sm:$0xff] }
 0x1a0   : > { %v2137_v25 = vld [vmem:[#allocation2 + $0xef] sm:$0xff]  ;;  %v2106_v39 = vld [vmem:[#allocation2 + $0x106] sm:$0xff]  ;;  %v2358_v23 = vmax.f32 %v2294_v20, %v2326_v13 }
 0x1a1   : > { %v2169_v30 = vmax.f32 %v2105_v36, %v2137_v25  ;;  %v2200_v19 = vld [vmem:[#allocation2 + $0xe8] sm:$0xff]  ;;  %v2201_v1 = vld [vmem:[#allocation2 + $0xf0] sm:$0xff]  ;;  %v2359_v7 = vmax.f32 %v2295_v37, %v2327_v55  ;;  %v1776_v37 = vpack.c.bf16 %v6064_v21, %v6052_v3  ;;  %2083 = vst.msk [vmem:[#allocation2 + $0x190] sm:$0xff] %vm801_vm2, %v6064_v21 }
 0x1a2   : > { %v2264_v8 = vld [vmem:[#allocation2 + $0xe9] sm:$0xff]  ;;  %v2232_v48 = vmax.f32 %v2168_v41, %v2200_v19  ;;  %v2265_v60 = vld [vmem:[#allocation2 + $0xf1] sm:$0xff]  ;;  %2390 = vst.msk [vmem:[#allocation3 + $0x80] sm:$0xff] %vm801_vm2, %v2358_v23  ;;  %v6090_v19 = vmax.f32 %v2481_v11, %v6003_v14 }
 0x1a3   : > { %v2206_v44 = vld [vmem:[#allocation2 + $0x148] sm:$0xff]  ;;  %v2233_v36 = vmax.f32 %v2169_v30, %v2201_v1  ;;  %v2203_v43 = vld [vmem:[#allocation2 + $0x110] sm:$0xff]  ;;  %2391 = vst.msk [vmem:[#allocation3 + $0x88] sm:$0xff] %vm801_vm2, %v2359_v7  ;;  %v6087_v30 = vmax.f32 %v2480_v38, %v6001_v49  ;;  %v2483_v38 = vmax.f32 %v5967_v6, %v6003_v14 }
 0x1a4   : > { %v2107_v22 = vld [vmem:[#allocation2 + $0x10e] sm:$0xff]  ;;  %v2296_v63 = vmax.f32 %v2232_v48, %v2264_v8  ;;  %v6070_v13 = vmax.f32 %v2174_v32, %v2206_v44  ;;  %v6072_v55 = vld [vmem:[#allocation2 + $0x166] sm:$0xff]  ;;  %v2482_v44 = vmax.f32 %v5937_v15, %v6001_v49  ;;  %v1661_v15 = vmax.f32 %v5836_v18, %v6021_v50  ;;  %4726 = vmatmul.mubr.msk.bf16.gmra.mxu0 %vm801_vm2, %v1775_v17 }
 0x1a5   : > { %v2328_v59 = vld [vmem:[#allocation2 + $0xea] sm:$0xff]  ;;  %v2297_v20 = vmax.f32 %v2233_v36, %v2265_v60  ;;  %4729 = vmatprep.mubr.msk.bf16.mxu0 %vm801_vm2, %v1776_v37 }
 0x1a6   : > { %v2138_v54 = vld [vmem:[#allocation2 + $0x107] sm:$0xff]  ;;  %v2139_v10 = vld [vmem:[#allocation2 + $0x10f] sm:$0xff]  ;;  %v2360_v1 = vmax.f32 %v2296_v63, %v2328_v59 }
 0x1a7   : > { %v2170_v57 = vmax.f32 %v2106_v39, %v2138_v54  ;;  %v2171_v25 = vmax.f32 %v2107_v22, %v2139_v10  ;;  %v2202_v41 = vld [vmem:[#allocation2 + $0x108] sm:$0xff]  ;;  %v2267_v28 = vld [vmem:[#allocation2 + $0x111] sm:$0xff]  ;;  %v2361_v48 = vmax.f32 %v2297_v20, %v2329_v52  ;;  %v1533_v10 = vmax.f32 %v5796_v40, %v5915_v33 }
 0x1a8   : > { %v6074_v26 = vld [vmem:[#allocation2 + $0x167] sm:$0xff]  ;;  %v2141_v56 = vld [vmem:[#allocation2 + $0x12f] sm:$0xff]  ;;  %2392 = vst.msk [vmem:[#allocation3 + $0x90] sm:$0xff] %vm801_vm2, %v2360_v1 }
 0x1a9   : > { %v2266_v31 = vld [vmem:[#allocation2 + $0x109] sm:$0xff]  ;;  %v2234_v8 = vmax.f32 %v2170_v57, %v2202_v41  ;;  %v2235_v5 = vmax.f32 %v2171_v25, %v2203_v43  ;;  %v2331_v39 = vld [vmem:[#allocation2 + $0x112] sm:$0xff]  ;;  %2393 = vst.msk [vmem:[#allocation3 + $0x98] sm:$0xff] %vm801_vm2, %v2361_v48  ;;  %v6102_v57 = vld [vmem:[#allocation3 + $0x60] sm:$0xff]  ;;  %v2176_v41 = vmax.f32 %v6072_v55, %v6074_v26  ;;  %v1535_v43 = vmax.f32 %v5915_v33, %v5984_v53 }
 0x1aa   : > { %v2108_v34 = vld [vmem:[#allocation2 + $0x126] sm:$0xff]  ;;  %v2109_v46 = vld [vmem:[#allocation2 + $0x12e] sm:$0xff]  ;;  %v2670_v18 = vmax.f32 %v2606_v0, %v6102_v57  ;;  %v2608_v48 = vmax.f32 %v6087_v30, %v6102_v57 }
 0x1ab   : > { %v2140_v42 = vld [vmem:[#allocation2 + $0x127] sm:$0xff]  ;;  %v2173_v32 = vmax.f32 %v2109_v46, %v2141_v56  ;;  %v2298_v11 = vmax.f32 %v2234_v8, %v2266_v31  ;;  %v2299_v7 = vmax.f32 %v2235_v5, %v2267_v28  ;;  %v2205_v36 = vld [vmem:[#allocation2 + $0x130] sm:$0xff] }
 0x1ac   : > { %v2330_v60 = vld [vmem:[#allocation2 + $0x10a] sm:$0xff]  ;;  %v2172_v22 = vmax.f32 %v2108_v34, %v2140_v42  ;;  %v2333_v5 = vld [vmem:[#allocation2 + $0x132] sm:$0xff]  ;;  %3028 = vst.msk [vmem:[#allocation2 + $0x48] sm:$0xff] %vm801_vm2, %v2670_v18 }
 0x1ad   : > { %v2204_v23 = vld [vmem:[#allocation2 + $0x128] sm:$0xff]  ;;  %v2269_v54 = vld [vmem:[#allocation2 + $0x131] sm:$0xff]  ;;  %v2237_v52 = vmax.f32 %v2173_v32, %v2205_v36  ;;  %v2362_v20 = vmax.f32 %v2298_v11, %v2330_v60  ;;  %v2363_v40 = vmax.f32 %v2299_v7, %v2331_v39  ;;  %v6133_v39 = vmax.f32 %v2482_v44, %v6102_v57 }
 0x1ae   : > { %v2268_v59 = vld [vmem:[#allocation2 + $0x129] sm:$0xff]  ;;  %v2236_v63 = vmax.f32 %v2172_v22, %v2204_v23  ;;  %v3217_v23 = vld [vmem:[#allocation2 + $0x11] sm:$0xff] }
 0x1af   : > { %v6104_v6 = vld [vmem:[#allocation3 + $0x68] sm:$0xff]  ;;  %v2301_v55 = vmax.f32 %v2237_v52, %v2269_v54  ;;  %v6118_v56 = vld [vmem:[#allocation3 + $0x110] sm:$0xff]  ;;  %2394 = vst.msk [vmem:[#allocation3 + $0xa0] sm:$0xff] %vm801_vm2, %v2362_v20  ;;  %2395 = vst.msk [vmem:[#allocation3 + $0xa8] sm:$0xff] %vm801_vm2, %v2363_v40 }
 0x1b0   : > { %v3056_v25 = vld [vmem:[#allocation2 + $0x6] sm:$0xff]  ;;  %v2671_v31 = vmax.f32 %v2607_v61, %v6104_v6  ;;  %v3057_v28 = vld [vmem:[#allocation2 + $0xe] sm:$0xff]  ;;  %v2300_v8 = vmax.f32 %v2236_v63, %v2268_v59  ;;  %v2609_v60 = vmax.f32 %v6090_v19, %v6104_v6  ;;  %v2547_v54 = vmax.f32 %v2483_v38, %v6104_v6  ;;  %v6150_v40 = vld [vmem:[#allocation3 + $0x78] sm:$0xff] }
 0x1b1   : > { %v3088_v34 = vld [vmem:[#allocation2 + $0x7] sm:$0xff]  ;;  %v3089_v1 = vld [vmem:[#allocation2 + $0xf] sm:$0xff]  ;;  %v2365_v17 = vmax.f32 %v2301_v55, %v2333_v5  ;;  %v1597_v63 = vmax.f32 %v1533_v10, %v5984_v53  ;;  %v6143_v52 = vmax.f32 %v1661_v15, %v6118_v56 }
 0x1b2   : > { %v2332_v26 = vld [vmem:[#allocation2 + $0x12a] sm:$0xff]  ;;  %v3120_v46 = vmax.f32 %v3056_v25, %v3088_v34  ;;  %v3121_v42 = vmax.f32 %v3057_v28, %v3089_v1  ;;  %v2732_v35 = vpack.c.bf16 %v2671_v31, %v2670_v18  ;;  %3029 = vst.msk [vmem:[#allocation2 + $0x50] sm:$0xff] %vm801_vm2, %v2671_v31  ;;  %v3281_v19 = vld [vmem:[#allocation2 + $0x12] sm:$0xff]  ;;  %v2673_v15 = vmax.f32 %v2609_v60, %v6150_v40 }
 0x1b3   : > { %v3152_v58 = vld [vmem:[#allocation2 + $0x8] sm:$0xff]  ;;  %v3153_v0 = vld [vmem:[#allocation2 + $0x10] sm:$0xff]  ;;  %v2364_v47 = vmax.f32 %v2300_v8, %v2332_v26  ;;  %2397 = vst.msk [vmem:[#allocation3 + $0xb8] sm:$0xff] %vm801_vm2, %v2365_v17  ;;  %2084 = vst.msk [vmem:[#allocation2 + $0x1a8] sm:$0xff] %vm801_vm2, %v6143_v52 }
 0x1b4   : > { %v3216_v61 = vld [vmem:[#allocation2 + $0x9] sm:$0xff]  ;;  %v3184_v22 = vmax.f32 %v3120_v46, %v3152_v58  ;;  %v3185_v32 = vmax.f32 %v3121_v42, %v3153_v0  ;;  %4743 = vmatprep.mubr.msk.bf16.mxu1 %vm801_vm2, %v2732_v35  ;;  %v2271_v55 = vld [vmem:[#allocation2 + $0x151] sm:$0xff]  ;;  %3031 = vst.msk [vmem:[#allocation2 + $0x70] sm:$0xff] %vm801_vm2, %v2673_v15  ;;  %v6170_v17 = vld [vmem:[#allocation3 + $0x80] sm:$0xff] }
 0x1b5   : > { %v2208_v45 = vld [vmem:[#allocation2 + $0x168] sm:$0xff]  ;;  %v2207_v44 = vld [vmem:[#allocation2 + $0x150] sm:$0xff]  ;;  %2396 = vst.msk [vmem:[#allocation3 + $0xb0] sm:$0xff] %vm801_vm2, %v2364_v47  ;;  %v6163_v60 = vld [vmem:[#allocation3 + $0x118] sm:$0xff] }
 0x1b6   : > { %v2111_v11 = vld [vmem:[#allocation2 + $0x14e] sm:$0xff]  ;;  %v3248_v3 = vmax.f32 %v3184_v22, %v3216_v61  ;;  %v3249_v21 = vmax.f32 %v3185_v32, %v3217_v23  ;;  %v6152_v18 = vmax.f32 %v2176_v41, %v2208_v45  ;;  %v3058_v31 = vld [vmem:[#allocation2 + $0x26] sm:$0xff]  ;;  %v1662_v32 = vmax.f32 %v1597_v63, %v6037_v24 }
 0x1b7   : > { %v2143_v7 = vld [vmem:[#allocation2 + $0x14f] sm:$0xff]  ;;  %v3090_v34 = vld [vmem:[#allocation2 + $0x27] sm:$0xff]  ;;  %v1598_v23 = vmax.f32 %v1534_v4, %v6021_v50 }
 0x1b8   : > { %v3280_v30 = vld [vmem:[#allocation2 + $0xa] sm:$0xff]  ;;  %v2175_v36 = vmax.f32 %v2111_v11, %v2143_v7  ;;  %v3313_v8 = vmax.f32 %v3249_v21, %v3281_v19  ;;  %v3122_v5 = vmax.f32 %v3058_v31, %v3090_v34  ;;  %v2335_v42 = vld [vmem:[#allocation2 + $0x152] sm:$0xff]  ;;  %v1599_v11 = vmax.f32 %v1535_v43, %v6037_v24 }
 0x1b9   : > { %v2270_v59 = vld [vmem:[#allocation2 + $0x149] sm:$0xff]  ;;  %v3219_v9 = vld [vmem:[#allocation2 + $0x31] sm:$0xff]  ;;  %v1727_v33 = vmax.f32 %v1662_v32, %v6163_v60  ;;  %v1663_v43 = vmax.f32 %v1598_v23, %v6118_v56 }
 0x1ba   : > { %v2302_v37 = vmax.f32 %v6070_v13, %v2270_v59  ;;  %v2334_v25 = vld [vmem:[#allocation2 + $0x14a] sm:$0xff]  ;;  %v2239_v38 = vmax.f32 %v2175_v36, %v2207_v44  ;;  %v3312_v13 = vmax.f32 %v3248_v3, %v3280_v30  ;;  %3345 = vst.msk [vmem:[#allocation3 + $0x28] sm:$0xff] %vm801_vm2, %v3313_v8 }
 0x1bb   : > { %v6148_v20 = vld [vmem:[#allocation3 + $0x70] sm:$0xff]  ;;  %v3154_v0 = vld [vmem:[#allocation2 + $0x28] sm:$0xff]  ;;  %v1777_v8 = vpack.c.bf16 %v1727_v33, %v6143_v52  ;;  %2085 = vst.msk [vmem:[#allocation2 + $0x1b0] sm:$0xff] %vm801_vm2, %v1727_v33 }
 0x1bc   : > { %v2672_v10 = vmax.f32 %v2608_v48, %v6148_v20  ;;  %v3059_v28 = vld [vmem:[#allocation2 + $0x2e] sm:$0xff]  ;;  %v2610_v1 = vmax.f32 %v6133_v39, %v6148_v20  ;;  %v2366_v26 = vmax.f32 %v2302_v37, %v2334_v25  ;;  %v2303_v46 = vmax.f32 %v2239_v38, %v2271_v55  ;;  %v6165_v39 = vld [vmem:[#allocation3 + $0x120] sm:$0xff]  ;;  %3344 = vst.msk [vmem:[#allocation3 + $0x20] sm:$0xff] %vm801_vm2, %v3312_v13 }
 0x1bd   : > { %v3091_v41 = vld [vmem:[#allocation2 + $0x2f] sm:$0xff]  ;;  %v2611_v48 = vmax.f32 %v2547_v54, %v6150_v40  ;;  %v3186_v47 = vmax.f32 %v3122_v5, %v3154_v0  ;;  %v3060_v59 = vld [vmem:[#allocation2 + $0x46] sm:$0xff]  ;;  %4730 = vmatmul.mubr.msk.bf16.gmra.mxu0 %vm801_vm2, %v1777_v8 }
 0x1be   : > { %v2733_v35 = vpack.c.bf16 %v2673_v15, %v2672_v10  ;;  %v3123_v58 = vmax.f32 %v3059_v28, %v3091_v41  ;;  %v3218_v61 = vld [vmem:[#allocation2 + $0x29] sm:$0xff]  ;;  %3030 = vst.msk [vmem:[#allocation2 + $0x68] sm:$0xff] %vm801_vm2, %v2672_v10  ;;  %2398 = vst.msk [vmem:[#allocation3 + $0xc0] sm:$0xff] %vm801_vm2, %v2366_v26  ;;  %v2367_v30 = vmax.f32 %v2303_v46, %v2335_v42  ;;  %v3283_v25 = vld [vmem:[#allocation2 + $0x32] sm:$0xff] }
 0x1bf   : > { %v3155_v45 = vld [vmem:[#allocation2 + $0x30] sm:$0xff]  ;;  %v6172_v22 = vld [vmem:[#allocation3 + $0x88] sm:$0xff]  ;;  %v2674_v36 = vmax.f32 %v2610_v1, %v6170_v17  ;;  %v3250_v16 = vmax.f32 %v3186_v47, %v3218_v61  ;;  %v1664_v28 = vmax.f32 %v1599_v11, %v6163_v60  ;;  %v1728_v41 = vmax.f32 %v1663_v43, %v6165_v39 }
 0x1c0   : > { %v6183_v7 = vld [vmem:[#allocation3 + $0x128] sm:$0xff]  ;;  %4744 = vmatmul.mubr.msk.bf16.gmra.mxu1 %vm801_vm2, %v2733_v35  ;;  %v3187_v19 = vmax.f32 %v3123_v58, %v3155_v45  ;;  %v2675_v44 = vmax.f32 %v2611_v48, %v6172_v22  ;;  %2399 = vst.msk [vmem:[#allocation3 + $0xc8] sm:$0xff] %vm801_vm2, %v2367_v30  ;;  %v3157_v1 = vld [vmem:[#allocation2 + $0x50] sm:$0xff]  ;;  %v2484_v11 = vmax.f32 %v6001_v49, %v6102_v57 }
 0x1c1   : > { %v3061_v54 = vld [vmem:[#allocation2 + $0x4e] sm:$0xff]  ;;  %3032 = vst.msk [vmem:[#allocation2 + $0x88] sm:$0xff] %vm801_vm2, %v2674_v36  ;;  %v1729_v61 = vmax.f32 %v1664_v28, %v6183_v7  ;;  %2086 = vst.msk [vmem:[#allocation2 + $0x1c8] sm:$0xff] %vm801_vm2, %v1728_v41  ;;  %v2114_v23 = vld [vmem:[#allocation2 + $0x186] sm:$0xff]  ;;  %v2485_v30 = vmax.f32 %v6003_v14, %v6104_v6 }
 0x1c2   : > { %v3092_v63 = vld [vmem:[#allocation2 + $0x47] sm:$0xff]  ;;  %v3093_v3 = vld [vmem:[#allocation2 + $0x4f] sm:$0xff]  ;;  %v3251_v37 = vmax.f32 %v3187_v19, %v3219_v9  ;;  %v2734_v38 = vpack.c.bf16 %v2675_v44, %v2674_v36  ;;  %3033 = vst.msk [vmem:[#allocation2 + $0x90] sm:$0xff] %vm801_vm2, %v2675_v44 }
 0x1c3   : > { %v3282_v4 = vld [vmem:[#allocation2 + $0x2a] sm:$0xff]  ;;  %v3124_v21 = vmax.f32 %v3060_v59, %v3092_v63  ;;  %v3125_v10 = vmax.f32 %v3061_v54, %v3093_v3  ;;  %v3285_v52 = vld [vmem:[#allocation2 + $0x52] sm:$0xff]  ;;  %v1778_v44 = vpack.c.bf16 %v1729_v61, %v1728_v41  ;;  %2087 = vst.msk [vmem:[#allocation2 + $0x1d0] sm:$0xff] %vm801_vm2, %v1729_v61  ;;  %v2486_v63 = vmax.f32 %v6102_v57, %v6148_v20 }
 0x1c4   : > { %v3156_v15 = vld [vmem:[#allocation2 + $0x48] sm:$0xff]  ;;  %v3314_v34 = vmax.f32 %v3250_v16, %v3282_v4  ;;  %v3315_v5 = vmax.f32 %v3251_v37, %v3283_v25  ;;  %4747 = vmatprep.mubr.msk.bf16.mxu1 %vm801_vm2, %v2734_v38  ;;  %v3221_v42 = vld [vmem:[#allocation2 + $0x51] sm:$0xff] }
 0x1c5   : > { %v3220_v31 = vld [vmem:[#allocation2 + $0x49] sm:$0xff]  ;;  %v3188_v13 = vmax.f32 %v3124_v21, %v3156_v15  ;;  %v3189_v46 = vmax.f32 %v3125_v10, %v3157_v1  ;;  %v2273_v16 = vld [vmem:[#allocation2 + $0x171] sm:$0xff]  ;;  %4733 = vmatprep.mubr.msk.bf16.mxu0 %vm801_vm2, %v1778_v44  ;;  %v2548_v10 = vmax.f32 %v2484_v11, %v6148_v20  ;;  %v2549_v15 = vmax.f32 %v2485_v30, %v6150_v40 }
 0x1c6   : > { %v2113_v55 = vld [vmem:[#allocation2 + $0x16e] sm:$0xff]  ;;  %3346 = vst.msk [vmem:[#allocation3 + $0x30] sm:$0xff] %vm801_vm2, %v3314_v34  ;;  %3347 = vst.msk [vmem:[#allocation3 + $0x38] sm:$0xff] %vm801_vm2, %v3315_v5  ;;  %v6218_v34 = vld [vmem:[#allocation3 + $0x98] sm:$0xff]  ;;  %v2550_v8 = vmax.f32 %v2486_v63, %v6170_v17 }
 0x1c7   : > { %v2145_v26 = vld [vmem:[#allocation2 + $0x16f] sm:$0xff]  ;;  %v3252_v48 = vmax.f32 %v3188_v13, %v3220_v31  ;;  %v3253_v19 = vmax.f32 %v3189_v46, %v3221_v42  ;;  %v2146_v54 = vld [vmem:[#allocation2 + $0x187] sm:$0xff]  ;;  %v2487_v13 = vmax.f32 %v6104_v6, %v6150_v40  ;;  %v2613_v41 = vmax.f32 %v2549_v15, %v6172_v22 }
 0x1c8   : > { %v3284_v35 = vld [vmem:[#allocation2 + $0x4a] sm:$0xff]  ;;  %v2177_v58 = vmax.f32 %v2113_v55, %v2145_v26  ;;  %v2337_v4 = vld [vmem:[#allocation2 + $0x172] sm:$0xff]  ;;  %v2178_v3 = vmax.f32 %v2114_v23, %v2146_v54  ;;  %v2612_v26 = vmax.f32 %v2548_v10, %v6170_v17  ;;  %v6232_v63 = vld [vmem:[#allocation3 + $0xa0] sm:$0xff] }
 0x1c9   : > { %v2272_v0 = vld [vmem:[#allocation2 + $0x169] sm:$0xff]  ;;  %v3316_v9 = vmax.f32 %v3252_v48, %v3284_v35  ;;  %v3317_v33 = vmax.f32 %v3253_v19, %v3285_v52  ;;  %v2275_v38 = vld [vmem:[#allocation2 + $0x191] sm:$0xff]  ;;  %v2551_v19 = vmax.f32 %v2487_v13, %v6172_v22 }
 0x1ca   : > { %v2209_v45 = vld [vmem:[#allocation2 + $0x170] sm:$0xff]  ;;  %v2304_v47 = vmax.f32 %v6152_v18, %v2272_v0  ;;  %v2210_v14 = vld [vmem:[#allocation2 + $0x188] sm:$0xff]  ;;  %v1699_v13 = vld [vmem:[#allocation3 + $0x138] sm:$0xff] }
 0x1cb   : > { %v2336_v32 = vld [vmem:[#allocation2 + $0x16a] sm:$0xff]  ;;  %v2241_v36 = vmax.f32 %v2177_v58, %v2209_v45  ;;  %3348 = vst.msk [vmem:[#allocation3 + $0x40] sm:$0xff] %vm801_vm2, %v3316_v9  ;;  %v2242_v57 = vmax.f32 %v2178_v3, %v2210_v14  ;;  %3349 = vst.msk [vmem:[#allocation3 + $0x48] sm:$0xff] %vm801_vm2, %v3317_v33  ;;  %v2339_v52 = vld [vmem:[#allocation2 + $0x192] sm:$0xff] }
 0x1cc   : > { %v2115_v59 = vld [vmem:[#allocation2 + $0x18e] sm:$0xff]  ;;  %v2368_v49 = vmax.f32 %v2304_v47, %v2336_v32  ;;  %v3062_v1 = vld [vmem:[#allocation2 + $0x66] sm:$0xff]  ;;  %v2677_v32 = vmax.f32 %v2613_v41, %v6218_v34 }
 0x1cd   : > { %v2147_v18 = vld [vmem:[#allocation2 + $0x18f] sm:$0xff]  ;;  %v2305_v43 = vmax.f32 %v2241_v36, %v2273_v16  ;;  %v3094_v46 = vld [vmem:[#allocation2 + $0x67] sm:$0xff] }
 0x1ce   : > { %v2179_v21 = vmax.f32 %v2115_v59, %v2147_v18  ;;  %v2211_v37 = vld [vmem:[#allocation2 + $0x190] sm:$0xff]  ;;  %2400 = vst.msk [vmem:[#allocation3 + $0xd0] sm:$0xff] %vm801_vm2, %v2368_v49  ;;  %v3126_v6 = vmax.f32 %v3062_v1, %v3094_v46  ;;  %v3158_v23 = vld [vmem:[#allocation2 + $0x68] sm:$0xff]  ;;  %3035 = vst.msk [vmem:[#allocation2 + $0xb0] sm:$0xff] %vm801_vm2, %v2677_v32  ;;  %v2615_v49 = vmax.f32 %v2551_v19, %v6218_v34 }
 0x1cf   : > { %v2274_v25 = vld [vmem:[#allocation2 + $0x189] sm:$0xff]  ;;  %v2369_v55 = vmax.f32 %v2305_v43, %v2337_v4  ;;  %v3223_v18 = vld [vmem:[#allocation2 + $0x71] sm:$0xff]  ;;  %v1537_v43 = vmax.f32 %v5984_v53, %v6037_v24 }
 0x1d0   : > { %v2243_v31 = vmax.f32 %v2179_v21, %v2211_v37  ;;  %v6216_v28 = vld [vmem:[#allocation3 + $0x90] sm:$0xff]  ;;  %v2306_v0 = vmax.f32 %v2242_v57, %v2274_v25  ;;  %v3190_v59 = vmax.f32 %v3126_v6, %v3158_v23  ;;  %v3064_v9 = vld [vmem:[#allocation2 + $0x86] sm:$0xff] }
 0x1d1   : > { %v3063_v5 = vld [vmem:[#allocation2 + $0x6e] sm:$0xff]  ;;  %2401 = vst.msk [vmem:[#allocation3 + $0xd8] sm:$0xff] %vm801_vm2, %v2369_v55  ;;  %v2676_v47 = vmax.f32 %v2612_v26, %v6216_v28  ;;  %v2614_v36 = vmax.f32 %v2550_v8, %v6216_v28  ;;  %v1601_v41 = vmax.f32 %v1537_v43, %v6163_v60 }
 0x1d2   : > { %v3095_v42 = vld [vmem:[#allocation2 + $0x6f] sm:$0xff]  ;;  %v2307_v61 = vmax.f32 %v2243_v31, %v2275_v38  ;;  %v3096_v14 = vld [vmem:[#allocation2 + $0x87] sm:$0xff] }
 0x1d3   : > { %v5095_v35 = vld [vmem:[#allocation3 + $0xf0] sm:$0xff]  ;;  %v3127_v45 = vmax.f32 %v3063_v5, %v3095_v42  ;;  %v2735_v16 = vpack.c.bf16 %v2677_v32, %v2676_v47  ;;  %3034 = vst.msk [vmem:[#allocation2 + $0xa8] sm:$0xff] %vm801_vm2, %v2676_v47  ;;  %v2678_v3 = vmax.f32 %v2614_v36, %v6232_v63  ;;  %v6242_v10 = vld [vmem:[#allocation3 + $0xa8] sm:$0xff]  ;;  %v3128_v15 = vmax.f32 %v3064_v9, %v3096_v14 }
 0x1d4   : > { %v1536_v58 = vmax.f32 %v5095_v35, %v6021_v50  ;;  %v2338_v48 = vld [vmem:[#allocation2 + $0x18a] sm:$0xff]  ;;  %v2371_v44 = vmax.f32 %v2307_v61, %v2339_v52  ;;  %v3287_v38 = vld [vmem:[#allocation2 + $0x72] sm:$0xff]  ;;  %v2679_v8 = vmax.f32 %v2615_v49, %v6242_v10  ;;  %v2488_v5 = vmax.f32 %v6148_v20, %v6170_v17 }
 0x1d5   : > { %v3159_v11 = vld [vmem:[#allocation2 + $0x70] sm:$0xff]  ;;  %v2370_v50 = vmax.f32 %v2306_v0, %v2338_v48  ;;  %v3160_v31 = vld [vmem:[#allocation2 + $0x88] sm:$0xff]  ;;  %4748 = vmatmul.mubr.msk.bf16.gmra.mxu1 %vm801_vm2, %v2735_v16  ;;  %3036 = vst.msk [vmem:[#allocation2 + $0xc8] sm:$0xff] %vm801_vm2, %v2678_v3  ;;  %v2489_v20 = vmax.f32 %v6150_v40, %v6172_v22 }
 0x1d6   : > { %v3222_v30 = vld [vmem:[#allocation2 + $0x69] sm:$0xff]  ;;  %v3191_v54 = vmax.f32 %v3127_v45, %v3159_v11  ;;  %2403 = vst.msk [vmem:[#allocation3 + $0xe8] sm:$0xff] %vm801_vm2, %v2371_v44  ;;  %v3225_v24 = vld [vmem:[#allocation2 + $0x91] sm:$0xff]  ;;  %v1600_v26 = vmax.f32 %v1536_v58, %v6118_v56  ;;  %v3192_v35 = vmax.f32 %v3128_v15, %v3160_v31  ;;  %v2736_v6 = vpack.c.bf16 %v2679_v8, %v2678_v3 }
 0x1d7   : > { %v3286_v4 = vld [vmem:[#allocation2 + $0x6a] sm:$0xff]  ;;  %2402 = vst.msk [vmem:[#allocation3 + $0xe0] sm:$0xff] %vm801_vm2, %v2370_v50  ;;  %v3254_v37 = vmax.f32 %v3190_v59, %v3222_v30  ;;  %3037 = vst.msk [vmem:[#allocation2 + $0xd0] sm:$0xff] %vm801_vm2, %v2679_v8  ;;  %v1666_v56 = vmax.f32 %v1601_v41, %v6183_v7  ;;  %v3289_v30 = vld [vmem:[#allocation2 + $0x92] sm:$0xff] }
 0x1d8   : > { %v3065_v21 = vld [vmem:[#allocation2 + $0x8e] sm:$0xff]  ;;  %v3255_v25 = vmax.f32 %v3191_v54, %v3223_v18  ;;  %v2116_v61 = vld [vmem:[#allocation2 + $0x1a6] sm:$0xff]  ;;  %v1665_v47 = vmax.f32 %v1600_v26, %v6165_v39  ;;  %4751 = vmatprep.mubr.msk.bf16.mxu1 %vm801_vm2, %v2736_v6 }
 0x1d9   : > { %v3097_v33 = vld [vmem:[#allocation2 + $0x8f] sm:$0xff]  ;;  %v3318_v46 = vmax.f32 %v3254_v37, %v3286_v4  ;;  %v2118_v52 = vld [vmem:[#allocation2 + $0x1c6] sm:$0xff]  ;;  %v1731_v7 = vmax.f32 %v1666_v56, %v1699_v13 }
 0x1da   : > { %v3129_v57 = vmax.f32 %v3065_v21, %v3097_v33  ;;  %v1698_v1 = vld [vmem:[#allocation3 + $0x130] sm:$0xff]  ;;  %v3319_v42 = vmax.f32 %v3255_v25, %v3287_v38  ;;  %v2148_v60 = vld [vmem:[#allocation2 + $0x1a7] sm:$0xff] }
 0x1db   : > { %v3161_v55 = vld [vmem:[#allocation2 + $0x90] sm:$0xff]  ;;  %3350 = vst.msk [vmem:[#allocation3 + $0x50] sm:$0xff] %vm801_vm2, %v3318_v46  ;;  %v2150_v19 = vld [vmem:[#allocation2 + $0x1c7] sm:$0xff]  ;;  %v2180_v50 = vmax.f32 %v2116_v61, %v2148_v60  ;;  %v1730_v39 = vmax.f32 %v1665_v47, %v1698_v1  ;;  %2089 = vst.msk [vmem:[#allocation2 + $0x1f0] sm:$0xff] %vm801_vm2, %v1731_v7 }
 0x1dc   : > { %v3224_v53 = vld [vmem:[#allocation2 + $0x89] sm:$0xff]  ;;  %v3193_v0 = vmax.f32 %v3129_v57, %v3161_v55  ;;  %3351 = vst.msk [vmem:[#allocation3 + $0x58] sm:$0xff] %vm801_vm2, %v3319_v42  ;;  %v2182_v59 = vmax.f32 %v2118_v52, %v2150_v19  ;;  %v2277_v38 = vld [vmem:[#allocation2 + $0x1b1] sm:$0xff]  ;;  %v2552_v57 = vmax.f32 %v2488_v5, %v6216_v28 }
 0x1dd   : > { %v2117_v48 = vld [vmem:[#allocation2 + $0x1ae] sm:$0xff]  ;;  %v3256_v23 = vmax.f32 %v3192_v35, %v3224_v53  ;;  %v1779_v43 = vpack.c.bf16 %v1731_v7, %v1730_v39  ;;  %2088 = vst.msk [vmem:[#allocation2 + $0x1e8] sm:$0xff] %vm801_vm2, %v1730_v39  ;;  %v2553_v53 = vmax.f32 %v2489_v20, %v6218_v34  ;;  %v3066_v42 = vld [vmem:[#allocation2 + $0xa6] sm:$0xff]  ;;  %v6275_v60 = vld [vmem:[#allocation3 + $0xb8] sm:$0xff] }
 0x1de   : > { %v3288_v45 = vld [vmem:[#allocation2 + $0x8a] sm:$0xff]  ;;  %v3257_v11 = vmax.f32 %v3193_v0, %v3225_v24  ;;  %v2341_v8 = vld [vmem:[#allocation2 + $0x1b2] sm:$0xff]  ;;  %v2490_v24 = vmax.f32 %v6170_v17, %v6216_v28  ;;  %v2616_v5 = vmax.f32 %v2552_v57, %v6232_v63  ;;  %v2491_v0 = vmax.f32 %v6172_v22, %v6218_v34  ;;  %v6286_v7 = vld [vmem:[#allocation3 + $0xc0] sm:$0xff] }
 0x1df   : > { %v2119_v58 = vld [vmem:[#allocation2 + $0x1ce] sm:$0xff]  ;;  %v3320_v16 = vmax.f32 %v3256_v23, %v3288_v45  ;;  %4734 = vmatmul.mubr.msk.bf16.gmra.mxu0 %vm801_vm2, %v1779_v43  ;;  %v2617_v52 = vmax.f32 %v2553_v53, %v6242_v10 }
 0x1e0   : > { %v2149_v32 = vld [vmem:[#allocation2 + $0x1af] sm:$0xff]  ;;  %v3321_v4 = vmax.f32 %v3257_v11, %v3289_v30  ;;  %v3098_v45 = vld [vmem:[#allocation2 + $0xa7] sm:$0xff]  ;;  %v2554_v47 = vmax.f32 %v2490_v24, %v6232_v63  ;;  %v2555_v19 = vmax.f32 %v2491_v0, %v6242_v10 }
 0x1e1   : > { %v2151_v36 = vld [vmem:[#allocation2 + $0x1cf] sm:$0xff]  ;;  %v2181_v44 = vmax.f32 %v2117_v48, %v2149_v32  ;;  %3352 = vst.msk [vmem:[#allocation3 + $0x60] sm:$0xff] %vm801_vm2, %v3320_v16  ;;  %v3130_v20 = vmax.f32 %v3066_v42, %v3098_v45  ;;  %v2681_v22 = vmax.f32 %v2617_v52, %v6275_v60 }
 0x1e2   : > { %v2183_v54 = vmax.f32 %v2119_v58, %v2151_v36  ;;  %v2212_v18 = vld [vmem:[#allocation2 + $0x1a8] sm:$0xff]  ;;  %v2213_v9 = vld [vmem:[#allocation2 + $0x1b0] sm:$0xff]  ;;  %3353 = vst.msk [vmem:[#allocation3 + $0x68] sm:$0xff] %vm801_vm2, %v3321_v4 }
 0x1e3   : > { %v2214_v40 = vld [vmem:[#allocation2 + $0x1c8] sm:$0xff]  ;;  %v2215_v49 = vld [vmem:[#allocation2 + $0x1d0] sm:$0xff]  ;;  %v2244_v3 = vmax.f32 %v2180_v50, %v2212_v18  ;;  %v2245_v21 = vmax.f32 %v2181_v44, %v2213_v9  ;;  %3039 = vst.msk [vmem:[#allocation2 + $0xf0] sm:$0xff] %vm801_vm2, %v2681_v22 }
 0x1e4   : > { %v2276_v14 = vld [vmem:[#allocation2 + $0x1a9] sm:$0xff]  ;;  %v2246_v37 = vmax.f32 %v2182_v59, %v2214_v40  ;;  %v2247_v25 = vmax.f32 %v2183_v54, %v2215_v49  ;;  %v2279_v15 = vld [vmem:[#allocation2 + $0x1d1] sm:$0xff]  ;;  %v2492_v59 = vmax.f32 %v6216_v28, %v6232_v63  ;;  %v2493_v54 = vmax.f32 %v6218_v34, %v6242_v10 }
 0x1e5   : > { %v2278_v33 = vld [vmem:[#allocation2 + $0x1c9] sm:$0xff]  ;;  %v2308_v31 = vmax.f32 %v2244_v3, %v2276_v14  ;;  %v2309_v1 = vmax.f32 %v2245_v21, %v2277_v38  ;;  %v2343_v46 = vld [vmem:[#allocation2 + $0x1d2] sm:$0xff]  ;;  %v2619_v21 = vmax.f32 %v2555_v19, %v6275_v60 }
 0x1e6   : > { %v2340_v13 = vld [vmem:[#allocation2 + $0x1aa] sm:$0xff]  ;;  %v2310_v26 = vmax.f32 %v2246_v37, %v2278_v33  ;;  %v2311_v41 = vmax.f32 %v2247_v25, %v2279_v15  ;;  %v3291_v37 = vld [vmem:[#allocation2 + $0xb2] sm:$0xff]  ;;  %v2557_v38 = vmax.f32 %v2493_v54, %v6275_v60 }
 0x1e7   : > { %v2342_v55 = vld [vmem:[#allocation2 + $0x1ca] sm:$0xff]  ;;  %v2372_v61 = vmax.f32 %v2308_v31, %v2340_v13  ;;  %v2373_v48 = vmax.f32 %v2309_v1, %v2341_v8 }
 0x1e8   : > { %v3067_v35 = vld [vmem:[#allocation2 + $0xae] sm:$0xff]  ;;  %v2374_v56 = vmax.f32 %v2310_v26, %v2342_v55  ;;  %v2375_v58 = vmax.f32 %v2311_v41, %v2343_v46  ;;  %v2120_v9 = vld [vmem:[#allocation2 + $0x1e6] sm:$0xff]  ;;  %v2495_v55 = vmax.f32 %v6242_v10, %v6275_v60 }
 0x1e9   : > { %v6272_v6 = vld [vmem:[#allocation3 + $0xb0] sm:$0xff]  ;;  %2404 = vst.msk [vmem:[#allocation3 + $0xf0] sm:$0xff] %vm801_vm2, %v2372_v61  ;;  %2405 = vst.msk [vmem:[#allocation3 + $0xf8] sm:$0xff] %vm801_vm2, %v2373_v48  ;;  %v3162_v11 = vld [vmem:[#allocation2 + $0xa8] sm:$0xff] }
 0x1ea   : > { %v3099_v17 = vld [vmem:[#allocation2 + $0xaf] sm:$0xff]  ;;  %v2680_v32 = vmax.f32 %v2616_v5, %v6272_v6  ;;  %v2618_v36 = vmax.f32 %v2554_v47, %v6272_v6  ;;  %2406 = vst.msk [vmem:[#allocation3 + $0x100] sm:$0xff] %vm801_vm2, %v2374_v56  ;;  %2407 = vst.msk [vmem:[#allocation3 + $0x108] sm:$0xff] %vm801_vm2, %v2375_v58  ;;  %v3194_v44 = vmax.f32 %v3130_v20, %v3162_v11  ;;  %v2152_v16 = vld [vmem:[#allocation2 + $0x1e7] sm:$0xff] }
 0x1eb   : > { %v3131_v23 = vmax.f32 %v3067_v35, %v3099_v17  ;;  %v3226_v30 = vld [vmem:[#allocation2 + $0xa9] sm:$0xff]  ;;  %v3227_v39 = vld [vmem:[#allocation2 + $0xb1] sm:$0xff]  ;;  %v2494_v18 = vmax.f32 %v6232_v63, %v6272_v6  ;;  %v2184_v28 = vmax.f32 %v2120_v9, %v2152_v16  ;;  %v2556_v63 = vmax.f32 %v2492_v59, %v6272_v6 }
 0x1ec   : > { %v3163_v50 = vld [vmem:[#allocation2 + $0xb0] sm:$0xff]  ;;  %3038 = vst.msk [vmem:[#allocation2 + $0xe8] sm:$0xff] %vm801_vm2, %v2680_v32  ;;  %v2737_v4 = vpack.c.bf16 %v2681_v22, %v2680_v32  ;;  %v2682_v14 = vmax.f32 %v2618_v36, %v6286_v7  ;;  %v3258_v43 = vmax.f32 %v3194_v44, %v3226_v30  ;;  %v6297_v34 = vld [vmem:[#allocation3 + $0xc8] sm:$0xff]  ;;  %v6320_v36 = vld [vmem:[#allocation3 + $0xd8] sm:$0xff]  ;;  %v2496_v44 = vmax.f32 %v6272_v6, %v6286_v7 }
 0x1ed   : > { %v2121_v40 = vld [vmem:[#allocation2 + $0x1ee] sm:$0xff]  ;;  %v3195_v49 = vmax.f32 %v3131_v23, %v3163_v50  ;;  %v3068_v25 = vld [vmem:[#allocation2 + $0xc6] sm:$0xff]  ;;  %v2683_v13 = vmax.f32 %v2619_v21, %v6297_v34  ;;  %v2620_v5 = vmax.f32 %v2556_v63, %v6286_v7  ;;  %v2621_v42 = vmax.f32 %v2557_v38, %v6297_v34 }
 0x1ee   : > { %v3290_v3 = vld [vmem:[#allocation2 + $0xaa] sm:$0xff]  ;;  %4752 = vmatmul.mubr.msk.bf16.gmra.mxu1 %vm801_vm2, %v2737_v4  ;;  %3040 = vst.msk [vmem:[#allocation2 + $0x108] sm:$0xff] %vm801_vm2, %v2682_v14  ;;  %v2345_v47 = vld [vmem:[#allocation2 + $0x1f2] sm:$0xff]  ;;  %v6311_v20 = vmax.f32 %v2494_v18, %v6286_v7  ;;  %v6314_v22 = vmax.f32 %v2495_v55, %v6297_v34 }
 0x1ef   : > { %v2153_v33 = vld [vmem:[#allocation2 + $0x1ef] sm:$0xff]  ;;  %v3259_v1 = vmax.f32 %v3195_v49, %v3227_v39  ;;  %v3322_v26 = vmax.f32 %v3258_v43, %v3290_v3  ;;  %v3100_v41 = vld [vmem:[#allocation2 + $0xc7] sm:$0xff]  ;;  %v2738_v52 = vpack.c.bf16 %v2683_v13, %v2682_v14  ;;  %3041 = vst.msk [vmem:[#allocation2 + $0x110] sm:$0xff] %vm801_vm2, %v2683_v13  ;;  %v2497_v39 = vmax.f32 %v6275_v60, %v6297_v34 }
 0x1f0   : > { %v2185_v15 = vmax.f32 %v2121_v40, %v2153_v33  ;;  %v2216_v57 = vld [vmem:[#allocation2 + $0x1e8] sm:$0xff]  ;;  %v2217_v53 = vld [vmem:[#allocation2 + $0x1f0] sm:$0xff]  ;;  %v3132_v45 = vmax.f32 %v3068_v25, %v3100_v41  ;;  %v2685_v9 = vmax.f32 %v2621_v42, %v6320_v36 }
 0x1f1   : > { %v2280_v31 = vld [vmem:[#allocation2 + $0x1e9] sm:$0xff]  ;;  %v2248_v24 = vmax.f32 %v2184_v28, %v2216_v57  ;;  %v2281_v0 = vld [vmem:[#allocation2 + $0x1f1] sm:$0xff]  ;;  %v3323_v48 = vmax.f32 %v3259_v1, %v3291_v37  ;;  %3354 = vst.msk [vmem:[#allocation3 + $0x70] sm:$0xff] %vm801_vm2, %v3322_v26  ;;  %4755 = vmatprep.mubr.msk.bf16.mxu1 %vm801_vm2, %v2738_v52  ;;  %v2623_v57 = vmax.f32 %v6314_v22, %v6320_v36 }
 0x1f2   : > { %v3069_v8 = vld [vmem:[#allocation2 + $0xce] sm:$0xff]  ;;  %v2249_v35 = vmax.f32 %v2185_v15, %v2217_v53  ;;  %3043 = vst.msk [vmem:[#allocation2 + $0x130] sm:$0xff] %vm801_vm2, %v2685_v9 }
 0x1f3   : > { %v3101_v46 = vld [vmem:[#allocation2 + $0xcf] sm:$0xff]  ;;  %v2312_v17 = vmax.f32 %v2248_v24, %v2280_v31  ;;  %3355 = vst.msk [vmem:[#allocation3 + $0x78] sm:$0xff] %vm801_vm2, %v3323_v48  ;;  %v3070_v50 = vld [vmem:[#allocation2 + $0xe6] sm:$0xff] }
 0x1f4   : > { %v2344_v61 = vld [vmem:[#allocation2 + $0x1ea] sm:$0xff]  ;;  %v3133_v10 = vmax.f32 %v3069_v8, %v3101_v46  ;;  %v2313_v23 = vmax.f32 %v2249_v35, %v2281_v0  ;;  %v3293_v14 = vld [vmem:[#allocation2 + $0xd2] sm:$0xff]  ;;  %v3472_v8 = vld [vmem:[#allocation3 + $0x20] sm:$0xff] }
 0x1f5   : > { %v3164_v56 = vld [vmem:[#allocation2 + $0xc8] sm:$0xff]  ;;  %v3165_v58 = vld [vmem:[#allocation2 + $0xd0] sm:$0xff]  ;;  %v2376_v59 = vmax.f32 %v2312_v17, %v2344_v61  ;;  %v6351_v35 = vld [vmem:[#allocation3 + $0x38] sm:$0xff] }
 0x1f6   : > { %v3228_v32 = vld [vmem:[#allocation2 + $0xc9] sm:$0xff]  ;;  %v3196_v11 = vmax.f32 %v3132_v45, %v3164_v56  ;;  %v3229_v30 = vld [vmem:[#allocation2 + $0xd1] sm:$0xff]  ;;  %v3197_v54 = vmax.f32 %v3133_v10, %v3165_v58  ;;  %v2377_v49 = vmax.f32 %v2313_v23, %v2345_v47  ;;  %v6353_v0 = vld [vmem:[#allocation3 + $0x40] sm:$0xff] }
 0x1f7   : > { %v6318_v19 = vld [vmem:[#allocation3 + $0xd0] sm:$0xff]  ;;  %v3102_v16 = vld [vmem:[#allocation2 + $0xe7] sm:$0xff]  ;;  %2408 = vst.msk [vmem:[#allocation3 + $0x110] sm:$0xff] %vm801_vm2, %v2376_v59 }
 0x1f8   : > { %v2684_v18 = vmax.f32 %v2620_v5, %v6318_v19  ;;  %v3071_v40 = vld [vmem:[#allocation2 + $0xee] sm:$0xff]  ;;  %v3260_v3 = vmax.f32 %v3196_v11, %v3228_v32  ;;  %v3134_v33 = vmax.f32 %v3070_v50, %v3102_v16  ;;  %v3261_v6 = vmax.f32 %v3197_v54, %v3229_v30  ;;  %2409 = vst.msk [vmem:[#allocation3 + $0x118] sm:$0xff] %vm801_vm2, %v2377_v49  ;;  %v6358_v47 = vld [vmem:[#allocation3 + $0xe0] sm:$0xff] }
 0x1f9   : > { %v3103_v4 = vld [vmem:[#allocation2 + $0xef] sm:$0xff]  ;;  %v2622_v15 = vmax.f32 %v6311_v20, %v6318_v19  ;;  %v6341_v24 = vmax.f32 %v2496_v44, %v6318_v19  ;;  %v3504_v5 = vmax.f32 %v3440_v51, %v3472_v8  ;;  %v3072_v12 = vld [vmem:[#allocation2 + $0x106] sm:$0xff]  ;;  %v5097_v51 = vld [vmem:[#allocation3 + $0x18] sm:$0xff] }
 0x1fa   : > { %v3292_v21 = vld [vmem:[#allocation2 + $0xca] sm:$0xff]  ;;  %v3135_v28 = vmax.f32 %v3071_v40, %v3103_v4  ;;  %v2739_v37 = vpack.c.bf16 %v2685_v9, %v2684_v18  ;;  %3042 = vst.msk [vmem:[#allocation2 + $0x128] sm:$0xff] %vm801_vm2, %v2684_v18  ;;  %v3325_v26 = vmax.f32 %v3261_v6, %v3293_v14  ;;  %v3295_v46 = vld [vmem:[#allocation2 + $0xf2] sm:$0xff] }
 0x1fb   : > { %v3166_v43 = vld [vmem:[#allocation2 + $0xe8] sm:$0xff]  ;;  %v3167_v25 = vld [vmem:[#allocation2 + $0xf0] sm:$0xff]  ;;  %v3324_v31 = vmax.f32 %v3260_v3, %v3292_v21  ;;  %v2686_v56 = vmax.f32 %v2622_v15, %v6358_v47  ;;  %v2624_v60 = vmax.f32 %v6341_v24, %v6358_v47 }
 0x1fc   : > { %v3230_v63 = vld [vmem:[#allocation2 + $0xe9] sm:$0xff]  ;;  %v3231_v38 = vld [vmem:[#allocation2 + $0xf1] sm:$0xff]  ;;  %v3198_v1 = vmax.f32 %v3134_v33, %v3166_v43  ;;  %v3199_v13 = vmax.f32 %v3135_v28, %v3167_v25  ;;  %4756 = vmatmul.mubr.msk.bf16.gmra.mxu1 %vm801_vm2, %v2739_v37  ;;  %3357 = vst.msk [vmem:[#allocation3 + $0x88] sm:$0xff] %vm801_vm2, %v3325_v26 }
 0x1fd   : > { %v6336_v55 = vld [vmem:[#allocation3 + $0x28] sm:$0xff]  ;;  %v6338_v53 = vld [vmem:[#allocation3 + $0x30] sm:$0xff]  ;;  %3356 = vst.msk [vmem:[#allocation3 + $0x80] sm:$0xff] %vm801_vm2, %v3324_v31  ;;  %3044 = vst.msk [vmem:[#allocation2 + $0x148] sm:$0xff] %vm801_vm2, %v2686_v56 }
 0x1fe   : > { %v3294_v41 = vld [vmem:[#allocation2 + $0xea] sm:$0xff]  ;;  %v3505_v42 = vmax.f32 %v3441_v27, %v6336_v55  ;;  %v3262_v45 = vmax.f32 %v3198_v1, %v3230_v63  ;;  %v3263_v17 = vmax.f32 %v3199_v13, %v3231_v38  ;;  %v3443_v2 = vmax.f32 %v5097_v51, %v6336_v55  ;;  %v3297_v6 = vld [vmem:[#allocation2 + $0x112] sm:$0xff]  ;;  %v6392_v13 = vld [vmem:[#allocation3 + $0x60] sm:$0xff] }
 0x1ff   : > { %v6355_v61 = vld [vmem:[#allocation3 + $0x48] sm:$0xff]  ;;  %v5096_v48 = vld [vmem:[#allocation3 + $0x10] sm:$0xff]  ;;  %v3444_v62 = vmax.f32 %v3472_v8, %v6338_v53  ;;  %v3568_v27 = vmax.f32 %v3504_v5, %v6338_v53  ;;  %v3445_v33 = vmax.f32 %v6336_v55, %v6351_v35  ;;  %v6383_v25 = vld [vmem:[#allocation3 + $0x58] sm:$0xff]  ;;  %v2561_v38 = vmax.f32 %v2497_v39, %v6320_v36 }
 0x200   : > { %v3442_v52 = vmax.f32 %v5096_v48, %v3472_v8  ;;  %v6360_v29 = vld [vmem:[#allocation3 + $0xe8] sm:$0xff]  ;;  %v3569_v10 = vmax.f32 %v3505_v42, %v6351_v35  ;;  %v3326_v23 = vmax.f32 %v3262_v45, %v3294_v41  ;;  %v3327_v11 = vmax.f32 %v3263_v17, %v3295_v46  ;;  %v3169_v9 = vld [vmem:[#allocation2 + $0x110] sm:$0xff]  ;;  %v6406_v51 = vld [vmem:[#allocation3 + $0xf8] sm:$0xff] }
 0x201   : > { %v2687_v58 = vmax.f32 %v2623_v57, %v6360_v29  ;;  %v3073_v32 = vld [vmem:[#allocation2 + $0x10e] sm:$0xff]  ;;  %v3632_v44 = vmax.f32 %v3568_v27, %v6353_v0  ;;  %v3507_v21 = vmax.f32 %v3443_v2, %v6351_v35  ;;  %v3508_v63 = vmax.f32 %v3444_v62, %v6353_v0  ;;  %v3074_v8 = vld [vmem:[#allocation2 + $0x126] sm:$0xff] }
 0x202   : > { %v3104_v20 = vld [vmem:[#allocation2 + $0x107] sm:$0xff]  ;;  %v3105_v22 = vld [vmem:[#allocation2 + $0x10f] sm:$0xff]  ;;  %v3633_v59 = vmax.f32 %v3569_v10, %v6355_v61  ;;  %v3506_v16 = vmax.f32 %v3442_v52, %v6338_v53  ;;  %3358 = vst.msk [vmem:[#allocation3 + $0x90] sm:$0xff] %vm801_vm2, %v3326_v23  ;;  %3359 = vst.msk [vmem:[#allocation3 + $0x98] sm:$0xff] %vm801_vm2, %v3327_v11  ;;  %v3509_v1 = vmax.f32 %v3445_v33, %v6355_v61 }
 0x203   : > { %v3136_v30 = vmax.f32 %v3072_v12, %v3104_v20  ;;  %v3137_v50 = vmax.f32 %v3073_v32, %v3105_v22  ;;  %v2740_v54 = vpack.c.bf16 %v2687_v58, %v2686_v56  ;;  %v3168_v18 = vld [vmem:[#allocation2 + $0x108] sm:$0xff]  ;;  %3045 = vst.msk [vmem:[#allocation2 + $0x150] sm:$0xff] %vm801_vm2, %v2687_v58  ;;  %v3233_v3 = vld [vmem:[#allocation2 + $0x111] sm:$0xff]  ;;  %v3571_v31 = vmax.f32 %v3507_v21, %v6355_v61 }
 0x204   : > { %v3232_v40 = vld [vmem:[#allocation2 + $0x109] sm:$0xff]  ;;  %v3696_v28 = vpack.c.bf16 %v3633_v59, %v3632_v44  ;;  %v3570_v37 = vmax.f32 %v3506_v16, %v6353_v0  ;;  %v2625_v39 = vmax.f32 %v2561_v38, %v6360_v29  ;;  %v3573_v17 = vmax.f32 %v3509_v1, %v6383_v25  ;;  %v3235_v21 = vld [vmem:[#allocation2 + $0x131] sm:$0xff] }
 0x205   : > { %v3200_v4 = vmax.f32 %v3136_v30, %v3168_v18  ;;  %v3201_v49 = vmax.f32 %v3137_v50, %v3169_v9  ;;  %v6377_v14 = vld [vmem:[#allocation3 + $0x50] sm:$0xff]  ;;  %4759 = vmatprep.mubr.msk.bf16.mxu1 %vm801_vm2, %v2740_v54  ;;  %v3106_v55 = vld [vmem:[#allocation2 + $0x127] sm:$0xff]  ;;  %v3635_v45 = vmax.f32 %v3571_v31, %v6383_v25  ;;  %v2498_v22 = vmax.f32 %v6286_v7, %v6318_v19 }
 0x206   : > { %v3296_v43 = vld [vmem:[#allocation2 + $0x10a] sm:$0xff]  ;;  %4773 = vmatprep.mubr.msk.bf16.mxu0 %vm801_vm2, %v3696_v28  ;;  %v3634_v26 = vmax.f32 %v3570_v37, %v6377_v14  ;;  %v3572_v41 = vmax.f32 %v3508_v63, %v6377_v14  ;;  %v2689_v24 = vmax.f32 %v2625_v39, %v6406_v51  ;;  %v3138_v27 = vmax.f32 %v3074_v8, %v3106_v55  ;;  %v3299_v8 = vld [vmem:[#allocation2 + $0x132] sm:$0xff] }
 0x207   : > { %v3264_v15 = vmax.f32 %v3200_v4, %v3232_v40  ;;  %v3265_v57 = vmax.f32 %v3201_v49, %v3233_v3  ;;  %v6397_v46 = vld [vmem:[#allocation3 + $0x68] sm:$0xff]  ;;  %v6404_v12 = vld [vmem:[#allocation3 + $0xf0] sm:$0xff]  ;;  %v2499_v54 = vmax.f32 %v6297_v34, %v6320_v36  ;;  %v2562_v7 = vmax.f32 %v2498_v22, %v6358_v47 }
 0x208   : > { %v3075_v5 = vld [vmem:[#allocation2 + $0x12e] sm:$0xff]  ;;  %v3636_v2 = vmax.f32 %v3572_v41, %v6392_v13  ;;  %v2688_v62 = vmax.f32 %v2624_v60, %v6404_v12  ;;  %v3697_v58 = vpack.c.bf16 %v3635_v45, %v3634_v26  ;;  %v3637_v32 = vmax.f32 %v3573_v17, %v6397_v46  ;;  %v3076_v23 = vld [vmem:[#allocation2 + $0x146] sm:$0xff]  ;;  %3047 = vst.msk [vmem:[#allocation2 + $0x170] sm:$0xff] %vm801_vm2, %v2689_v24 }
 0x209   : > { %v3107_v42 = vld [vmem:[#allocation2 + $0x12f] sm:$0xff]  ;;  %v3328_v48 = vmax.f32 %v3264_v15, %v3296_v43  ;;  %v3329_v52 = vmax.f32 %v3265_v57, %v3297_v6  ;;  %v3108_v30 = vld [vmem:[#allocation2 + $0x147] sm:$0xff]  ;;  %v2563_v28 = vmax.f32 %v2499_v54, %v6360_v29  ;;  %v3446_v37 = vmax.f32 %v6338_v53, %v6353_v0 }
 0x20a   : > { %v3170_v10 = vld [vmem:[#allocation2 + $0x128] sm:$0xff]  ;;  %v3139_v20 = vmax.f32 %v3075_v5, %v3107_v42  ;;  %v2741_v50 = vpack.c.bf16 %v2689_v24, %v2688_v62  ;;  %v3171_v44 = vld [vmem:[#allocation2 + $0x130] sm:$0xff]  ;;  %3046 = vst.msk [vmem:[#allocation2 + $0x168] sm:$0xff] %vm801_vm2, %v2688_v62  ;;  %v3140_v9 = vmax.f32 %v3076_v23, %v3108_v30  ;;  %4774 = vmatmul.mubr.msk.bf16.vlgmr.msra.gmra.mxu0 %vm801_vm2, %v3697_v58  ;;  %v6424_v43 = vld [vmem:[#allocation3 + $0x100] sm:$0xff] }
 0x20b   : > { %v3234_v56 = vld [vmem:[#allocation2 + $0x129] sm:$0xff]  ;;  %3360 = vst.msk [vmem:[#allocation3 + $0xa0] sm:$0xff] %vm801_vm2, %v3328_v48  ;;  %3361 = vst.msk [vmem:[#allocation3 + $0xa8] sm:$0xff] %vm801_vm2, %v3329_v52  ;;  %v3202_v59 = vmax.f32 %v3138_v27, %v3170_v10  ;;  %v3698_v40 = vpack.c.bf16 %v3637_v32, %v3636_v2  ;;  %v2626_v15 = vmax.f32 %v2562_v7, %v6404_v12  ;;  %v3237_v41 = vld [vmem:[#allocation2 + $0x151] sm:$0xff] }
 0x20c   : > { %v3077_v11 = vld [vmem:[#allocation2 + $0x14e] sm:$0xff]  ;;  %v3203_v16 = vmax.f32 %v3139_v20, %v3171_v44  ;;  %4760 = vmatmul.mubr.msk.bf16.gmra.mxu1 %vm801_vm2, %v2741_v50  ;;  %v3447_v1 = vmax.f32 %v6351_v35, %v6355_v61  ;;  %v2627_v26 = vmax.f32 %v2563_v28, %v6406_v51  ;;  %v3510_v53 = vmax.f32 %v3446_v37, %v6377_v14  ;;  %v6443_v24 = vld [vmem:[#allocation3 + $0x78] sm:$0xff] }
 0x20d   : > { %v3109_v18 = vld [vmem:[#allocation2 + $0x14f] sm:$0xff]  ;;  %v3266_v33 = vmax.f32 %v3202_v59, %v3234_v56  ;;  %4777 = vmatprep.mubr.msk.bf16.mxu0 %vm801_vm2, %v3698_v40  ;;  %v2690_v5 = vmax.f32 %v2626_v15, %v6424_v43  ;;  %v3448_v27 = vmax.f32 %v6353_v0, %v6377_v14  ;;  %v3449_v58 = vmax.f32 %v6355_v61, %v6383_v25  ;;  %v6463_v59 = vld [vmem:[#allocation3 + $0x80] sm:$0xff] }
 0x20e   : > { %v3141_v4 = vmax.f32 %v3077_v11, %v3109_v18  ;;  %v3172_v49 = vld [vmem:[#allocation2 + $0x148] sm:$0xff]  ;;  %v3173_v34 = vld [vmem:[#allocation2 + $0x150] sm:$0xff]  ;;  %v3267_v63 = vmax.f32 %v3203_v16, %v3235_v21  ;;  %v3511_v52 = vmax.f32 %v3447_v1, %v6383_v25  ;;  %v3574_v62 = vmax.f32 %v3510_v53, %v6392_v13 }
 0x20f   : > { %v3236_v3 = vld [vmem:[#allocation2 + $0x149] sm:$0xff]  ;;  %v3204_v6 = vmax.f32 %v3140_v9, %v3172_v49  ;;  %v3301_v17 = vld [vmem:[#allocation2 + $0x152] sm:$0xff]  ;;  %3048 = vst.msk [vmem:[#allocation2 + $0x188] sm:$0xff] %vm801_vm2, %v2690_v5  ;;  %v2500_v32 = vmax.f32 %v6318_v19, %v6358_v47  ;;  %v3512_v30 = vmax.f32 %v3448_v27, %v6392_v13  ;;  %v2501_v50 = vmax.f32 %v6320_v36, %v6360_v29 }
 0x210   : > { %v3298_v38 = vld [vmem:[#allocation2 + $0x12a] sm:$0xff]  ;;  %v3205_v31 = vmax.f32 %v3141_v4, %v3173_v34  ;;  %v3331_v39 = vmax.f32 %v3267_v63, %v3299_v8  ;;  %v3575_v56 = vmax.f32 %v3511_v52, %v6397_v46  ;;  %v3513_v61 = vmax.f32 %v3449_v58, %v6397_v46  ;;  %v6477_v34 = vld [vmem:[#allocation3 + $0x118] sm:$0xff] }
 0x211   : > { %v6430_v57 = vld [vmem:[#allocation3 + $0x108] sm:$0xff]  ;;  %v3330_v55 = vmax.f32 %v3266_v33, %v3298_v38  ;;  %v3268_v60 = vmax.f32 %v3204_v6, %v3236_v3  ;;  %v6438_v45 = vld [vmem:[#allocation3 + $0x70] sm:$0xff]  ;;  %v2564_v18 = vmax.f32 %v2500_v32, %v6404_v12  ;;  %v2565_v36 = vmax.f32 %v2501_v50, %v6406_v51 }
 0x212   : > { %v3269_v42 = vmax.f32 %v3205_v31, %v3237_v41  ;;  %v3300_v48 = vld [vmem:[#allocation2 + $0x14a] sm:$0xff]  ;;  %v2691_v35 = vmax.f32 %v2627_v26, %v6430_v57  ;;  %3363 = vst.msk [vmem:[#allocation3 + $0xb8] sm:$0xff] %vm801_vm2, %v3331_v39  ;;  %v3638_v0 = vmax.f32 %v3574_v62, %v6438_v45  ;;  %v3639_v19 = vmax.f32 %v3575_v56, %v6443_v24  ;;  %v6488_v41 = vld [vmem:[#allocation3 + $0x120] sm:$0xff] }
 0x213   : > { %3362 = vst.msk [vmem:[#allocation3 + $0xb0] sm:$0xff] %vm801_vm2, %v3330_v55  ;;  %v3332_v2 = vmax.f32 %v3268_v60, %v3300_v48  ;;  %v3078_v20 = vld [vmem:[#allocation2 + $0x166] sm:$0xff]  ;;  %v3079_v22 = vld [vmem:[#allocation2 + $0x16e] sm:$0xff]  ;;  %v3576_v40 = vmax.f32 %v3512_v30, %v6438_v45  ;;  %v2502_v3 = vmax.f32 %v6358_v47, %v6404_v12  ;;  %v3577_v33 = vmax.f32 %v3513_v61, %v6443_v24 }
 0x214   : > { %v3333_v10 = vmax.f32 %v3269_v42, %v3301_v17  ;;  %v3110_v23 = vld [vmem:[#allocation2 + $0x167] sm:$0xff]  ;;  %v2742_v11 = vpack.c.bf16 %v2691_v35, %v2690_v5  ;;  %3049 = vst.msk [vmem:[#allocation2 + $0x190] sm:$0xff] %vm801_vm2, %v2691_v35  ;;  %v3111_v44 = vld [vmem:[#allocation2 + $0x16f] sm:$0xff]  ;;  %v3699_v21 = vpack.c.bf16 %v3639_v19, %v3638_v0  ;;  %v2628_v28 = vmax.f32 %v2564_v18, %v6424_v43  ;;  %v4673_v19 = vpop.f32.mrf.mxu1 }
 0x215   : > { %3364 = vst.msk [vmem:[#allocation3 + $0xc0] sm:$0xff] %vm801_vm2, %v3332_v2  ;;  %v6465_v54 = vld [vmem:[#allocation3 + $0x88] sm:$0xff]  ;;  %v3142_v9 = vmax.f32 %v3078_v20, %v3110_v23  ;;  %v6471_v16 = vld [vmem:[#allocation3 + $0x110] sm:$0xff]  ;;  %v3143_v7 = vmax.f32 %v3079_v22, %v3111_v44  ;;  %v3640_v63 = vmax.f32 %v3576_v40, %v6463_v59  ;;  %v2629_v38 = vmax.f32 %v2565_v36, %v6430_v57 }
 0x216   : > { %3365 = vst.msk [vmem:[#allocation3 + $0xc8] sm:$0xff] %vm801_vm2, %v3333_v10  ;;  %4763 = vmatprep.mubr.msk.bf16.mxu1 %vm801_vm2, %v2742_v11  ;;  %v3174_v4 = vld [vmem:[#allocation2 + $0x168] sm:$0xff]  ;;  %v3175_v6 = vld [vmem:[#allocation2 + $0x170] sm:$0xff]  ;;  %v2503_v31 = vmax.f32 %v6360_v29, %v6406_v51  ;;  %4778 = vmatmul.mubr.msk.bf16.gmra.mxu0 %vm801_vm2, %v3699_v21  ;;  %v3641_v47 = vmax.f32 %v3577_v33, %v6465_v54 }
 0x217   : > { %v3238_v49 = vld [vmem:[#allocation2 + $0x169] sm:$0xff]  ;;  %v3206_v37 = vmax.f32 %v3142_v9, %v3174_v4  ;;  %v3207_v15 = vmax.f32 %v3143_v7, %v3175_v6  ;;  %v2692_v1 = vmax.f32 %v2628_v28, %v6471_v16  ;;  %v3239_v8 = vld [vmem:[#allocation2 + $0x171] sm:$0xff]  ;;  %v2566_v26 = vmax.f32 %v2502_v3, %v6424_v43  ;;  %1017 = vst.msk [vmem:[%s6499_s14 + $0x10] sm:$0xff] %vm346_vm1, %v4673_v19 }
 0x218   : > { %v6490_v60 = vld [vmem:[#allocation3 + $0x128] sm:$0xff]  ;;  %v2693_v53 = vmax.f32 %v2629_v38, %v6477_v34  ;;  %v2567_v29 = vmax.f32 %v2503_v31, %v6430_v57  ;;  %v3450_v52 = vmax.f32 %v6377_v14, %v6392_v13  ;;  %v3700_v35 = vpack.c.bf16 %v3641_v47, %v3640_v63  ;;  %v3303_v17 = vld [vmem:[#allocation2 + $0x172] sm:$0xff] }
 0x219   : > { %v3270_v55 = vmax.f32 %v3206_v37, %v3238_v49  ;;  %v3271_v39 = vmax.f32 %v3207_v15, %v3239_v8  ;;  %v3302_v5 = vld [vmem:[#allocation2 + $0x16a] sm:$0xff]  ;;  %3050 = vst.msk [vmem:[#allocation2 + $0x1a8] sm:$0xff] %vm801_vm2, %v2692_v1  ;;  %v2630_v62 = vmax.f32 %v2566_v26, %v6471_v16  ;;  %v3451_v50 = vmax.f32 %v6383_v25, %v6397_v46  ;;  %v6525_v3 = vld [vmem:[#allocation3 + $0x98] sm:$0xff] }
 0x21a   : > { %v3080_v42 = vld [vmem:[#allocation2 + $0x186] sm:$0xff]  ;;  %v2743_v58 = vpack.c.bf16 %v2693_v53, %v2692_v1  ;;  %3051 = vst.msk [vmem:[#allocation2 + $0x1b0] sm:$0xff] %vm801_vm2, %v2693_v53  ;;  %v2631_v14 = vmax.f32 %v2567_v29, %v6477_v34  ;;  %4781 = vmatprep.mubr.msk.bf16.mxu0 %vm801_vm2, %v3700_v35  ;;  %v3514_v44 = vmax.f32 %v3450_v52, %v6438_v45  ;;  %v6514_v9 = vld [vmem:[#allocation3 + $0x90] sm:$0xff] }
 0x21b   : > { %v3112_v48 = vld [vmem:[#allocation2 + $0x187] sm:$0xff]  ;;  %v3334_v2 = vmax.f32 %v3270_v55, %v3302_v5  ;;  %v3113_v10 = vld [vmem:[#allocation2 + $0x18f] sm:$0xff]  ;;  %v3335_v32 = vmax.f32 %v3271_v39, %v3303_v17  ;;  %v2694_v11 = vmax.f32 %v2630_v62, %v6488_v41  ;;  %v3452_v40 = vmax.f32 %v6392_v13, %v6438_v45  ;;  %v888_v13 = vpop.f32.mrf.mxu1 }
 0x21c   : > { %v3081_v27 = vld [vmem:[#allocation2 + $0x18e] sm:$0xff]  ;;  %v3144_v56 = vmax.f32 %v3080_v42, %v3112_v48  ;;  %4764 = vmatmul.mubr.msk.bf16.gmra.mxu1 %vm801_vm2, %v2743_v58  ;;  %v2695_v61 = vmax.f32 %v2631_v14, %v6490_v60  ;;  %v3453_v36 = vmax.f32 %v6397_v46, %v6443_v24  ;;  %v3515_v4 = vmax.f32 %v3451_v50, %v6443_v24 }
 0x21d   : > { %v3145_v20 = vmax.f32 %v3081_v27, %v3113_v10  ;;  %v3176_v22 = vld [vmem:[#allocation2 + $0x188] sm:$0xff]  ;;  %3366 = vst.msk [vmem:[#allocation3 + $0xd0] sm:$0xff] %vm801_vm2, %v3334_v2  ;;  %v3177_v0 = vld [vmem:[#allocation2 + $0x190] sm:$0xff]  ;;  %3367 = vst.msk [vmem:[#allocation3 + $0xd8] sm:$0xff] %vm801_vm2, %v3335_v32  ;;  %v3578_v49 = vmax.f32 %v3514_v44, %v6463_v59  ;;  %v2504_v21 = vmax.f32 %v6404_v12, %v6424_v43  ;;  %v4674_v1 = vpop.f32.mrf.mxu1 }
 0x21e   : > { %v3240_v23 = vld [vmem:[#allocation2 + $0x189] sm:$0xff]  ;;  %v3208_v30 = vmax.f32 %v3144_v56, %v3176_v22  ;;  %v3241_v25 = vld [vmem:[#allocation2 + $0x191] sm:$0xff]  ;;  %3052 = vst.msk [vmem:[#allocation2 + $0x1c8] sm:$0xff] %vm801_vm2, %v2694_v11  ;;  %v2744_v33 = vpack.c.bf16 %v2695_v61, %v2694_v11  ;;  %3053 = vst.msk [vmem:[#allocation2 + $0x1d0] sm:$0xff] %vm801_vm2, %v2695_v61  ;;  %v3516_v6 = vmax.f32 %v3452_v40, %v6463_v59 }
 0x21f   : > { %v3209_v18 = vmax.f32 %v3145_v20, %v3177_v0  ;;  %v3304_v46 = vld [vmem:[#allocation2 + $0x18a] sm:$0xff]  ;;  %v3517_v37 = vmax.f32 %v3453_v36, %v6465_v54  ;;  %1015 = vst.msk [vmem:[%s6499_s14] sm:$0xff] %vm346_vm1, %v888_v13  ;;  %v3305_v63 = vld [vmem:[#allocation2 + $0x192] sm:$0xff]  ;;  %v3579_v15 = vmax.f32 %v3515_v4, %v6465_v54  ;;  %v3642_v31 = vmax.f32 %v3578_v49, %v6514_v9  ;;  %v6536_v12 = vld [vmem:[#allocation3 + $0xa0] sm:$0xff] }
 0x220   : > { %v3272_v7 = vmax.f32 %v3208_v30, %v3240_v23  ;;  %v6538_v43 = vld [vmem:[#allocation3 + $0xa8] sm:$0xff]  ;;  %v2505_v47 = vmax.f32 %v6406_v51, %v6430_v57  ;;  %4767 = vmatprep.mubr.msk.bf16.mxu1 %vm801_vm2, %v2744_v33  ;;  %v3580_v55 = vmax.f32 %v3516_v6, %v6514_v9  ;;  %v2568_v53 = vmax.f32 %v2504_v21, %v6471_v16  ;;  %v6551_v57 = vld [vmem:[#allocation3 + $0x130] sm:$0xff]  ;;  %v891_v16 = vpop.f32.mrf.mxu1  ;;  %v6559_v27 = vld [vmem:[#allocation3 + $0x138] sm:$0xff] }
 0x221   : > { %v3273_v28 = vmax.f32 %v3209_v18, %v3241_v25  ;;  %v3581_v26 = vmax.f32 %v3517_v37, %v6525_v3  ;;  %v3082_v39 = vld [vmem:[#allocation2 + $0x1a6] sm:$0xff]  ;;  %1018 = vst.msk [vmem:[%s6499_s14 + $0x18] sm:$0xff] %vm346_vm1, %v4674_v1  ;;  %v3643_v29 = vmax.f32 %v3579_v15, %v6525_v3  ;;  %v3083_v42 = vld [vmem:[#allocation2 + $0x1ae] sm:$0xff]  ;;  %v3454_v35 = vmax.f32 %v6438_v45, %v6463_v59 }
 0x222   : > { %v3336_v38 = vmax.f32 %v3272_v7, %v3304_v46  ;;  %v3114_v5 = vld [vmem:[#allocation2 + $0x1a7] sm:$0xff]  ;;  %v2569_v51 = vmax.f32 %v2505_v47, %v6477_v34  ;;  %v3115_v48 = vld [vmem:[#allocation2 + $0x1af] sm:$0xff]  ;;  %v3644_v17 = vmax.f32 %v3580_v55, %v6536_v12  ;;  %v2632_v62 = vmax.f32 %v2568_v53, %v6488_v41  ;;  %1016 = vst.msk [vmem:[%s6499_s14 + $0x8] sm:$0xff] %vm346_vm1, %v891_v16  ;;  %v4677_v22 = vpop.f32.mrf.mxu1 }
 0x223   : > { %v3337_v8 = vmax.f32 %v3273_v28, %v3305_v63  ;;  %v3146_v52 = vmax.f32 %v3082_v39, %v3114_v5  ;;  %v3645_v2 = vmax.f32 %v3581_v26, %v6538_v43  ;;  %v3147_v34 = vmax.f32 %v3083_v42, %v3115_v48  ;;  %v3178_v10 = vld [vmem:[#allocation2 + $0x1a8] sm:$0xff]  ;;  %v3179_v32 = vld [vmem:[#allocation2 + $0x1b0] sm:$0xff]  ;;  %1021 = vst.msk [vmem:[%s6499_s14 + $0x30] sm:$0xff] %vm346_vm1, %v4677_v22  ;;  %v6584_v26 = vld [vmem:[#allocation3 + $0xb8] sm:$0xff] }
 0x224   : > { %3368 = vst.msk [vmem:[#allocation3 + $0xe0] sm:$0xff] %vm801_vm2, %v3336_v38  ;;  %v3242_v56 = vld [vmem:[#allocation2 + $0x1a9] sm:$0xff]  ;;  %v3701_v58 = vpack.c.bf16 %v3643_v29, %v3642_v31  ;;  %v2633_v45 = vmax.f32 %v2569_v51, %v6490_v60  ;;  %v3455_v20 = vmax.f32 %v6443_v24, %v6465_v54  ;;  %v2696_v11 = vmax.f32 %v2632_v62, %v6551_v57  ;;  %v3243_v24 = vld [vmem:[#allocation2 + $0x1b1] sm:$0xff]  ;;  %v904_v7 = vpop.f32.mrf.mxu1  ;;  %v6599_v16 = vld [vmem:[#allocation3 + $0xc0] sm:$0xff] }
 0x225   : > { %3369 = vst.msk [vmem:[#allocation3 + $0xe8] sm:$0xff] %vm801_vm2, %v3337_v8  ;;  %v3210_v14 = vmax.f32 %v3146_v52, %v3178_v10  ;;  %v3702_v23 = vpack.c.bf16 %v3645_v2, %v3644_v17  ;;  %v3084_v0 = vld [vmem:[#allocation2 + $0x1c6] sm:$0xff]  ;;  %v3211_v50 = vmax.f32 %v3147_v34, %v3179_v32  ;;  %v3518_v44 = vmax.f32 %v3454_v35, %v6514_v9  ;;  %v3085_v61 = vld [vmem:[#allocation2 + $0x1ce] sm:$0xff] }
 0x226   : > { %v3116_v30 = vld [vmem:[#allocation2 + $0x1c7] sm:$0xff]  ;;  %4782 = vmatmul.mubr.msk.bf16.gmra.mxu0 %vm801_vm2, %v3701_v58  ;;  %v2697_v19 = vmax.f32 %v2633_v45, %v6559_v27  ;;  %v3117_v18 = vld [vmem:[#allocation2 + $0x1cf] sm:$0xff]  ;;  %v3519_v25 = vmax.f32 %v3455_v20, %v6525_v3  ;;  %3054 = vst.msk [vmem:[#allocation2 + $0x1e8] sm:$0xff] %vm801_vm2, %v2696_v11  ;;  %v3456_v46 = vmax.f32 %v6463_v59, %v6514_v9  ;;  %v4678_v1 = vpop.f32.mrf.mxu1 }
 0x227   : > { %v3148_v40 = vmax.f32 %v3084_v0, %v3116_v30  ;;  %v3274_v36 = vmax.f32 %v3210_v14, %v3242_v56  ;;  %4785 = vmatprep.mubr.msk.bf16.mxu0 %vm801_vm2, %v3702_v23  ;;  %v3149_v4 = vmax.f32 %v3085_v61, %v3117_v18  ;;  %v3180_v49 = vld [vmem:[#allocation2 + $0x1c8] sm:$0xff]  ;;  %v3275_v13 = vmax.f32 %v3211_v50, %v3243_v24  ;;  %v3181_v37 = vld [vmem:[#allocation2 + $0x1d0] sm:$0xff] }
 0x228   : > { %v3244_v21 = vld [vmem:[#allocation2 + $0x1c9] sm:$0xff]  ;;  %v3582_v28 = vmax.f32 %v3518_v44, %v6536_v12  ;;  %1019 = vst.msk [vmem:[%s6499_s14 + $0x20] sm:$0xff] %vm346_vm1, %v904_v7  ;;  %v2745_v6 = vpack.c.bf16 %v2697_v19, %v2696_v11  ;;  %v3307_v38 = vld [vmem:[#allocation2 + $0x1b2] sm:$0xff]  ;;  %v3583_v31 = vmax.f32 %v3519_v25, %v6538_v43  ;;  %v3457_v53 = vmax.f32 %v6465_v54, %v6525_v3  ;;  %v907_v48 = vpop.f32.mrf.mxu1 }
 0x229   : > { %v3306_v33 = vld [vmem:[#allocation2 + $0x1aa] sm:$0xff]  ;;  %3055 = vst.msk [vmem:[#allocation2 + $0x1f0] sm:$0xff] %vm801_vm2, %v2697_v19  ;;  %v3212_v63 = vmax.f32 %v3148_v40, %v3180_v49  ;;  %v3213_v8 = vmax.f32 %v3149_v4, %v3181_v37  ;;  %v3339_v55 = vmax.f32 %v3275_v13, %v3307_v38  ;;  %v3520_v51 = vmax.f32 %v3456_v46, %v6536_v12  ;;  %v3309_v62 = vld [vmem:[#allocation2 + $0x1d2] sm:$0xff] }
 0x22a   : > { %v3338_v15 = vmax.f32 %v3274_v36, %v3306_v33  ;;  %v6582_v47 = vld [vmem:[#allocation3 + $0xb0] sm:$0xff]  ;;  %1022 = vst.msk [vmem:[%s6499_s14 + $0x38] sm:$0xff] %vm346_vm1, %v4678_v1  ;;  %4768 = vmatmul.mubr.msk.bf16.gmra.mxu1 %vm801_vm2, %v2745_v6  ;;  %v3647_v29 = vmax.f32 %v3583_v31, %v6584_v26  ;;  %v3458_v42 = vmax.f32 %v6514_v9, %v6536_v12  ;;  %1020 = vst.msk [vmem:[%s6499_s14 + $0x28] sm:$0xff] %vm346_vm1, %v907_v48  ;;  %v3617_v32 = vld [vmem:[#allocation3 + $0xc8] sm:$0xff] }
 0x22b   : > { %v3646_v59 = vmax.f32 %v3582_v28, %v6582_v47  ;;  %v3245_v39 = vld [vmem:[#allocation2 + $0x1d1] sm:$0xff]  ;;  %v3276_v5 = vmax.f32 %v3212_v63, %v3244_v21  ;;  %3371 = vst.msk [vmem:[#allocation3 + $0xf8] sm:$0xff] %vm801_vm2, %v3339_v55  ;;  %v3521_v54 = vmax.f32 %v3457_v53, %v6538_v43  ;;  %v3459_v17 = vmax.f32 %v6525_v3, %v6538_v43  ;;  %v3620_v37 = vld [vmem:[#allocation3 + $0xe0] sm:$0xff] }
 0x22c   : > { %3370 = vst.msk [vmem:[#allocation3 + $0xf0] sm:$0xff] %vm801_vm2, %v3338_v15  ;;  %v3277_v52 = vmax.f32 %v3213_v8, %v3245_v39  ;;  %v3308_v35 = vld [vmem:[#allocation2 + $0x1ca] sm:$0xff]  ;;  %v3460_v2 = vmax.f32 %v6536_v12, %v6582_v47  ;;  %v3584_v10 = vmax.f32 %v3520_v51, %v6582_v47  ;;  %v3522_v56 = vmax.f32 %v3458_v42, %v6582_v47  ;;  %v3619_v25 = vld [vmem:[#allocation3 + $0xd8] sm:$0xff] }
 0x22d   : > { %v3340_v34 = vmax.f32 %v3276_v5, %v3308_v35  ;;  %v3703_v9 = vpack.c.bf16 %v3647_v29, %v3646_v59  ;;  %v3585_v45 = vmax.f32 %v3521_v54, %v6584_v26  ;;  %v3523_v14 = vmax.f32 %v3459_v17, %v6584_v26  ;;  %v3086_v20 = vld [vmem:[#allocation2 + $0x1e6] sm:$0xff]  ;;  %v3618_v61 = vld [vmem:[#allocation3 + $0xd0] sm:$0xff] }
 0x22e   : > { %v3341_v58 = vmax.f32 %v3277_v52, %v3309_v62  ;;  %v3461_v3 = vmax.f32 %v6538_v43, %v6584_v26  ;;  %v3118_v12 = vld [vmem:[#allocation2 + $0x1e7] sm:$0xff]  ;;  %v3648_v22 = vmax.f32 %v3584_v10, %v6599_v16  ;;  %v3586_v23 = vmax.f32 %v3522_v56, %v6599_v16 }
 0x22f   : > { %3372 = vst.msk [vmem:[#allocation3 + $0x100] sm:$0xff] %vm801_vm2, %v3340_v34  ;;  %4786 = vmatmul.mubr.msk.bf16.gmra.mxu0 %vm801_vm2, %v3703_v9  ;;  %v3524_v11 = vmax.f32 %v3460_v2, %v6599_v16  ;;  %v3462_v0 = vmax.f32 %v6582_v47, %v6599_v16  ;;  %v3150_v44 = vmax.f32 %v3086_v20, %v3118_v12  ;;  %v3182_v24 = vld [vmem:[#allocation2 + $0x1e8] sm:$0xff] }
 0x230   : > { %v3087_v30 = vld [vmem:[#allocation2 + $0x1ee] sm:$0xff]  ;;  %3373 = vst.msk [vmem:[#allocation3 + $0x108] sm:$0xff] %vm801_vm2, %v3341_v58  ;;  %v3649_v43 = vmax.f32 %v3585_v45, %v3617_v32  ;;  %v3587_v19 = vmax.f32 %v3523_v14, %v3617_v32  ;;  %v3525_v18 = vmax.f32 %v3461_v3, %v3617_v32  ;;  %v3463_v4 = vmax.f32 %v6584_v26, %v3617_v32 }
 0x231   : > { %v3119_v50 = vld [vmem:[#allocation2 + $0x1ef] sm:$0xff]  ;;  %v3588_v7 = vmax.f32 %v3524_v11, %v3618_v61  ;;  %v3214_v21 = vmax.f32 %v3150_v44, %v3182_v24  ;;  %v3650_v6 = vmax.f32 %v3586_v23, %v3618_v61  ;;  %v3526_v38 = vmax.f32 %v3462_v0, %v3618_v61 }
 0x232   : > { %v3151_v40 = vmax.f32 %v3087_v30, %v3119_v50  ;;  %v3246_v36 = vld [vmem:[#allocation2 + $0x1e9] sm:$0xff]  ;;  %v3704_v13 = vpack.c.bf16 %v3649_v43, %v3648_v22  ;;  %v3651_v33 = vmax.f32 %v3587_v19, %v3619_v25  ;;  %v3589_v28 = vmax.f32 %v3525_v18, %v3619_v25  ;;  %v3247_v31 = vld [vmem:[#allocation2 + $0x1f1] sm:$0xff]  ;;  %v4681_v18 = vpop.f32.mrf.mxu1 }
 0x233   : > { %v3183_v49 = vld [vmem:[#allocation2 + $0x1f0] sm:$0xff]  ;;  %v3621_v63 = vld [vmem:[#allocation3 + $0xe8] sm:$0xff]  ;;  %v3527_v15 = vmax.f32 %v3463_v4, %v3619_v25  ;;  %v3278_v47 = vmax.f32 %v3214_v21, %v3246_v36  ;;  %v3652_v1 = vmax.f32 %v3588_v7, %v3620_v37  ;;  %v3464_v55 = vmax.f32 %v6599_v16, %v3618_v61  ;;  %v3623_v52 = vld [vmem:[#allocation3 + $0xf8] sm:$0xff]  ;;  %1025 = vst.msk [vmem:[%s6499_s14 + $0x50] sm:$0xff] %vm346_vm1, %v4681_v18 }
 0x234   : > { %v3215_v46 = vmax.f32 %v3151_v40, %v3183_v49  ;;  %4789 = vmatprep.mubr.msk.bf16.mxu0 %vm801_vm2, %v3704_v13  ;;  %v3653_v8 = vmax.f32 %v3589_v28, %v3621_v63  ;;  %v3310_v59 = vld [vmem:[#allocation2 + $0x1ea] sm:$0xff]  ;;  %v3705_v53 = vpack.c.bf16 %v3651_v33, %v3650_v6  ;;  %v3465_v29 = vmax.f32 %v3617_v32, %v3619_v25  ;;  %v3311_v51 = vld [vmem:[#allocation2 + $0x1f2] sm:$0xff]  ;;  %v920_v4 = vpop.f32.mrf.mxu1 }
 0x235   : > { %v3591_v39 = vmax.f32 %v3527_v15, %v3621_v63  ;;  %v3622_v5 = vld [vmem:[#allocation3 + $0xf0] sm:$0xff]  ;;  %v3342_v42 = vmax.f32 %v3278_v47, %v3310_v59  ;;  %v3528_v35 = vmax.f32 %v3464_v55, %v3620_v37  ;;  %v3590_v17 = vmax.f32 %v3526_v38, %v3620_v37  ;;  %1023 = vst.msk [vmem:[%s6499_s14 + $0x40] sm:$0xff] %vm346_vm1, %v920_v4  ;;  %v1732_v55 = vld [vmem:[%s6499_s14] sm:$0xff]  ;;  %v1735_v59 = vld [vmem:[%s6499_s14 + $0x18] sm:$0xff] }
 0x236   : > { %v3279_v26 = vmax.f32 %v3215_v46, %v3247_v31  ;;  %v3706_v48 = vpack.c.bf16 %v3653_v8, %v3652_v1  ;;  %v3529_v2 = vmax.f32 %v3465_v29, %v3621_v63  ;;  %v3466_v62 = vmax.f32 %v3618_v61, %v3620_v37  ;;  %v3624_v58 = vld [vmem:[#allocation3 + $0x100] sm:$0xff]  ;;  %v4682_v33 = vpop.f32.mrf.mxu1  ;;  %v4707_v1 = vpop.f32.mrf.mxu0 }
 0x237   : > { %4790 = vmatmul.mubr.msk.bf16.gmra.mxu0 %vm801_vm2, %v3705_v53  ;;  %3374 = vst.msk [vmem:[#allocation3 + $0x110] sm:$0xff] %vm801_vm2, %v3342_v42  ;;  %v3592_v16 = vmax.f32 %v3528_v35, %v3622_v5  ;;  %v3467_v34 = vmax.f32 %v3619_v25, %v3621_v63  ;;  %v3468_v9 = vmax.f32 %v3620_v37, %v3622_v5  ;;  %v3625_v32 = vld [vmem:[#allocation3 + $0x108] sm:$0xff]  ;;  %v1736_v35 = vld [vmem:[%s6499_s14 + $0x20] sm:$0xff] }
 0x238   : > { %v3343_v54 = vmax.f32 %v3279_v26, %v3311_v51  ;;  %4793 = vmatprep.mubr.msk.bf16.mxu0 %vm801_vm2, %v3706_v48  ;;  %v3655_v10 = vmax.f32 %v3591_v39, %v3623_v52  ;;  %v3593_v56 = vmax.f32 %v3529_v2, %v3623_v52  ;;  %v3469_v45 = vmax.f32 %v3621_v63, %v3623_v52  ;;  %v923_v37 = vpop.f32.mrf.mxu1  ;;  %v1867_v26 = vpop.f32.mrf.mxu0  ;;  %v1733_v53 = vld [vmem:[%s6499_s14 + $0x8] sm:$0xff]  ;;  %v1738_v51 = vld [vmem:[%s6499_s14 + $0x30] sm:$0xff] }
 0x239   : > { %v3531_v14 = vmax.f32 %v3467_v34, %v3623_v52  ;;  %v3654_v3 = vmax.f32 %v3590_v17, %v3622_v5  ;;  %v3530_v12 = vmax.f32 %v3466_v62, %v3622_v5  ;;  %v3656_v22 = vmax.f32 %v3592_v16, %v3624_v58  ;;  %1026 = vst.msk [vmem:[%s6499_s14 + $0x58] sm:$0xff] %vm346_vm1, %v4682_v33  ;;  %v1739_v62 = vld [vmem:[%s6499_s14 + $0x38] sm:$0xff] }
 0x23a   : > { %3375 = vst.msk [vmem:[#allocation3 + $0x118] sm:$0xff] %vm801_vm2, %v3343_v54  ;;  %v3657_v20 = vmax.f32 %v3593_v56, %v3625_v32  ;;  %v3532_v23 = vmax.f32 %v3468_v9, %v3624_v58  ;;  %v3533_v30 = vmax.f32 %v3469_v45, %v3625_v32  ;;  %v3471_v50 = vmax.f32 %v3623_v52, %v3625_v32 }
 0x23b   : > { %v3707_v11 = vpack.c.bf16 %v3655_v10, %v3654_v3  ;;  %v3595_v0 = vmax.f32 %v3531_v14, %v3625_v32  ;;  %v3594_v43 = vmax.f32 %v3530_v12, %v3624_v58  ;;  %v3470_v61 = vmax.f32 %v3622_v5, %v3624_v58  ;;  %1024 = vst.msk [vmem:[%s6499_s14 + $0x48] sm:$0xff] %vm346_vm1, %v923_v37  ;;  %v4685_v5 = vpop.f32.mrf.mxu1  ;;  %v1737_v10 = vld [vmem:[%s6499_s14 + $0x28] sm:$0xff] }
 0x23c   : > { %v3708_v44 = vpack.c.bf16 %v3657_v20, %v3656_v22  ;;  %1029 = vst.msk [vmem:[%s6499_s14 + $0x70] sm:$0xff] %vm346_vm1, %v4685_v5 }
 0x23d   : > { %v936_v48 = vpop.f32.mrf.mxu1 }
 0x23e   : > { %v3626_v19 = vld [vmem:[#allocation3 + $0x110] sm:$0xff]  ;;  %1027 = vst.msk [vmem:[%s6499_s14 + $0x60] sm:$0xff] %vm346_vm1, %v936_v48 }
 0x23f   : > { %4794 = vmatmul.mubr.msk.bf16.gmra.mxu0 %vm801_vm2, %v3707_v11  ;;  %v3596_v24 = vmax.f32 %v3532_v23, %v3626_v19  ;;  %v3658_v49 = vmax.f32 %v3594_v43, %v3626_v19  ;;  %v3534_v13 = vmax.f32 %v3470_v61, %v3626_v19  ;;  %v4686_v17 = vpop.f32.mrf.mxu1  ;;  %v1740_v61 = vld [vmem:[%s6499_s14 + $0x40] sm:$0xff] }
 0x240   : > { %4797 = vmatprep.mubr.msk.bf16.mxu0 %vm801_vm2, %v3708_v44  ;;  %1030 = vst.msk [vmem:[%s6499_s14 + $0x78] sm:$0xff] %vm346_vm1, %v4686_v17 }
 0x241   : > { %v3627_v40 = vld [vmem:[#allocation3 + $0x118] sm:$0xff]  ;;  %v3660_v28 = vmax.f32 %v3596_v24, %v6488_v41  ;;  %v3598_v38 = vmax.f32 %v3534_v13, %v6488_v41  ;;  %v1994_v41 = vadd.f32 %v1867_v26, %v1732_v55  ;;  %v939_v34 = vpop.f32.mrf.mxu1 }
 0x242   : > { %v3659_v36 = vmax.f32 %v3595_v0, %v3627_v40  ;;  %v3597_v25 = vmax.f32 %v3533_v30, %v3627_v40  ;;  %v3535_v7 = vmax.f32 %v3471_v50, %v3627_v40  ;;  %1028 = vst.msk [vmem:[%s6499_s14 + $0x68] sm:$0xff] %vm346_vm1, %v939_v34  ;;  %v1742_v50 = vld [vmem:[%s6499_s14 + $0x50] sm:$0xff] }
 0x243   : > { %v3662_v31 = vmax.f32 %v3598_v38, %v6551_v57  ;;  %2026 = vst.msk [vmem:[%s6499_s14] sm:$0xff] %vm346_vm1, %v1994_v41  ;;  %v4689_v58 = vpop.f32.mrf.mxu1 }
 0x244   : > { %v3661_v21 = vmax.f32 %v3597_v25, %v6490_v60  ;;  %v3709_v46 = vpack.c.bf16 %v3659_v36, %v3658_v49  ;;  %v3599_v6 = vmax.f32 %v3535_v7, %v6490_v60  ;;  %v1734_v60 = vld [vmem:[%s6499_s14 + $0x10] sm:$0xff]  ;;  %1033 = vst.msk [vmem:[%s6499_s14 + $0x90] sm:$0xff] %vm346_vm1, %v4689_v58  ;;  %v1743_v36 = vld [vmem:[%s6499_s14 + $0x58] sm:$0xff]  ;;  %v1741_v49 = vld [vmem:[%s6499_s14 + $0x48] sm:$0xff] }
 0x245   : > { %v1996_v8 = vadd.f32 %v4707_v1, %v1734_v60  ;;  %v952_v32 = vpop.f32.mrf.mxu1 }
 0x246   : > { %v3710_v63 = vpack.c.bf16 %v3661_v21, %v3660_v28  ;;  %v3663_v15 = vmax.f32 %v3599_v6, %v6559_v27  ;;  %v4708_v27 = vpop.f32.mrf.mxu0  ;;  %1031 = vst.msk [vmem:[%s6499_s14 + $0x80] sm:$0xff] %vm346_vm1, %v952_v32  ;;  %v1746_v28 = vld [vmem:[%s6499_s14 + $0x70] sm:$0xff] }
 0x247   : > { %4798 = vmatmul.mubr.msk.bf16.gmra.mxu0 %vm801_vm2, %v3709_v46  ;;  %2028 = vst.msk [vmem:[%s6499_s14 + $0x10] sm:$0xff] %vm346_vm1, %v1996_v8  ;;  %v1997_v57 = vadd.f32 %v4708_v27, %v1735_v59  ;;  %v4690_v14 = vpop.f32.mrf.mxu1 }
 0x248   : > { %4801 = vmatprep.mubr.msk.bf16.mxu0 %vm801_vm2, %v3710_v63  ;;  %v3711_v47 = vpack.c.bf16 %v3663_v15, %v3662_v31  ;;  %v1870_v39 = vpop.f32.mrf.mxu0  ;;  %1034 = vst.msk [vmem:[%s6499_s14 + $0x98] sm:$0xff] %vm346_vm1, %v4690_v14  ;;  %v1744_v63 = vld [vmem:[%s6499_s14 + $0x60] sm:$0xff]  ;;  %v1747_v31 = vld [vmem:[%s6499_s14 + $0x78] sm:$0xff] }
 0x249   : > { %2029 = vst.msk [vmem:[%s6499_s14 + $0x18] sm:$0xff] %vm346_vm1, %v1997_v57  ;;  %v1995_v29 = vadd.f32 %v1870_v39, %v1733_v53  ;;  %v955_v3 = vpop.f32.mrf.mxu1  ;;  %v1745_v55 = vld [vmem:[%s6499_s14 + $0x68] sm:$0xff] }
 0x24a   : > { %v4711_v42 = vpop.f32.mrf.mxu0  ;;  %1032 = vst.msk [vmem:[%s6499_s14 + $0x88] sm:$0xff] %vm346_vm1, %v955_v3  ;;  %v2698_v27 = vld [vmem:[%s6499_s14] sm:$0xff] }
 0x24b   : > { %2027 = vst.msk [vmem:[%s6499_s14 + $0x8] sm:$0xff] %vm346_vm1, %v1995_v29  ;;  %v2000_v52 = vadd.f32 %v4711_v42, %v1738_v51  ;;  %v4693_v20 = vpop.f32.mrf.mxu1  ;;  %v1750_v53 = vld [vmem:[%s6499_s14 + $0x90] sm:$0xff] }
 0x24c   : > { %v1883_v54 = vpop.f32.mrf.mxu0  ;;  %1037 = vst.msk [vmem:[%s6499_s14 + $0xb0] sm:$0xff] %vm346_vm1, %v4693_v20 }
 0x24d   : > { %2032 = vst.msk [vmem:[%s6499_s14 + $0x30] sm:$0xff] %vm346_vm1, %v2000_v52  ;;  %v1998_v2 = vadd.f32 %v1883_v54, %v1736_v35  ;;  %v968_v12 = vpop.f32.mrf.mxu1  ;;  %v1748_v48 = vld [vmem:[%s6499_s14 + $0x80] sm:$0xff] }
 0x24e   : > { %v4712_v16 = vpop.f32.mrf.mxu0  ;;  %1035 = vst.msk [vmem:[%s6499_s14 + $0xa0] sm:$0xff] %vm346_vm1, %v968_v12  ;;  %v2700_v1 = vld [vmem:[%s6499_s14 + $0x10] sm:$0xff] }
 0x24f   : > { %4802 = vmatmul.mubr.msk.bf16.gmra.mxu0 %vm801_vm2, %v3711_v47  ;;  %2030 = vst.msk [vmem:[%s6499_s14 + $0x20] sm:$0xff] %vm346_vm1, %v1998_v2  ;;  %v2001_v9 = vadd.f32 %v4712_v16, %v1739_v62  ;;  %v4694_v22 = vpop.f32.mrf.mxu1  ;;  %v1751_v62 = vld [vmem:[%s6499_s14 + $0x98] sm:$0xff] }
 0x250   : > { %v1886_v56 = vpop.f32.mrf.mxu0  ;;  %1038 = vst.msk [vmem:[%s6499_s14 + $0xb8] sm:$0xff] %vm346_vm1, %v4694_v22  ;;  %v2701_v51 = vld [vmem:[%s6499_s14 + $0x18] sm:$0xff] }
 0x251   : > { %2033 = vst.msk [vmem:[%s6499_s14 + $0x38] sm:$0xff] %vm346_vm1, %v2001_v9  ;;  %v1999_v45 = vadd.f32 %v1886_v56, %v1737_v10  ;;  %v971_v23 = vpop.f32.mrf.mxu1  ;;  %v1749_v10 = vld [vmem:[%s6499_s14 + $0x88] sm:$0xff] }
 0x252   : > { %1036 = vst.msk [vmem:[%s6499_s14 + $0xa8] sm:$0xff] %vm346_vm1, %v971_v23  ;;  %v4715_v44 = vpop.f32.mrf.mxu0  ;;  %v2699_v17 = vld [vmem:[%s6499_s14 + $0x8] sm:$0xff] }
 0x253   : > { %2031 = vst.msk [vmem:[%s6499_s14 + $0x28] sm:$0xff] %vm346_vm1, %v1999_v45  ;;  %v4697_v11 = vpop.f32.mrf.mxu1  ;;  %v2004_v43 = vadd.f32 %v4715_v44, %v1742_v50  ;;  %v1754_v45 = vld [vmem:[%s6499_s14 + $0xb0] sm:$0xff] }
 0x254   : > { %1041 = vst.msk [vmem:[%s6499_s14 + $0xd0] sm:$0xff] %vm346_vm1, %v4697_v11  ;;  %v1899_v18 = vpop.f32.mrf.mxu0  ;;  %v2704_v44 = vld [vmem:[%s6499_s14 + $0x30] sm:$0xff] }
 0x255   : > { %v984_v0 = vpop.f32.mrf.mxu1  ;;  %2036 = vst.msk [vmem:[%s6499_s14 + $0x50] sm:$0xff] %vm346_vm1, %v2004_v43  ;;  %v2002_v40 = vadd.f32 %v1899_v18, %v1740_v61  ;;  %v1752_v3 = vld [vmem:[%s6499_s14 + $0xa0] sm:$0xff] }
 0x256   : > { %1039 = vst.msk [vmem:[%s6499_s14 + $0xc0] sm:$0xff] %vm346_vm1, %v984_v0  ;;  %v4716_v25 = vpop.f32.mrf.mxu0  ;;  %v2702_v61 = vld [vmem:[%s6499_s14 + $0x20] sm:$0xff] }
 0x257   : > { %v4698_v30 = vpop.f32.mrf.mxu1  ;;  %2034 = vst.msk [vmem:[%s6499_s14 + $0x40] sm:$0xff] %vm346_vm1, %v2002_v40  ;;  %v2005_v7 = vadd.f32 %v4716_v25, %v1743_v36  ;;  %v1755_v22 = vld [vmem:[%s6499_s14 + $0xb8] sm:$0xff] }
 0x258   : > { %1042 = vst.msk [vmem:[%s6499_s14 + $0xd8] sm:$0xff] %vm346_vm1, %v4698_v30  ;;  %v1902_v21 = vpop.f32.mrf.mxu0 }
 0x259   : > { %v987_v19 = vpop.f32.mrf.mxu1  ;;  %2037 = vst.msk [vmem:[%s6499_s14 + $0x58] sm:$0xff] %vm346_vm1, %v2005_v7  ;;  %v2003_v13 = vadd.f32 %v1902_v21, %v1741_v49  ;;  %v1753_v0 = vld [vmem:[%s6499_s14 + $0xa8] sm:$0xff] }
 0x25a   : > { %1040 = vst.msk [vmem:[%s6499_s14 + $0xc8] sm:$0xff] %vm346_vm1, %v987_v19  ;;  %v4719_v46 = vpop.f32.mrf.mxu0  ;;  %v2703_v21 = vld [vmem:[%s6499_s14 + $0x28] sm:$0xff] }
 0x25b   : > { %v4701_v24 = vpop.f32.mrf.mxu1  ;;  %2035 = vst.msk [vmem:[%s6499_s14 + $0x48] sm:$0xff] %vm346_vm1, %v2003_v13  ;;  %v2008_v6 = vadd.f32 %v4719_v46, %v1746_v28  ;;  %v1758_v7 = vld [vmem:[%s6499_s14 + $0xd0] sm:$0xff] }
 0x25c   : > { %1045 = vst.msk [vmem:[%s6499_s14 + $0xf0] sm:$0xff] %vm346_vm1, %v4701_v24  ;;  %v1915_v38 = vpop.f32.mrf.mxu0  ;;  %v2705_v24 = vld [vmem:[%s6499_s14 + $0x38] sm:$0xff] }
 0x25d   : > { %v1000_v4 = vpop.f32.mrf.mxu1  ;;  %2040 = vst.msk [vmem:[%s6499_s14 + $0x70] sm:$0xff] %vm346_vm1, %v2008_v6  ;;  %v2006_v15 = vadd.f32 %v1915_v38, %v1744_v63  ;;  %v1756_v28 = vld [vmem:[%s6499_s14 + $0xc0] sm:$0xff] }
 0x25e   : > { %1043 = vst.msk [vmem:[%s6499_s14 + $0xe0] sm:$0xff] %vm346_vm1, %v1000_v4  ;;  %v4720_v47 = vpop.f32.mrf.mxu0 }
 0x25f   : > { %v4702_v33 = vpop.f32.mrf.mxu1  ;;  %2038 = vst.msk [vmem:[%s6499_s14 + $0x60] sm:$0xff] %vm346_vm1, %v2006_v15  ;;  %v2009_v60 = vadd.f32 %v4720_v47, %v1747_v31 }
 0x260   : > { %1046 = vst.msk [vmem:[%s6499_s14 + $0xf8] sm:$0xff] %vm346_vm1, %v4702_v33  ;;  %v1918_v26 = vpop.f32.mrf.mxu0 }
 0x261   : > { %v1003_v37 = vpop.f32.mrf.mxu1  ;;  %2041 = vst.msk [vmem:[%s6499_s14 + $0x78] sm:$0xff] %vm346_vm1, %v2009_v60  ;;  %v2007_v59 = vadd.f32 %v1918_v26, %v1745_v55  ;;  %v1757_v15 = vld [vmem:[%s6499_s14 + $0xc8] sm:$0xff]  ;;  %v2708_v60 = vld [vmem:[%s6499_s14 + $0x50] sm:$0xff]  ;;  %v2706_v55 = vld [vmem:[%s6499_s14 + $0x40] sm:$0xff] }
 0x262   : > { %1044 = vst.msk [vmem:[%s6499_s14 + $0xe8] sm:$0xff] %vm346_vm1, %v1003_v37  ;;  %v4723_v39 = vpop.f32.mrf.mxu0  ;;  %v1759_v37 = vld [vmem:[%s6499_s14 + $0xd8] sm:$0xff] }
 0x263   : > { %v4741_v8 = vpop.f32.mrf.mxu1  ;;  %2039 = vst.msk [vmem:[%s6499_s14 + $0x68] sm:$0xff] %vm346_vm1, %v2007_v59  ;;  %v2012_v29 = vadd.f32 %v4723_v39, %v1750_v53  ;;  %v2709_v59 = vld [vmem:[%s6499_s14 + $0x58] sm:$0xff]  ;;  %v2707_v53 = vld [vmem:[%s6499_s14 + $0x48] sm:$0xff] }
 0x264   : > { %v2962_v41 = vadd.f32 %v4741_v8, %v2700_v1  ;;  %v1931_v52 = vpop.f32.mrf.mxu0 }
 0x265   : > { %v2833_v57 = vpop.f32.mrf.mxu1  ;;  %2044 = vst.msk [vmem:[%s6499_s14 + $0x90] sm:$0xff] %vm346_vm1, %v2012_v29  ;;  %v2010_v54 = vadd.f32 %v1931_v52, %v1748_v48  ;;  %v1762_v29 = vld [vmem:[%s6499_s14 + $0xf0] sm:$0xff]  ;;  %v1760_v48 = vld [vmem:[%s6499_s14 + $0xe0] sm:$0xff] }
 0x266   : > { %2994 = vst.msk [vmem:[%s6499_s14 + $0x10] sm:$0xff] %vm346_vm1, %v2962_v41  ;;  %v2960_v5 = vadd.f32 %v2833_v57, %v2698_v27  ;;  %v4724_v16 = vpop.f32.mrf.mxu0 }
 0x267   : > { %v4742_v42 = vpop.f32.mrf.mxu1  ;;  %2042 = vst.msk [vmem:[%s6499_s14 + $0x80] sm:$0xff] %vm346_vm1, %v2010_v54  ;;  %v2013_v9 = vadd.f32 %v4724_v16, %v1751_v62  ;;  %v1763_v54 = vld [vmem:[%s6499_s14 + $0xf8] sm:$0xff] }
 0x268   : > { %2992 = vst.msk [vmem:[%s6499_s14] sm:$0xff] %vm346_vm1, %v2960_v5  ;;  %v2963_v35 = vadd.f32 %v4742_v42, %v2701_v51  ;;  %v1934_v56 = vpop.f32.mrf.mxu0 }
 0x269   : > { %v2836_v2 = vpop.f32.mrf.mxu1  ;;  %2045 = vst.msk [vmem:[%s6499_s14 + $0x98] sm:$0xff] %vm346_vm1, %v2013_v9  ;;  %v2011_v58 = vadd.f32 %v1934_v56, %v1749_v10  ;;  %v1761_v62 = vld [vmem:[%s6499_s14 + $0xe8] sm:$0xff] }
 0x26a   : > { %2995 = vst.msk [vmem:[%s6499_s14 + $0x18] sm:$0xff] %vm346_vm1, %v2963_v35  ;;  %v2961_v34 = vadd.f32 %v2836_v2, %v2699_v17  ;;  %v4727_v32 = vpop.f32.mrf.mxu0 }
 0x26b   : > { %2043 = vst.msk [vmem:[%s6499_s14 + $0x88] sm:$0xff] %vm346_vm1, %v2011_v58  ;;  %v2016_v14 = vadd.f32 %v4727_v32, %v1754_v45  ;;  %v2710_v58 = vld [vmem:[%s6499_s14 + $0x60] sm:$0xff] }
 0x26c   : > { %2993 = vst.msk [vmem:[%s6499_s14 + $0x8] sm:$0xff] %vm346_vm1, %v2961_v34  ;;  %v1947_v20 = vpop.f32.mrf.mxu0  ;;  %v2712_v34 = vld [vmem:[%s6499_s14 + $0x70] sm:$0xff] }
 0x26d   : > { %2048 = vst.msk [vmem:[%s6499_s14 + $0xb0] sm:$0xff] %vm346_vm1, %v2016_v14  ;;  %v2014_v12 = vadd.f32 %v1947_v20, %v1752_v3  ;;  %v2713_v14 = vld [vmem:[%s6499_s14 + $0x78] sm:$0xff] }
 0x26e   : > { %v4728_v23 = vpop.f32.mrf.mxu0 }
 0x26f   : > { %2046 = vst.msk [vmem:[%s6499_s14 + $0xa0] sm:$0xff] %vm346_vm1, %v2014_v12  ;;  %v2017_v11 = vadd.f32 %v4728_v23, %v1755_v22  ;;  %v2711_v12 = vld [vmem:[%s6499_s14 + $0x68] sm:$0xff] }
 0x270   : > { %v1950_v30 = vpop.f32.mrf.mxu0 }
 0x271   : > { %2049 = vst.msk [vmem:[%s6499_s14 + $0xb8] sm:$0xff] %vm346_vm1, %v2017_v11  ;;  %v2015_v50 = vadd.f32 %v1950_v30, %v1753_v0  ;;  %v2716_v11 = vld [vmem:[%s6499_s14 + $0x90] sm:$0xff] }
 0x273   : > { %2047 = vst.msk [vmem:[%s6499_s14 + $0xa8] sm:$0xff] %vm346_vm1, %v2015_v50  ;;  %v2714_v50 = vld [vmem:[%s6499_s14 + $0x80] sm:$0xff] }
 0x27d   : > { %v4731_v4 = vpop.f32.mrf.mxu0 }
 0x27e   : > { %v2020_v49 = vadd.f32 %v4731_v4, %v1758_v7 }
 0x27f   : > { %v1963_v46 = vpop.f32.mrf.mxu0 }
 0x280   : > { %v4745_v43 = vpop.f32.mrf.mxu1  ;;  %2052 = vst.msk [vmem:[%s6499_s14 + $0xd0] sm:$0xff] %vm346_vm1, %v2020_v49  ;;  %v2018_v6 = vadd.f32 %v1963_v46, %v1756_v28  ;;  %v2720_v49 = vld [vmem:[%s6499_s14 + $0xb0] sm:$0xff] }
 0x281   : > { %v2966_v19 = vadd.f32 %v4745_v43, %v2704_v44  ;;  %v4732_v63 = vpop.f32.mrf.mxu0 }
 0x282   : > { %v2849_v18 = vpop.f32.mrf.mxu1  ;;  %2050 = vst.msk [vmem:[%s6499_s14 + $0xc0] sm:$0xff] %vm346_vm1, %v2018_v6  ;;  %v2021_v38 = vadd.f32 %v4732_v63, %v1759_v37  ;;  %v2718_v6 = vld [vmem:[%s6499_s14 + $0xa0] sm:$0xff]  ;;  %v3667_v63 = vld [vmem:[%s6499_s14 + $0x18] sm:$0xff] }
 0x283   : > { %2998 = vst.msk [vmem:[%s6499_s14 + $0x30] sm:$0xff] %vm346_vm1, %v2966_v19  ;;  %v2964_v40 = vadd.f32 %v2849_v18, %v2702_v61  ;;  %v1966_v31 = vpop.f32.mrf.mxu0  ;;  %v2717_v19 = vld [vmem:[%s6499_s14 + $0x98] sm:$0xff] }
 0x284   : > { %v4746_v36 = vpop.f32.mrf.mxu1  ;;  %2053 = vst.msk [vmem:[%s6499_s14 + $0xd8] sm:$0xff] %vm346_vm1, %v2021_v38  ;;  %v2019_v47 = vadd.f32 %v1966_v31, %v1757_v15 }
 0x285   : > { %2996 = vst.msk [vmem:[%s6499_s14 + $0x20] sm:$0xff] %vm346_vm1, %v2964_v40  ;;  %v2967_v25 = vadd.f32 %v4746_v36, %v2705_v24  ;;  %v2715_v40 = vld [vmem:[%s6499_s14 + $0x88] sm:$0xff] }
 0x286   : > { %v2852_v13 = vpop.f32.mrf.mxu1  ;;  %2051 = vst.msk [vmem:[%s6499_s14 + $0xc8] sm:$0xff] %vm346_vm1, %v2019_v47  ;;  %v2721_v47 = vld [vmem:[%s6499_s14 + $0xb8] sm:$0xff] }
 0x287   : > { %2999 = vst.msk [vmem:[%s6499_s14 + $0x38] sm:$0xff] %vm346_vm1, %v2967_v25  ;;  %v2965_v33 = vadd.f32 %v2852_v13, %v2703_v21  ;;  %v3666_v25 = vld [vmem:[%s6499_s14 + $0x10] sm:$0xff]  ;;  %v3664_v13 = vld [vmem:[%s6499_s14] sm:$0xff] }
 0x289   : > { %2997 = vst.msk [vmem:[%s6499_s14 + $0x28] sm:$0xff] %vm346_vm1, %v2965_v33 }
 0x295   : > { %v4749_v1 = vpop.f32.mrf.mxu1 }
 0x296   : > { %v2970_v8 = vadd.f32 %v4749_v1, %v2708_v60  ;;  %v3665_v1 = vld [vmem:[%s6499_s14 + $0x8] sm:$0xff] }
 0x297   : > { %v2865_v26 = vpop.f32.mrf.mxu1 }
 0x298   : > { %3002 = vst.msk [vmem:[%s6499_s14 + $0x50] sm:$0xff] %vm346_vm1, %v2970_v8  ;;  %v2968_v41 = vadd.f32 %v2865_v26, %v2706_v55 }
 0x299   : > { %v4750_v27 = vpop.f32.mrf.mxu1 }
 0x29a   : > { %3000 = vst.msk [vmem:[%s6499_s14 + $0x40] sm:$0xff] %vm346_vm1, %v2968_v41  ;;  %v2971_v57 = vadd.f32 %v4750_v27, %v2709_v59  ;;  %v2719_v41 = vld [vmem:[%s6499_s14 + $0xa8] sm:$0xff]  ;;  %v6864_v27 = vld [vmem:[%s7243_s4] ss:$0 sm:$0xff] }
 0x29b   : > { %v2868_v39 = vpop.f32.mrf.mxu1 }
 0x29c   : > { %3003 = vst.msk [vmem:[%s6499_s14 + $0x58] sm:$0xff] %vm346_vm1, %v2971_v57  ;;  %v2969_v5 = vadd.f32 %v2868_v39, %v2707_v53 }
 0x29e   : > { %3001 = vst.msk [vmem:[%s6499_s14 + $0x48] sm:$0xff] %vm346_vm1, %v2969_v5 }
 0x29f   : > { %v4735_v51 = vpop.f32.mrf.mxu0 }
 0x2a0   : > { %v2024_v42 = vadd.f32 %v4735_v51, %v1762_v29  ;;  %v3670_v29 = vld [vmem:[%s6499_s14 + $0x30] sm:$0xff] }
 0x2a1   : > { %v1979_v52 = vpop.f32.mrf.mxu0 }
 0x2a2   : > { %2056 = vst.msk [vmem:[%s6499_s14 + $0xf0] sm:$0xff] %vm346_vm1, %v2024_v42  ;;  %v2022_v35 = vadd.f32 %v1979_v52, %v1760_v48 }
 0x2a3   : > { %v4736_v17 = vpop.f32.mrf.mxu0 }
 0x2a4   : > { %2054 = vst.msk [vmem:[%s6499_s14 + $0xe0] sm:$0xff] %vm346_vm1, %v2022_v35  ;;  %v2025_v2 = vadd.f32 %v4736_v17, %v1763_v54  ;;  %v3668_v54 = vld [vmem:[%s6499_s14 + $0x20] sm:$0xff] }
 0x2a5   : > { %v1982_v16 = vpop.f32.mrf.mxu0 }
 0x2a6   : > { %2057 = vst.msk [vmem:[%s6499_s14 + $0xf8] sm:$0xff] %vm346_vm1, %v2025_v2  ;;  %v2023_v10 = vadd.f32 %v1982_v16, %v1761_v62 }
 0x2a8   : > { %2055 = vst.msk [vmem:[%s6499_s14 + $0xe8] sm:$0xff] %vm346_vm1, %v2023_v10 }
 0x2ae   : > { %v4753_v9 = vpop.f32.mrf.mxu1 }
 0x2af   : > { %v2974_v56 = vadd.f32 %v4753_v9, %v2712_v34  ;;  %v3671_v9 = vld [vmem:[%s6499_s14 + $0x38] sm:$0xff] }
 0x2b0   : > { %v2881_v45 = vpop.f32.mrf.mxu1 }
 0x2b1   : > { %3006 = vst.msk [vmem:[%s6499_s14 + $0x70] sm:$0xff] %vm346_vm1, %v2974_v56  ;;  %v2972_v32 = vadd.f32 %v2881_v45, %v2710_v58 }
 0x2b2   : > { %v4754_v3 = vpop.f32.mrf.mxu1 }
 0x2b3   : > { %3004 = vst.msk [vmem:[%s6499_s14 + $0x60] sm:$0xff] %vm346_vm1, %v2972_v32  ;;  %v2975_v20 = vadd.f32 %v4754_v3, %v2713_v14  ;;  %v2724_v32 = vld [vmem:[%s6499_s14 + $0xd0] sm:$0xff] }
 0x2b4   : > { %v2884_v22 = vpop.f32.mrf.mxu1 }
 0x2b5   : > { %3007 = vst.msk [vmem:[%s6499_s14 + $0x78] sm:$0xff] %vm346_vm1, %v2975_v20  ;;  %v2973_v23 = vadd.f32 %v2884_v22, %v2711_v12  ;;  %v3669_v20 = vld [vmem:[%s6499_s14 + $0x28] sm:$0xff] }
 0x2b7   : > { %3005 = vst.msk [vmem:[%s6499_s14 + $0x68] sm:$0xff] %vm346_vm1, %v2973_v23 }
 0x2bc   : > { %v4757_v0 = vpop.f32.mrf.mxu1 }
 0x2bd   : > { %v2978_v30 = vadd.f32 %v4757_v0, %v2716_v11  ;;  %v2722_v11 = vld [vmem:[%s6499_s14 + $0xc0] sm:$0xff] }
 0x2be   : > { %v2897_v44 = vpop.f32.mrf.mxu1 }
 0x2bf   : > { %3010 = vst.msk [vmem:[%s6499_s14 + $0x90] sm:$0xff] %vm346_vm1, %v2978_v30  ;;  %v2976_v43 = vadd.f32 %v2897_v44, %v2714_v50  ;;  %v2725_v50 = vld [vmem:[%s6499_s14 + $0xd8] sm:$0xff] }
 0x2c0   : > { %v4758_v61 = vpop.f32.mrf.mxu1 }
 0x2c1   : > { %3008 = vst.msk [vmem:[%s6499_s14 + $0x80] sm:$0xff] %vm346_vm1, %v2976_v43  ;;  %v2979_v18 = vadd.f32 %v4758_v61, %v2717_v19 }
 0x2c2   : > { %v2900_v24 = vpop.f32.mrf.mxu1 }
 0x2c3   : > { %3011 = vst.msk [vmem:[%s6499_s14 + $0x98] sm:$0xff] %vm346_vm1, %v2979_v18  ;;  %v2977_v36 = vadd.f32 %v2900_v24, %v2715_v40  ;;  %v2723_v18 = vld [vmem:[%s6499_s14 + $0xc8] sm:$0xff] }
 0x2c5   : > { %3009 = vst.msk [vmem:[%s6499_s14 + $0x88] sm:$0xff] %vm346_vm1, %v2977_v36 }
 0x2ca   : > { %v4775_v7 = vpop.f32.mrf.mxu0 }
 0x2cb   : > { %v3928_v4 = vadd.f32 %v4775_v7, %v3666_v25 }
 0x2cc   : > { %v4761_v21 = vpop.f32.mrf.mxu1  ;;  %v3799_v33 = vpop.f32.mrf.mxu0 }
 0x2cd   : > { %v2982_v28 = vadd.f32 %v4761_v21, %v2720_v49  ;;  %3960 = vst.msk [vmem:[%s6499_s14 + $0x10] sm:$0xff] %vm346_vm1, %v3928_v4  ;;  %v3926_v46 = vadd.f32 %v3799_v33, %v3664_v13  ;;  %v3674_v49 = vld [vmem:[%s6499_s14 + $0x50] sm:$0xff] }
 0x2ce   : > { %v2913_v37 = vpop.f32.mrf.mxu1  ;;  %v4776_v38 = vpop.f32.mrf.mxu0 }
 0x2cf   : > { %3014 = vst.msk [vmem:[%s6499_s14 + $0xb0] sm:$0xff] %vm346_vm1, %v2982_v28  ;;  %v2980_v15 = vadd.f32 %v2913_v37, %v2718_v6  ;;  %3958 = vst.msk [vmem:[%s6499_s14] sm:$0xff] %vm346_vm1, %v3926_v46  ;;  %v3929_v31 = vadd.f32 %v4776_v38, %v3667_v63 }
 0x2d0   : > { %v4762_v60 = vpop.f32.mrf.mxu1  ;;  %v3802_v8 = vpop.f32.mrf.mxu0 }
 0x2d1   : > { %3012 = vst.msk [vmem:[%s6499_s14 + $0xa0] sm:$0xff] %vm346_vm1, %v2980_v15  ;;  %v2983_v55 = vadd.f32 %v4762_v60, %v2721_v47  ;;  %3961 = vst.msk [vmem:[%s6499_s14 + $0x18] sm:$0xff] %vm346_vm1, %v3929_v31  ;;  %v3927_v26 = vadd.f32 %v3802_v8, %v3665_v1  ;;  %v3672_v31 = vld [vmem:[%s6499_s14 + $0x40] sm:$0xff]  ;;  %v3675_v1 = vld [vmem:[%s6499_s14 + $0x58] sm:$0xff] }
 0x2d2   : > { %v2916_v59 = vpop.f32.mrf.mxu1 }
 0x2d3   : > { %3015 = vst.msk [vmem:[%s6499_s14 + $0xb8] sm:$0xff] %vm346_vm1, %v2983_v55  ;;  %v2981_v57 = vadd.f32 %v2916_v59, %v2719_v41  ;;  %3959 = vst.msk [vmem:[%s6499_s14 + $0x8] sm:$0xff] %vm346_vm1, %v3927_v26 }
 0x2d4   : > { %v3992_v53 = vld [vmem:[%s6499_s14 + $0x10] sm:$0xff] }
 0x2d5   : > { %3013 = vst.msk [vmem:[%s6499_s14 + $0xa8] sm:$0xff] %vm346_vm1, %v2981_v57  ;;  %v6874_v39 = vadd.f32 %v6864_v27, %v3992_v53  ;;  %v2728_v57 = vld [vmem:[%s6499_s14 + $0xf0] sm:$0xff] }
 0x2d6   : > { %v3990_v5 = vld [vmem:[%s6499_s14] sm:$0xff]  ;;  %v4779_v51 = vpop.f32.mrf.mxu0 }
 0x2d7   : > { %v4516_v42 = vmul.f32 -1.442695, %v6874_v39  ;;  %v6880_v48 = vadd.f32 %v6864_v27, %v3990_v5  ;;  %v3932_v52 = vadd.f32 %v4779_v51, %v3670_v29  ;;  %v3673_v29 = vld [vmem:[%s6499_s14 + $0x48] sm:$0xff] }
 0x2d8   : > { %v3993_v35 = vld [vmem:[%s6499_s14 + $0x18] sm:$0xff]  ;;  %v3815_v17 = vpop.f32.mrf.mxu0 }
 0x2d9   : > { %4966 = vpow2.f32 %v4516_v42  ;;  %v4514_v2 = vmul.f32 -1.442695, %v6880_v48  ;;  %v6886_v62 = vadd.f32 %v6864_v27, %v3993_v35  ;;  %3964 = vst.msk [vmem:[%s6499_s14 + $0x30] sm:$0xff] %vm346_vm1, %v3932_v52  ;;  %v3930_v16 = vadd.f32 %v3815_v17, %v3668_v54  ;;  %v2726_v42 = vld [vmem:[%s6499_s14 + $0xe0] sm:$0xff] }
 0x2da   : > { %v3991_v34 = vld [vmem:[%s6499_s14 + $0x8] sm:$0xff]  ;;  %v4780_v10 = vpop.f32.mrf.mxu0 }
 0x2db   : > { %4968 = vpow2.f32 %v4514_v2  ;;  %v4517_v56 = vmul.f32 -1.442695, %v6886_v62  ;;  %v6894_v58 = vadd.f32 %v6864_v27, %v3991_v34  ;;  %3962 = vst.msk [vmem:[%s6499_s14 + $0x20] sm:$0xff] %vm346_vm1, %v3930_v16  ;;  %v3933_v45 = vadd.f32 %v4780_v10, %v3671_v9  ;;  %v3678_v16 = vld [vmem:[%s6499_s14 + $0x70] sm:$0xff]  ;;  %v2729_v9 = vld [vmem:[%s6499_s14 + $0xf8] sm:$0xff] }
 0x2dc   : > { %v4765_v14 = vpop.f32.mrf.mxu1  ;;  %v3818_v12 = vpop.f32.mrf.mxu0 }
 0x2dd   : > { %v2986_v3 = vadd.f32 %v4765_v14, %v2724_v32  ;;  %4970 = vpow2.f32 %v4517_v56  ;;  %v4515_v22 = vmul.f32 -1.442695, %v6894_v58  ;;  %3965 = vst.msk [vmem:[%s6499_s14 + $0x38] sm:$0xff] %vm346_vm1, %v3933_v45  ;;  %v3931_v23 = vadd.f32 %v3818_v12, %v3669_v20  ;;  %v2727_v12 = vld [vmem:[%s6499_s14 + $0xe8] sm:$0xff] }
 0x2de   : > { %v2929_v0 = vpop.f32.mrf.mxu1 }
 0x2df   : > { %3018 = vst.msk [vmem:[%s6499_s14 + $0xd0] sm:$0xff] %vm346_vm1, %v2986_v3  ;;  %v2984_v30 = vadd.f32 %v2929_v0, %v2722_v11  ;;  %4972 = vpow2.f32 %v4515_v22  ;;  %3963 = vst.msk [vmem:[%s6499_s14 + $0x28] sm:$0xff] %vm346_vm1, %v3931_v23  ;;  %v3676_v3 = vld [vmem:[%s6499_s14 + $0x60] sm:$0xff] }
 0x2e0   : > { %v4766_v44 = vpop.f32.mrf.mxu1  ;;  %v3996_v43 = vld [vmem:[%s6499_s14 + $0x30] sm:$0xff] }
 0x2e1   : > { %3016 = vst.msk [vmem:[%s6499_s14 + $0xc0] sm:$0xff] %vm346_vm1, %v2984_v30  ;;  %v2987_v19 = vadd.f32 %v4766_v44, %v2725_v50  ;;  %v6913_v61 = vadd.f32 %v6864_v27, %v3996_v43  ;;  %v3679_v30 = vld [vmem:[%s6499_s14 + $0x78] sm:$0xff] }
 0x2e2   : > { %v2932_v40 = vpop.f32.mrf.mxu1  ;;  %v3994_v24 = vld [vmem:[%s6499_s14 + $0x20] sm:$0xff] }
 0x2e3   : > { %3019 = vst.msk [vmem:[%s6499_s14 + $0xd8] sm:$0xff] %vm346_vm1, %v2987_v19  ;;  %v2985_v36 = vadd.f32 %v2932_v40, %v2723_v18  ;;  %v4520_v25 = vmul.f32 -1.442695, %v6913_v61  ;;  %v6921_v7 = vadd.f32 %v6864_v27, %v3994_v24 }
 0x2e4   : > { %v3997_v4 = vld [vmem:[%s6499_s14 + $0x38] sm:$0xff] }
 0x2e5   : > { %3017 = vst.msk [vmem:[%s6499_s14 + $0xc8] sm:$0xff] %vm346_vm1, %v2985_v36  ;;  %4974 = vpow2.f32 %v4520_v25  ;;  %v4518_v13 = vmul.f32 -1.442695, %v6921_v7  ;;  %v6929_v33 = vadd.f32 %v6864_v27, %v3997_v4  ;;  %v3677_v36 = vld [vmem:[%s6499_s14 + $0x68] sm:$0xff] }
 0x2e6   : > { %v4783_v21 = vpop.f32.mrf.mxu0  ;;  %v4967_v46 = vpop.eup %4966  ;;  %v3995_v6 = vld [vmem:[%s6499_s14 + $0x28] sm:$0xff] }
 0x2e7   : > { %v3936_v28 = vadd.f32 %v4783_v21, %v3674_v49  ;;  %v4159_v63 = vadd.f32 1.0, %v4967_v46  ;;  %4976 = vpow2.f32 %v4518_v13  ;;  %v4521_v38 = vmul.f32 -1.442695, %v6929_v33 }
 0x2e8   : > { %v3831_v37 = vpop.f32.mrf.mxu0  ;;  %v6934_v15 = vadd.f32 %v6864_v27, %v3995_v6  ;;  %v4969_v47 = vpop.eup %4968 }
 0x2e9   : > { %3968 = vst.msk [vmem:[%s6499_s14 + $0x50] sm:$0xff] %vm346_vm1, %v3936_v28  ;;  %v3934_v60 = vadd.f32 %v3831_v37, %v3672_v31  ;;  %4978 = vrcp.f32 %v4159_v63  ;;  %v4157_v26 = vadd.f32 1.0, %v4969_v47  ;;  %v3682_v31 = vld [vmem:[%s6499_s14 + $0x90] sm:$0xff] }
 0x2ea   : > { %v4784_v8 = vpop.f32.mrf.mxu0  ;;  %v4769_v55 = vpop.f32.mrf.mxu1  ;;  %v4519_v41 = vmul.f32 -1.442695, %v6934_v15  ;;  %4980 = vpow2.f32 %v4521_v38 }
 0x2eb   : > { %v3937_v59 = vadd.f32 %v4784_v8, %v3675_v1  ;;  %v4971_v53 = vpop.eup %4970  ;;  %3966 = vst.msk [vmem:[%s6499_s14 + $0x40] sm:$0xff] %vm346_vm1, %v3934_v60  ;;  %v2990_v5 = vadd.f32 %v4769_v55, %v2728_v57  ;;  %4982 = vrcp.f32 %v4157_v26  ;;  %v3680_v57 = vld [vmem:[%s6499_s14 + $0x80] sm:$0xff] }
 0x2ec   : > { %v3834_v51 = vpop.f32.mrf.mxu0  ;;  %v2945_v52 = vpop.f32.mrf.mxu1  ;;  %v4160_v35 = vadd.f32 1.0, %v4971_v53  ;;  %4984 = vpow2.f32 %v4519_v41 }
 0x2ed   : > { %3969 = vst.msk [vmem:[%s6499_s14 + $0x58] sm:$0xff] %vm346_vm1, %v3937_v59  ;;  %v3935_v54 = vadd.f32 %v3834_v51, %v3673_v29  ;;  %v2988_v17 = vadd.f32 %v2945_v52, %v2726_v42  ;;  %v4973_v2 = vpop.eup %4972  ;;  %3022 = vst.msk [vmem:[%s6499_s14 + $0xf0] sm:$0xff] %vm346_vm1, %v2990_v5 }
 0x2ee   : > { %v4770_v10 = vpop.f32.mrf.mxu1  ;;  %4986 = vrcp.f32 %v4160_v35  ;;  %v4158_v56 = vadd.f32 1.0, %v4973_v2 }
 0x2ef   : > { %v4787_v34 = vpop.f32.mrf.mxu0  ;;  %3967 = vst.msk [vmem:[%s6499_s14 + $0x48] sm:$0xff] %vm346_vm1, %v3935_v54  ;;  %3020 = vst.msk [vmem:[%s6499_s14 + $0xe0] sm:$0xff] %vm346_vm1, %v2988_v17  ;;  %v2991_v32 = vadd.f32 %v4770_v10, %v2729_v9  ;;  %v3683_v17 = vld [vmem:[%s6499_s14 + $0x98] sm:$0xff] }
 0x2f0   : > { %v3940_v45 = vadd.f32 %v4787_v34, %v3678_v16  ;;  %v4000_v14 = vld [vmem:[%s6499_s14 + $0x50] sm:$0xff]  ;;  %v2948_v22 = vpop.f32.mrf.mxu1  ;;  %4988 = vrcp.f32 %v4158_v56 }
 0x2f1   : > { %v3847_v20 = vpop.f32.mrf.mxu0  ;;  %v6960_v23 = vadd.f32 %v6864_v27, %v4000_v14  ;;  %3023 = vst.msk [vmem:[%s6499_s14 + $0xf8] sm:$0xff] %vm346_vm1, %v2991_v32  ;;  %v2989_v0 = vadd.f32 %v2948_v22, %v2727_v12  ;;  %v3681_v32 = vld [vmem:[%s6499_s14 + $0x88] sm:$0xff] }
 0x2f2   : > { %3972 = vst.msk [vmem:[%s6499_s14 + $0x70] sm:$0xff] %vm346_vm1, %v3940_v45  ;;  %v3938_v11 = vadd.f32 %v3847_v20, %v3676_v3  ;;  %v3998_v43 = vld [vmem:[%s6499_s14 + $0x40] sm:$0xff]  ;;  %v4975_v18 = vpop.eup %4974 }
 0x2f3   : > { %v4788_v50 = vpop.f32.mrf.mxu0  ;;  %v4524_v44 = vmul.f32 -1.442695, %v6960_v23  ;;  %3021 = vst.msk [vmem:[%s6499_s14 + $0xe8] sm:$0xff] %vm346_vm1, %v2989_v0  ;;  %v6974_v40 = vadd.f32 %v6864_v27, %v3998_v43  ;;  %v4163_v4 = vadd.f32 1.0, %v4975_v18  ;;  %v3686_v0 = vld [vmem:[%s6499_s14 + $0xb0] sm:$0xff] }
 0x2f4   : > { %3970 = vst.msk [vmem:[%s6499_s14 + $0x60] sm:$0xff] %vm346_vm1, %v3938_v11  ;;  %v3941_v19 = vadd.f32 %v4788_v50, %v3679_v30  ;;  %v4001_v24 = vld [vmem:[%s6499_s14 + $0x58] sm:$0xff]  ;;  %v4977_v13 = vpop.eup %4976  ;;  %v3684_v50 = vld [vmem:[%s6499_s14 + $0xa0] sm:$0xff] }
 0x2f5   : > { %v3850_v25 = vpop.f32.mrf.mxu0  ;;  %4990 = vpow2.f32 %v4524_v44  ;;  %v6979_v49 = vadd.f32 %v6864_v27, %v4001_v24  ;;  %v4522_v28 = vmul.f32 -1.442695, %v6974_v40  ;;  %v4161_v37 = vadd.f32 1.0, %v4977_v13 }
 0x2f6   : > { %3973 = vst.msk [vmem:[%s6499_s14 + $0x78] sm:$0xff] %vm346_vm1, %v3941_v19  ;;  %v3939_v21 = vadd.f32 %v3850_v25, %v3677_v36  ;;  %v3999_v46 = vld [vmem:[%s6499_s14 + $0x48] sm:$0xff]  ;;  %4992 = vrcp.f32 %v4163_v4  ;;  %v4979_v47 = vpop.eup %4978  ;;  %v3687_v36 = vld [vmem:[%s6499_s14 + $0xb8] sm:$0xff] }
 0x2f7   : > { %v4791_v6 = vpop.f32.mrf.mxu0  ;;  %v4525_v63 = vmul.f32 -1.442695, %v6979_v49  ;;  %v6987_v38 = vadd.f32 %v6864_v27, %v3999_v46  ;;  %4994 = vpow2.f32 %v4522_v28  ;;  %v4981_v55 = vpop.eup %4980  ;;  %v4255_v26 = vmul.f32 %v4979_v47, %v6874_v39 }
 0x2f8   : > { %3971 = vst.msk [vmem:[%s6499_s14 + $0x68] sm:$0xff] %vm346_vm1, %v3939_v21  ;;  %v3944_v1 = vadd.f32 %v4791_v6, %v3682_v31  ;;  %4996 = vrcp.f32 %v4161_v37  ;;  %v4983_v53 = vpop.eup %4982  ;;  %v4164_v5 = vadd.f32 1.0, %v4981_v55  ;;  %v3685_v37 = vld [vmem:[%s6499_s14 + $0xa8] sm:$0xff] }
 0x2f9   : > { %v4004_v60 = vld [vmem:[%s6499_s14 + $0x70] sm:$0xff]  ;;  %v3863_v8 = vpop.f32.mrf.mxu0  ;;  %v4523_v41 = vmul.f32 -1.442695, %v6987_v38  ;;  %4998 = vpow2.f32 %v4525_v63  ;;  %v4985_v39 = vpop.eup %4984  ;;  %4287 = vst.msk [vmem:[%s6499_s14 + $0x10] sm:$0xff] %vm346_vm1, %v4255_v26  ;;  %v4253_v52 = vmul.f32 %v4983_v53, %v6880_v48 }
 0x2fa   : > { %v6996_v59 = vadd.f32 %v6864_v27, %v4004_v60  ;;  %3976 = vst.msk [vmem:[%s6499_s14 + $0x90] sm:$0xff] %vm346_vm1, %v3944_v1  ;;  %v3942_v51 = vadd.f32 %v3863_v8, %v3680_v57  ;;  %v4162_v16 = vadd.f32 1.0, %v4985_v39  ;;  %v3690_v57 = vld [vmem:[%s6499_s14 + $0xd0] sm:$0xff] }
 0x2fb   : > { %v4002_v29 = vld [vmem:[%s6499_s14 + $0x60] sm:$0xff]  ;;  %v4792_v42 = vpop.f32.mrf.mxu0  ;;  %5000 = vpow2.f32 %v4523_v41  ;;  %v4987_v2 = vpop.eup %4986  ;;  %4285 = vst.msk [vmem:[%s6499_s14] sm:$0xff] %vm346_vm1, %v4253_v52 }
 0x2fc   : > { %v4528_v35 = vmul.f32 -1.442695, %v6996_v59  ;;  %v7007_v54 = vadd.f32 %v6864_v27, %v4002_v29  ;;  %5002 = vrcp.f32 %v4164_v5  ;;  %3974 = vst.msk [vmem:[%s6499_s14 + $0x80] sm:$0xff] %vm346_vm1, %v3942_v51  ;;  %v3945_v9 = vadd.f32 %v4792_v42, %v3683_v17  ;;  %v3688_v17 = vld [vmem:[%s6499_s14 + $0xc0] sm:$0xff] }
 0x2fd   : > { %v4005_v34 = vld [vmem:[%s6499_s14 + $0x78] sm:$0xff]  ;;  %v3866_v10 = vpop.f32.mrf.mxu0  ;;  %v4256_v48 = vmul.f32 %v4987_v2, %v6886_v62  ;;  %v4989_v14 = vpop.eup %4988 }
 0x2fe   : > { %5004 = vpow2.f32 %v4528_v35  ;;  %v4526_v56 = vmul.f32 -1.442695, %v7007_v54  ;;  %v7018_v45 = vadd.f32 %v6864_v27, %v4005_v34  ;;  %3977 = vst.msk [vmem:[%s6499_s14 + $0x98] sm:$0xff] %vm346_vm1, %v3945_v9  ;;  %v3943_v20 = vadd.f32 %v3866_v10, %v3681_v32 }
 0x2ff   : > { %5006 = vrcp.f32 %v4162_v16  ;;  %v4003_v3 = vld [vmem:[%s6499_s14 + $0x68] sm:$0xff]  ;;  %v4795_v12 = vpop.f32.mrf.mxu0  ;;  %4288 = vst.msk [vmem:[%s6499_s14 + $0x18] sm:$0xff] %vm346_vm1, %v4256_v48  ;;  %v4254_v62 = vmul.f32 %v4989_v14, %v6894_v58 }
 0x300   : > { %5008 = vpow2.f32 %v4526_v56  ;;  %v4529_v22 = vmul.f32 -1.442695, %v7018_v45  ;;  %v7029_v11 = vadd.f32 %v6864_v27, %v4003_v3  ;;  %3975 = vst.msk [vmem:[%s6499_s14 + $0x88] sm:$0xff] %vm346_vm1, %v3943_v20  ;;  %v3948_v30 = vadd.f32 %v4795_v12, %v3686_v0  ;;  %v3691_v3 = vld [vmem:[%s6499_s14 + $0xd8] sm:$0xff] }
 0x301   : > { %v3879_v44 = vpop.f32.mrf.mxu0  ;;  %4286 = vst.msk [vmem:[%s6499_s14 + $0x8] sm:$0xff] %vm346_vm1, %v4254_v62  ;;  %v4008_v43 = vld [vmem:[%s6499_s14 + $0x90] sm:$0xff] }
 0x302   : > { %5010 = vpow2.f32 %v4529_v22  ;;  %v4527_v58 = vmul.f32 -1.442695, %v7029_v11  ;;  %v3946_v19 = vadd.f32 %v3879_v44, %v3684_v50  ;;  %v4991_v18 = vpop.eup %4990  ;;  %v7040_v24 = vadd.f32 %v6864_v27, %v4008_v43  ;;  %3980 = vst.msk [vmem:[%s6499_s14 + $0xb0] sm:$0xff] %vm346_vm1, %v3948_v30 }
 0x303   : > { %v4796_v25 = vpop.f32.mrf.mxu0  ;;  %v4167_v4 = vadd.f32 1.0, %v4991_v18  ;;  %v4006_v21 = vld [vmem:[%s6499_s14 + $0x80] sm:$0xff]  ;;  %v4993_v28 = vpop.eup %4992  ;;  %v3689_v18 = vld [vmem:[%s6499_s14 + $0xc8] sm:$0xff] }
 0x304   : > { %5012 = vpow2.f32 %v4527_v58  ;;  %3978 = vst.msk [vmem:[%s6499_s14 + $0xa0] sm:$0xff] %vm346_vm1, %v3946_v19  ;;  %v3949_v13 = vadd.f32 %v4796_v25, %v3687_v36  ;;  %v4532_v46 = vmul.f32 -1.442695, %v7040_v24  ;;  %v7050_v6 = vadd.f32 %v6864_v27, %v4006_v21  ;;  %v4995_v31 = vpop.eup %4994 }
 0x305   : > { %v3882_v63 = vpop.f32.mrf.mxu0  ;;  %v4259_v47 = vmul.f32 %v4993_v28, %v6913_v61  ;;  %5014 = vrcp.f32 %v4167_v4  ;;  %v4009_v60 = vld [vmem:[%s6499_s14 + $0x98] sm:$0xff]  ;;  %v4997_v8 = vpop.eup %4996  ;;  %v4165_v55 = vadd.f32 1.0, %v4995_v31 }
 0x306   : > { %3981 = vst.msk [vmem:[%s6499_s14 + $0xb8] sm:$0xff] %vm346_vm1, %v3949_v13  ;;  %v3947_v1 = vadd.f32 %v3882_v63, %v3685_v37  ;;  %5016 = vpow2.f32 %v4532_v46  ;;  %v4530_v26 = vmul.f32 -1.442695, %v7050_v6  ;;  %v7059_v41 = vadd.f32 %v6864_v27, %v4009_v60  ;;  %v4999_v5 = vpop.eup %4998  ;;  %v3694_v46 = vld [vmem:[%s6499_s14 + $0xf0] sm:$0xff] }
 0x307   : > { %v4799_v53 = vpop.f32.mrf.mxu0  ;;  %4291 = vst.msk [vmem:[%s6499_s14 + $0x30] sm:$0xff] %vm346_vm1, %v4259_v47  ;;  %v4257_v61 = vmul.f32 %v4997_v8, %v6921_v7  ;;  %v4007_v29 = vld [vmem:[%s6499_s14 + $0x88] sm:$0xff]  ;;  %5018 = vrcp.f32 %v4165_v55  ;;  %v4168_v39 = vadd.f32 1.0, %v4999_v5 }
 0x308   : > { %3979 = vst.msk [vmem:[%s6499_s14 + $0xa8] sm:$0xff] %vm346_vm1, %v3947_v1  ;;  %v3952_v51 = vadd.f32 %v4799_v53, %v3690_v57  ;;  %v5001_v42 = vpop.eup %5000  ;;  %v4533_v52 = vmul.f32 -1.442695, %v7059_v41  ;;  %v7070_v35 = vadd.f32 %v6864_v27, %v4007_v29  ;;  %5020 = vpow2.f32 %v4530_v26  ;;  %v3692_v26 = vld [vmem:[%s6499_s14 + $0xe0] sm:$0xff] }
 0x309   : > { %v3895_v2 = vpop.f32.mrf.mxu0  ;;  %v5003_v16 = vpop.eup %5002  ;;  %4289 = vst.msk [vmem:[%s6499_s14 + $0x20] sm:$0xff] %vm346_vm1, %v4257_v61  ;;  %v4166_v7 = vadd.f32 1.0, %v5001_v42  ;;  %v4012_v34 = vld [vmem:[%s6499_s14 + $0xb0] sm:$0xff]  ;;  %5022 = vrcp.f32 %v4168_v39 }
 0x30a   : > { %3984 = vst.msk [vmem:[%s6499_s14 + $0xd0] sm:$0xff] %vm346_vm1, %v3952_v51  ;;  %v3950_v9 = vadd.f32 %v3895_v2, %v3688_v17  ;;  %v4260_v48 = vmul.f32 %v5003_v16, %v6929_v33  ;;  %v4531_v56 = vmul.f32 -1.442695, %v7070_v35  ;;  %v7081_v32 = vadd.f32 %v6864_v27, %v4012_v34 }
 0x30b   : > { %v5005_v10 = vpop.eup %5004  ;;  %v4010_v14 = vld [vmem:[%s6499_s14 + $0xa0] sm:$0xff]  ;;  %v4800_v20 = vpop.f32.mrf.mxu0  ;;  %5024 = vrcp.f32 %v4166_v7  ;;  %v3693_v7 = vld [vmem:[%s6499_s14 + $0xe8] sm:$0xff] }
 0x30c   : > { %v5007_v12 = vpop.eup %5006  ;;  %v4171_v62 = vadd.f32 1.0, %v5005_v10  ;;  %v7086_v22 = vadd.f32 %v6864_v27, %v4010_v14  ;;  %3982 = vst.msk [vmem:[%s6499_s14 + $0xc0] sm:$0xff] %vm346_vm1, %v3950_v9  ;;  %v3953_v33 = vadd.f32 %v4800_v20, %v3691_v3  ;;  %4292 = vst.msk [vmem:[%s6499_s14 + $0x38] sm:$0xff] %vm346_vm1, %v4260_v48  ;;  %5026 = vpow2.f32 %v4533_v52  ;;  %v3695_v52 = vld [vmem:[%s6499_s14 + $0xf8] sm:$0xff] }
 0x30d   : > { %v5009_v0 = vpop.eup %5008  ;;  %v4258_v30 = vmul.f32 %v5007_v12, %v6934_v15  ;;  %v4536_v50 = vmul.f32 -1.442695, %v7081_v32  ;;  %v4013_v44 = vld [vmem:[%s6499_s14 + $0xb8] sm:$0xff]  ;;  %v3898_v58 = vpop.f32.mrf.mxu0 }
 0x30e   : > { %5028 = vrcp.f32 %v4171_v62  ;;  %v4169_v43 = vadd.f32 1.0, %v5009_v0  ;;  %v7096_v19 = vadd.f32 %v6864_v27, %v4013_v44  ;;  %3985 = vst.msk [vmem:[%s6499_s14 + $0xd8] sm:$0xff] %vm346_vm1, %v3953_v33  ;;  %v4534_v15 = vmul.f32 -1.442695, %v7086_v22 }
 0x30f   : > { %v5011_v36 = vpop.eup %5010  ;;  %4290 = vst.msk [vmem:[%s6499_s14 + $0x28] sm:$0xff] %vm346_vm1, %v4258_v30  ;;  %5030 = vpow2.f32 %v4531_v56  ;;  %v4011_v25 = vld [vmem:[%s6499_s14 + $0xa8] sm:$0xff]  ;;  %v3951_v4 = vadd.f32 %v3898_v58, %v3689_v18  ;;  %v4803_v21 = vpop.f32.mrf.mxu0 }
 0x310   : > { %5032 = vrcp.f32 %v4169_v43  ;;  %v4172_v13 = vadd.f32 1.0, %v5011_v36  ;;  %v7106_v28 = vadd.f32 %v6864_v27, %v4011_v25  ;;  %v4537_v63 = vmul.f32 -1.442695, %v7096_v19 }
 0x311   : > { %v5013_v37 = vpop.eup %5012  ;;  %5034 = vpow2.f32 %v4536_v50  ;;  %v4016_v31 = vld [vmem:[%s6499_s14 + $0xd0] sm:$0xff]  ;;  %3983 = vst.msk [vmem:[%s6499_s14 + $0xc8] sm:$0xff] %vm346_vm1, %v3951_v4  ;;  %v3956_v47 = vadd.f32 %v4803_v21, %v3694_v46  ;;  %v3911_v60 = vpop.f32.mrf.mxu0 }
 0x312   : > { %5036 = vrcp.f32 %v4172_v13  ;;  %v4170_v1 = vadd.f32 1.0, %v5013_v37  ;;  %v4535_v8 = vmul.f32 -1.442695, %v7106_v28  ;;  %v7115_v55 = vadd.f32 %v6864_v27, %v4016_v31  ;;  %v5015_v57 = vpop.eup %5014 }
 0x313   : > { %5038 = vpow2.f32 %v4534_v15  ;;  %v4014_v53 = vld [vmem:[%s6499_s14 + $0xc0] sm:$0xff]  ;;  %3988 = vst.msk [vmem:[%s6499_s14 + $0xf0] sm:$0xff] %vm346_vm1, %v3956_v47  ;;  %v3954_v5 = vadd.f32 %v3911_v60, %v3692_v26  ;;  %v4804_v61 = vpop.f32.mrf.mxu0  ;;  %v5017_v29 = vpop.eup %5016  ;;  %v4263_v51 = vmul.f32 %v5015_v57, %v6960_v23 }
 0x314   : > { %5040 = vrcp.f32 %v4170_v1  ;;  %v4540_v42 = vmul.f32 -1.442695, %v7115_v55  ;;  %v7124_v39 = vadd.f32 %v6864_v27, %v4014_v53  ;;  %v4175_v17 = vadd.f32 1.0, %v5017_v29  ;;  %v5019_v9 = vpop.eup %5018 }
 0x315   : > { %5042 = vpow2.f32 %v4537_v63  ;;  %v4017_v2 = vld [vmem:[%s6499_s14 + $0xd8] sm:$0xff]  ;;  %3986 = vst.msk [vmem:[%s6499_s14 + $0xe0] sm:$0xff] %vm346_vm1, %v3954_v5  ;;  %v3957_v16 = vadd.f32 %v4804_v61, %v3695_v52  ;;  %v3914_v34 = vpop.f32.mrf.mxu0  ;;  %4295 = vst.msk [vmem:[%s6499_s14 + $0x50] sm:$0xff] %vm346_vm1, %v4263_v51  ;;  %v5021_v56 = vpop.eup %5020  ;;  %v4261_v14 = vmul.f32 %v5019_v9, %v6974_v40 }
 0x316   : > { %5044 = vpow2.f32 %v4535_v8  ;;  %v4538_v23 = vmul.f32 -1.442695, %v7124_v39  ;;  %v7135_v10 = vadd.f32 %v6864_v27, %v4017_v2  ;;  %v3955_v48 = vadd.f32 %v3914_v34, %v3693_v7  ;;  %v5023_v3 = vpop.eup %5022 }
 0x317   : > { %5046 = vrcp.f32 %v4175_v17  ;;  %3989 = vst.msk [vmem:[%s6499_s14 + $0xf8] sm:$0xff] %vm346_vm1, %v3957_v16  ;;  %v4173_v20 = vadd.f32 1.0, %v5021_v56  ;;  %4293 = vst.msk [vmem:[%s6499_s14 + $0x40] sm:$0xff] %vm346_vm1, %v4261_v14  ;;  %v4264_v0 = vmul.f32 %v5023_v3, %v6979_v49 }
 0x318   : > { %5048 = vpow2.f32 %v4540_v42  ;;  %v4541_v12 = vmul.f32 -1.442695, %v7135_v10  ;;  %v4015_v62 = vld [vmem:[%s6499_s14 + $0xc8] sm:$0xff]  ;;  %3987 = vst.msk [vmem:[%s6499_s14 + $0xe8] sm:$0xff] %vm346_vm1, %v3955_v48  ;;  %v5025_v33 = vpop.eup %5024 }
 0x319   : > { %5050 = vpow2.f32 %v4538_v23  ;;  %v7148_v40 = vadd.f32 %v6864_v27, %v4015_v62  ;;  %v5027_v30 = vpop.eup %5026  ;;  %v4262_v50 = vmul.f32 %v5025_v33, %v6987_v38  ;;  %4296 = vst.msk [vmem:[%s6499_s14 + $0x58] sm:$0xff] %vm346_vm1, %v4264_v0 }
 0x31a   : > { %5052 = vrcp.f32 %v4173_v20  ;;  %v4020_v44 = vld [vmem:[%s6499_s14 + $0xf0] sm:$0xff]  ;;  %v4176_v43 = vadd.f32 1.0, %v5027_v30 }
 0x31b   : > { %v5029_v58 = vpop.eup %5028  ;;  %5054 = vpow2.f32 %v4541_v12  ;;  %v4539_v18 = vmul.f32 -1.442695, %v7148_v40  ;;  %v7156_v49 = vadd.f32 %v6864_v27, %v4020_v44  ;;  %4294 = vst.msk [vmem:[%s6499_s14 + $0x48] sm:$0xff] %vm346_vm1, %v4262_v50 }
 0x31c   : > { %v5031_v36 = vpop.eup %5030  ;;  %v4267_v15 = vmul.f32 %v5029_v58, %v6996_v59  ;;  %v4018_v38 = vld [vmem:[%s6499_s14 + $0xe0] sm:$0xff]  ;;  %5056 = vrcp.f32 %v4176_v43 }
 0x31d   : > { %v5033_v25 = vpop.eup %5032  ;;  %v4174_v4 = vadd.f32 1.0, %v5031_v36  ;;  %v4544_v21 = vmul.f32 -1.442695, %v7156_v49  ;;  %v7164_v13 = vadd.f32 %v6864_v27, %v4018_v38  ;;  %5058 = vpow2.f32 %v4539_v18 }
 0x31e   : > { %v5035_v46 = vpop.eup %5034  ;;  %4299 = vst.msk [vmem:[%s6499_s14 + $0x70] sm:$0xff] %vm346_vm1, %v4267_v15  ;;  %v4265_v37 = vmul.f32 %v5033_v25, %v7007_v54  ;;  %v4021_v63 = vld [vmem:[%s6499_s14 + $0xf8] sm:$0xff] }
 0x31f   : > { %v5037_v31 = vpop.eup %5036  ;;  %5060 = vrcp.f32 %v4174_v4  ;;  %v4179_v59 = vadd.f32 1.0, %v5035_v46  ;;  %v4542_v47 = vmul.f32 -1.442695, %v7164_v13  ;;  %v7172_v60 = vadd.f32 %v6864_v27, %v4021_v63  ;;  %v4019_v1 = vld [vmem:[%s6499_s14 + $0xe8] sm:$0xff] }
 0x320   : > { %v5039_v8 = vpop.eup %5038  ;;  %4297 = vst.msk [vmem:[%s6499_s14 + $0x60] sm:$0xff] %vm346_vm1, %v4265_v37  ;;  %v4268_v26 = vmul.f32 %v5037_v31, %v7018_v45  ;;  %5062 = vpow2.f32 %v4544_v21  ;;  %v7179_v54 = vadd.f32 %v6864_v27, %v4019_v1 }
 0x321   : > { %v5041_v57 = vpop.eup %5040  ;;  %5064 = vrcp.f32 %v4179_v59  ;;  %v4177_v53 = vadd.f32 1.0, %v5039_v8  ;;  %v4545_v5 = vmul.f32 -1.442695, %v7172_v60 }
 0x322   : > { %v5043_v61 = vpop.eup %5042  ;;  %4300 = vst.msk [vmem:[%s6499_s14 + $0x78] sm:$0xff] %vm346_vm1, %v4268_v26  ;;  %v4266_v29 = vmul.f32 %v5041_v57, %v7029_v11  ;;  %5066 = vpow2.f32 %v4542_v47  ;;  %v4543_v42 = vmul.f32 -1.442695, %v7179_v54 }
 0x323   : > { %v5045_v51 = vpop.eup %5044  ;;  %5068 = vrcp.f32 %v4177_v53  ;;  %v4180_v45 = vadd.f32 1.0, %v5043_v61 }
 0x324   : > { %v5047_v52 = vpop.eup %5046  ;;  %4298 = vst.msk [vmem:[%s6499_s14 + $0x68] sm:$0xff] %vm346_vm1, %v4266_v29  ;;  %v4178_v27 = vadd.f32 1.0, %v5045_v51  ;;  %5070 = vpow2.f32 %v4545_v5 }
 0x325   : > { %v5049_v17 = vpop.eup %5048  ;;  %v4271_v2 = vmul.f32 %v5047_v52, %v7040_v24  ;;  %5072 = vrcp.f32 %v4180_v45 }
 0x326   : > { %v5051_v16 = vpop.eup %5050  ;;  %5074 = vrcp.f32 %v4178_v27  ;;  %v4183_v11 = vadd.f32 1.0, %v5049_v17 }
 0x327   : > { %v5053_v7 = vpop.eup %5052  ;;  %4303 = vst.msk [vmem:[%s6499_s14 + $0x90] sm:$0xff] %vm346_vm1, %v4271_v2  ;;  %v4181_v34 = vadd.f32 1.0, %v5051_v16  ;;  %5076 = vpow2.f32 %v4543_v42 }
 0x328   : > { %v5055_v9 = vpop.eup %5054  ;;  %v4269_v23 = vmul.f32 %v5053_v7, %v7050_v6  ;;  %5078 = vrcp.f32 %v4183_v11 }
 0x329   : > { %5080 = vrcp.f32 %v4181_v34  ;;  %v4184_v48 = vadd.f32 1.0, %v5055_v9  ;;  %v5057_v56 = vpop.eup %5056 }
 0x32a   : > { %4301 = vst.msk [vmem:[%s6499_s14 + $0x80] sm:$0xff] %vm346_vm1, %v4269_v23  ;;  %v5059_v24 = vpop.eup %5058  ;;  %v4272_v14 = vmul.f32 %v5057_v56, %v7059_v41 }
 0x32b   : > { %5082 = vrcp.f32 %v4184_v48  ;;  %v4182_v20 = vadd.f32 1.0, %v5059_v24 }
 0x32c   : > { %v5061_v3 = vpop.eup %5060  ;;  %4304 = vst.msk [vmem:[%s6499_s14 + $0x98] sm:$0xff] %vm346_vm1, %v4272_v14 }
 0x32d   : > { %v5063_v12 = vpop.eup %5062  ;;  %v4270_v62 = vmul.f32 %v5061_v3, %v7070_v35  ;;  %5084 = vrcp.f32 %v4182_v20 }
 0x32e   : > { %v5065_v6 = vpop.eup %5064  ;;  %v4187_v33 = vadd.f32 1.0, %v5063_v12 }
 0x32f   : > { %v5067_v0 = vpop.eup %5066  ;;  %4302 = vst.msk [vmem:[%s6499_s14 + $0x88] sm:$0xff] %vm346_vm1, %v4270_v62  ;;  %v4275_v30 = vmul.f32 %v5065_v6, %v7081_v32 }
 0x330   : > { %v5069_v50 = vpop.eup %5068  ;;  %5086 = vrcp.f32 %v4187_v33  ;;  %v4185_v41 = vadd.f32 1.0, %v5067_v0 }
 0x331   : > { %v5071_v44 = vpop.eup %5070  ;;  %4307 = vst.msk [vmem:[%s6499_s14 + $0xb0] sm:$0xff] %vm346_vm1, %v4275_v30  ;;  %v4273_v58 = vmul.f32 %v5069_v50, %v7086_v22 }
 0x332   : > { %v5073_v35 = vpop.eup %5072  ;;  %5088 = vrcp.f32 %v4185_v41  ;;  %v4188_v43 = vadd.f32 1.0, %v5071_v44 }
 0x333   : > { %v5075_v18 = vpop.eup %5074  ;;  %4305 = vst.msk [vmem:[%s6499_s14 + $0xa0] sm:$0xff] %vm346_vm1, %v4273_v58  ;;  %v4276_v32 = vmul.f32 %v5073_v35, %v7096_v19 }
 0x334   : > { %v5077_v36 = vpop.eup %5076  ;;  %v4274_v15 = vmul.f32 %v5075_v18, %v7106_v28  ;;  %5090 = vrcp.f32 %v4188_v43 }
 0x335   : > { %v5079_v38 = vpop.eup %5078  ;;  %4308 = vst.msk [vmem:[%s6499_s14 + $0xb8] sm:$0xff] %vm346_vm1, %v4276_v32  ;;  %v4186_v22 = vadd.f32 1.0, %v5077_v36 }
 0x336   : > { %v5081_v25 = vpop.eup %5080  ;;  %4306 = vst.msk [vmem:[%s6499_s14 + $0xa8] sm:$0xff] %vm346_vm1, %v4274_v15  ;;  %v4279_v4 = vmul.f32 %v5079_v38, %v7115_v55 }
 0x337   : > { %v4277_v21 = vmul.f32 %v5081_v25, %v7124_v39  ;;  %5092 = vrcp.f32 %v4186_v22 }
 0x338   : > { %v5083_v19 = vpop.eup %5082  ;;  %4311 = vst.msk [vmem:[%s6499_s14 + $0xd0] sm:$0xff] %vm346_vm1, %v4279_v4 }
 0x339   : > { %4309 = vst.msk [vmem:[%s6499_s14 + $0xc0] sm:$0xff] %vm346_vm1, %v4277_v21  ;;  %v4280_v28 = vmul.f32 %v5083_v19, %v7135_v10 }
 0x33a   : > { %v5085_v46 = vpop.eup %5084 }
 0x33b   : > { %4312 = vst.msk [vmem:[%s6499_s14 + $0xd8] sm:$0xff] %vm346_vm1, %v4280_v28  ;;  %v4278_v37 = vmul.f32 %v5085_v46, %v7148_v40 }
 0x33d   : > { %v5087_v63 = vpop.eup %5086  ;;  %4310 = vst.msk [vmem:[%s6499_s14 + $0xc8] sm:$0xff] %vm346_vm1, %v4278_v37 }
 0x33e   : > { %v4283_v55 = vmul.f32 %v5087_v63, %v7156_v49 }
 0x33f   : > { %v5089_v39 = vpop.eup %5088 }
 0x340   : > { %4315 = vst.msk [vmem:[%s6499_s14 + $0xf0] sm:$0xff] %vm346_vm1, %v4283_v55  ;;  %v4281_v31 = vmul.f32 %v5089_v39, %v7164_v13 }
 0x341   : > { %v5091_v59 = vpop.eup %5090 }
 0x342   : > { %4313 = vst.msk [vmem:[%s6499_s14 + $0xe0] sm:$0xff] %vm346_vm1, %v4281_v31  ;;  %v4284_v10 = vmul.f32 %v5091_v59, %v7172_v60 }
 0x344   : > { %v5093_v47 = vpop.eup %5092  ;;  %4316 = vst.msk [vmem:[%s6499_s14 + $0xf8] sm:$0xff] %vm346_vm1, %v4284_v10 }
 0x345   : > { %v4282_v40 = vmul.f32 %v5093_v47, %v7179_v54 }
 0x347   : > { %4314 = vst.msk [vmem:[%s6499_s14 + $0xe8] sm:$0xff] %vm346_vm1, %v4282_v40 }
 0x348 PF: > { %s15_s18 = sadd.s32 1, %s5104_s18  }
 0x349   : > { %p12_p4 = scmp.ge.s32.totalorder %s15_s18, 4  }
 0x34b   :  { %14 = sbr.rel (!%p12_p4) target bundleno = 1 (0x1), region = 78 }

</bundles_post_ra>
